<compile_context>
chip_gen: v7x
topology: tpu7x:2x2x1
jax: 0.10.0
libtpu: 0.0.40
codegen_flags: <defaults>
</compile_context>

<pallas_src>
import math
from functools import partial

import jax
import jax.numpy as jnp
from jax.experimental import pallas as pl
from jax.experimental.pallas import tpu as pltpu  # noqa: F401  (used by the large-model grid fallback)


# ----------------------------- shared math helpers -----------------------------

def _layernorm(x, g, b, eps=1e-5):
    mu = jnp.mean(x, axis=-1, keepdims=True)
    xc = x - mu
    var = jnp.mean(xc * xc, axis=-1, keepdims=True)
    return xc * jax.lax.rsqrt(var + eps) * g + b


# ----------------------------- fused Pallas kernel -----------------------------

def fused_encoder_kernel(x_ref, pe_ref, ng_ref, nb_ref,
                         wq_ref, wk_ref, wv_ref,
                         bq_ref, bk_ref, bv_ref,
                         wo_ref, bo_ref,
                         ln1g_ref, ln1b_ref,
                         w1_ref, b1_ref, w2_ref, b2_ref,
                         ln2g_ref, ln2b_ref,
                         o_ref, *, num_heads, pre_norm):
    """Whole encoder stack in one invocation (all weights VMEM-resident).

    Attention is batched over b = B*H using host-pre-arranged per-head weights:
      wq/wk/wv: [L, B*H, D, dh]   bq/bk/bv: [L, B*H, 1, dh]   wo: [L, B*H, dh, D]
    """
    B, S, D = x_ref.shape
    L = wq_ref.shape[0]
    H = num_heads
    dh = D // H
    scale = 1.0 / math.sqrt(dh)
    f32 = jnp.float32

    # positional encoding (broadcast over batch) + optional outer pre-norm
    x = x_ref[...] + pe_ref[...]                       # (B,S,D) + (S,D)
    if pre_norm:
        x = _layernorm(x, ng_ref[...], nb_ref[...])

    for l in range(L):                                 # L is static -> unrolled
        # ---- multi-head self-attention, heads merged into the batch axis ----
        xh = jnp.broadcast_to(x[:, None], (B, H, S, D)).reshape(B * H, S, D)
        q = jnp.einsum('bsd,bdf->bsf', xh, wq_ref[l],
                       preferred_element_type=f32) + bq_ref[l]       # (B*H,S,dh)
        k = jnp.einsum('bsd,bdf->bsf', xh, wk_ref[l],
                       preferred_element_type=f32) + bk_ref[l]
        v = jnp.einsum('bsd,bdf->bsf', xh, wv_ref[l],
                       preferred_element_type=f32) + bv_ref[l]

        s = jnp.einsum('bqd,bkd->bqk', q, k,
                       preferred_element_type=f32) * scale            # (B*H,S,S)
        s = s - jnp.max(s, axis=-1, keepdims=True)
        p = jnp.exp(s)
        # exact normalization (use approx=True for inference-only deployments)
        p = p * pl.reciprocal(jnp.sum(p, axis=-1, keepdims=True), approx=False)
        o = jnp.einsum('bqk,bkd->bqd', p, v,
                       preferred_element_type=f32)                    # (B*H,S,dh)

        # output projection, head-batched; concat(o_h) @ Wo == sum_h o_h @ Wo_h
        oproj = jnp.einsum('bsd,bdf->bsf', o, wo_ref[l],
                           preferred_element_type=f32)                # (B*H,S,D)
        attn = jnp.sum(oproj.reshape(B, H, S, D), axis=1) + bo_ref[l]  # (B,S,D)

        # residual + LayerNorm1 (post-norm layer, norm_first=False)
        x = _layernorm(x + attn, ln1g_ref[l], ln1b_ref[l])

        # ---- feed-forward (relu) + residual + LayerNorm2 ----
        x2 = x.reshape(B * S, D)
        h1 = jnp.dot(x2, w1_ref[l], preferred_element_type=f32) + b1_ref[l]
        h1 = jnp.maximum(h1, 0.0)
        ff = jnp.dot(h1, w2_ref[l], preferred_element_type=f32) + b2_ref[l]
        x = _layernorm(x + ff.reshape(B, S, D), ln2g_ref[l], ln2b_ref[l])

    if not pre_norm:
        x = _layernorm(x, ng_ref[...], nb_ref[...])
    o_ref[...] = x.astype(o_ref.dtype)


# ----------------------------- pallas_call wrapper -----------------------------

@partial(jax.jit, static_argnames=("num_heads", "pre_norm"))
def transformer_encoder_forward(x, kp, *, num_heads, pre_norm=True):
    B, S, D = x.shape
    # Single fused invocation: no grid, no BlockSpec pipelining needed — every
    # operand is a whole-array VMEM block (total footprint << scoped VMEM limit).
    return pl.pallas_call(
        partial(fused_encoder_kernel, num_heads=num_heads, pre_norm=pre_norm),
        out_shape=jax.ShapeDtypeStruct((B, S, D), x.dtype),
    )(x, kp["pe"], kp["norm_g"], kp["norm_b"],
      kp["wq"], kp["wk"], kp["wv"], kp["bq"], kp["bk"], kp["bv"],
      kp["wo_h"], kp["bo"],
      kp["ln1g"], kp["ln1b"], kp["w1"], kp["b1"], kp["w2"], kp["b2"],
      kp["ln2g"], kp["ln2b"])


# ----------------------------- host-side weight relayout -----------------------------

def prepare_kernel_params(params, *, num_heads, batch):
    """One-time relayout of attention weights into head-stacked, B-tiled form.

    Q/K/V: [L, D, D] column-blocks  -> [L, B*H, D, dh]
    Wo   : [L, D, D] row-blocks     -> [L, B*H, dh, D]
    so every in-kernel contraction is a single-batch-dim 3-D einsum with b = B*H.
    """
    wqkv, bqkv, wo = params["wqkv"], params["bqkv"], params["wo"]
    L, D, _ = wqkv.shape
    H, B = num_heads, batch
    dh = D // H

    def w_heads(w):                                   # (L, D, H*dh) -> (L, B*H, D, dh)
        w = jnp.transpose(w.reshape(L, D, H, dh), (0, 2, 1, 3))        # (L,H,D,dh)
        return jnp.broadcast_to(w[:, None], (L, B, H, D, dh)).reshape(L, B * H, D, dh)

    def b_heads(b):                                   # (L, 1, H*dh) -> (L, B*H, 1, dh)
        b = b.reshape(L, H, dh)[:, :, None, :]                         # (L,H,1,dh)
        return jnp.broadcast_to(b[:, None], (L, B, H, 1, dh)).reshape(L, B * H, 1, dh)

    wo_h = jnp.broadcast_to(wo.reshape(L, H, dh, D)[:, None],
                            (L, B, H, dh, D)).reshape(L, B * H, dh, D)

    kp = {k: v for k, v in params.items() if k not in ("wqkv", "bqkv", "wo")}
    kp.update(
        wq=w_heads(wqkv[:, :, 0 * D:1 * D]),
        wk=w_heads(wqkv[:, :, 1 * D:2 * D]),
        wv=w_heads(wqkv[:, :, 2 * D:3 * D]),
        bq=b_heads(bqkv[:, :, 0 * D:1 * D]),
        bk=b_heads(bqkv[:, :, 1 * D:2 * D]),
        bv=b_heads(bqkv[:, :, 2 * D:3 * D]),
        wo_h=wo_h,
    )
    return kp


# ----------------------------- parameter init -----------------------------

def sinusoidal_pe(seq_len, d_model):
    pos = jnp.arange(seq_len, dtype=jnp.float32)[:, None]
    div = jnp.exp(jnp.arange(0, d_model, 2, dtype=jnp.float32) *
                  (-math.log(10000.0) / d_model))
    pe = jnp.zeros((seq_len, d_model), jnp.float32)
    pe = pe.at[:, 0::2].set(jnp.sin(pos * div))
    pe = pe.at[:, 1::2].set(jnp.cos(pos * div))
    return pe


def init_params(key, embed_dim, ff_dim, num_layers, seq_len):
    """Weights stored (in_features, out_features), stacked along a layer axis."""
    D, FF, L = embed_dim, ff_dim, num_layers

    def n(k, shape):
        return (0.02 * jax.random.normal(k, shape)).astype(jnp.float32)

    ks = jax.random.split(key, 6)
    return {
        "pe": sinusoidal_pe(seq_len, D),
        "norm_g": jnp.ones((1, D), jnp.float32),
        "norm_b": jnp.zeros((1, D), jnp.float32),
        "wqkv": n(ks[0], (L, D, 3 * D)),
        "bqkv": n(ks[1], (L, 1, 3 * D)),
        "wo":   n(ks[2], (L, D, D)),
        "bo":   jnp.zeros((L, 1, D), jnp.float32),
        "ln1g": jnp.ones((L, 1, D), jnp.float32),
        "ln1b": jnp.zeros((L, 1, D), jnp.float32),
        "w1":   n(ks[3], (L, D, FF)),
        "b1":   n(ks[4], (L, 1, FF)),
        "w2":   n(ks[5], (L, FF, D)),
        "b2":   jnp.zeros((L, 1, D), jnp.float32),
        "ln2g": jnp.ones((L, 1, D), jnp.float32),
        "ln2b": jnp.zeros((L, 1, D), jnp.float32),
    }


# ----------------------------- pure-JAX reference -----------------------------

def reference_forward(x, params, *, num_heads, pre_norm=True):
    B, S, D = x.shape
    H = num_heads
    dh = D // H
    x = x + params["pe"][None]
    if pre_norm:
        x = _layernorm(x, params["norm_g"], params["norm_b"])
    L = params["wqkv"].shape[0]
    for l in range(L):
        qkv = x @ params["wqkv"][l] + params["bqkv"][l]
        q, k, v = jnp.split(qkv, 3, axis=-1)
        q = q.reshape(B, S, H, dh).transpose(0, 2, 1, 3)
        k = k.reshape(B, S, H, dh).transpose(0, 2, 1, 3)
        v = v.reshape(B, S, H, dh).transpose(0, 2, 1, 3)
        s = (q @ k.transpose(0, 1, 3, 2)) / math.sqrt(dh)
        p = jax.nn.softmax(s, axis=-1)
        attn = (p @ v).transpose(0, 2, 1, 3).reshape(B, S, D)
        attn = attn @ params["wo"][l] + params["bo"][l]
        x = _layernorm(x + attn, params["ln1g"][l], params["ln1b"][l])
        hmid = jnp.maximum(x @ params["w1"][l] + params["b1"][l], 0.0)
        x = _layernorm(x + hmid @ params["w2"][l] + params["b2"][l],
                       params["ln2g"][l], params["ln2b"][l])
    if not pre_norm:
        x = _layernorm(x, params["norm_g"], params["norm_b"])
    return x


# ----------------------------- main -----------------------------

if __name__ == "__main__":
    BATCH, SEQ, EMBED_DIM = 2, 8, 32
    NUM_HEADS, FF_DIM, NUM_LAYERS = 4, 64, 2

    key = jax.random.PRNGKey(0)
    kx, kp_key = jax.random.split(key)
    x = jax.random.normal(kx, (BATCH, SEQ, EMBED_DIM), jnp.float32)
    params = init_params(kp_key, EMBED_DIM, FF_DIM, NUM_LAYERS, SEQ)
    kparams = prepare_kernel_params(params, num_heads=NUM_HEADS, batch=BATCH)

    for pre_norm in (True, False):
        out = transformer_encoder_forward(x, kparams,
                                          num_heads=NUM_HEADS, pre_norm=pre_norm)
        out = jax.block_until_ready(out)
        ref = reference_forward(x, params, num_heads=NUM_HEADS, pre_norm=pre_norm)
        assert out.shape == (BATCH, SEQ, EMBED_DIM)
        err = float(jnp.max(jnp.abs(out - ref)))
        assert jnp.allclose(out, ref, atol=1e-3, rtol=1e-3), \
            f"pre_norm={pre_norm}: max abs diff {err}"

    print("KERNEL_OK")
</pallas_src>

<mosaic_0001>
module attributes {stable_mosaic.version = 11 : i64} {
  func.func @fused_encoder_kernel(%arg0: memref<2x8x32xf32, #tpu.memory_space<vmem>>, %arg1: memref<8x32xf32, #tpu.memory_space<vmem>>, %arg2: memref<1x32xf32, #tpu.memory_space<vmem>>, %arg3: memref<1x32xf32, #tpu.memory_space<vmem>>, %arg4: memref<2x8x32x8xf32, #tpu.memory_space<vmem>>, %arg5: memref<2x8x32x8xf32, #tpu.memory_space<vmem>>, %arg6: memref<2x8x32x8xf32, #tpu.memory_space<vmem>>, %arg7: memref<2x8x1x8xf32, #tpu.memory_space<vmem>>, %arg8: memref<2x8x1x8xf32, #tpu.memory_space<vmem>>, %arg9: memref<2x8x1x8xf32, #tpu.memory_space<vmem>>, %arg10: memref<2x8x8x32xf32, #tpu.memory_space<vmem>>, %arg11: memref<2x1x32xf32, #tpu.memory_space<vmem>>, %arg12: memref<2x1x32xf32, #tpu.memory_space<vmem>>, %arg13: memref<2x1x32xf32, #tpu.memory_space<vmem>>, %arg14: memref<2x32x64xf32, #tpu.memory_space<vmem>>, %arg15: memref<2x1x64xf32, #tpu.memory_space<vmem>>, %arg16: memref<2x64x32xf32, #tpu.memory_space<vmem>>, %arg17: memref<2x1x32xf32, #tpu.memory_space<vmem>>, %arg18: memref<2x1x32xf32, #tpu.memory_space<vmem>>, %arg19: memref<2x1x32xf32, #tpu.memory_space<vmem>>, %arg20: memref<2x8x32xf32, #tpu.memory_space<vmem>>) attributes {dimension_semantics = [], scalar_prefetch = 0 : i64, scratch_operands = 0 : i64, tpu.core_type = #tpu.core_type<tc>} {
    %c0 = arith.constant 0 : index
    %c0_0 = arith.constant 0 : index
    %c0_1 = arith.constant 0 : index
    %0 = vector.load %arg0[%c0, %c0_0, %c0_1] : memref<2x8x32xf32, #tpu.memory_space<vmem>>, vector<2x8x32xf32>
    %c0_2 = arith.constant 0 : index
    %c0_3 = arith.constant 0 : index
    %1 = vector.load %arg1[%c0_2, %c0_3] : memref<8x32xf32, #tpu.memory_space<vmem>>, vector<8x32xf32>
    %2 = vector.shape_cast %1 : vector<8x32xf32> to vector<1x8x32xf32>
    %3 = vector.broadcast %2 : vector<1x8x32xf32> to vector<2x8x32xf32>
    %4 = arith.addf %0, %3 : vector<2x8x32xf32>
    %c0_4 = arith.constant 0 : index
    %c0_5 = arith.constant 0 : index
    %5 = vector.load %arg2[%c0_4, %c0_5] : memref<1x32xf32, #tpu.memory_space<vmem>>, vector<1x32xf32>
    %c0_6 = arith.constant 0 : index
    %c0_7 = arith.constant 0 : index
    %6 = vector.load %arg3[%c0_6, %c0_7] : memref<1x32xf32, #tpu.memory_space<vmem>>, vector<1x32xf32>
    %cst = arith.constant dense<0.000000e+00> : vector<2x8xf32>
    %7 = vector.multi_reduction <add>, %4, %cst [2] : vector<2x8x32xf32> to vector<2x8xf32>
    %8 = vector.shape_cast %7 : vector<2x8xf32> to vector<2x8x1xf32>
    %cst_8 = arith.constant 3.200000e+01 : f32
    %9 = vector.broadcast %cst_8 : f32 to vector<2x8x1xf32>
    %10 = arith.divf %8, %9 : vector<2x8x1xf32>
    %11 = vector.broadcast %10 : vector<2x8x1xf32> to vector<2x8x32xf32>
    %12 = arith.subf %4, %11 : vector<2x8x32xf32>
    %13 = arith.mulf %12, %12 : vector<2x8x32xf32>
    %cst_9 = arith.constant dense<0.000000e+00> : vector<2x8xf32>
    %14 = vector.multi_reduction <add>, %13, %cst_9 [2] : vector<2x8x32xf32> to vector<2x8xf32>
    %15 = vector.shape_cast %14 : vector<2x8xf32> to vector<2x8x1xf32>
    %cst_10 = arith.constant 3.200000e+01 : f32
    %16 = vector.broadcast %cst_10 : f32 to vector<2x8x1xf32>
    %17 = arith.divf %15, %16 : vector<2x8x1xf32>
    %cst_11 = arith.constant 9.99999974E-6 : f32
    %18 = vector.broadcast %cst_11 : f32 to vector<2x8x1xf32>
    %19 = arith.addf %17, %18 : vector<2x8x1xf32>
    %20 = math.rsqrt %19 : vector<2x8x1xf32>
    %21 = vector.broadcast %20 : vector<2x8x1xf32> to vector<2x8x32xf32>
    %22 = arith.mulf %12, %21 : vector<2x8x32xf32>
    %23 = vector.shape_cast %5 : vector<1x32xf32> to vector<1x1x32xf32>
    %24 = vector.broadcast %23 : vector<1x1x32xf32> to vector<2x8x32xf32>
    %25 = arith.mulf %22, %24 : vector<2x8x32xf32>
    %26 = vector.shape_cast %6 : vector<1x32xf32> to vector<1x1x32xf32>
    %27 = vector.broadcast %26 : vector<1x1x32xf32> to vector<2x8x32xf32>
    %28 = arith.addf %25, %27 : vector<2x8x32xf32>
    %29 = vector.shape_cast %28 : vector<2x8x32xf32> to vector<2x1x8x32xf32>
    %30 = vector.shape_cast %29 : vector<2x1x8x32xf32> to vector<2x1x8x32xf32>
    %31 = vector.broadcast %30 : vector<2x1x8x32xf32> to vector<2x4x8x32xf32>
    %32 = vector.shape_cast %31 : vector<2x4x8x32xf32> to vector<8x8x32xf32>
    %c0_12 = arith.constant 0 : index
    %c0_13 = arith.constant 0 : index
    %c0_14 = arith.constant 0 : index
    %c0_15 = arith.constant 0 : index
    %33 = vector.load %arg4[%c0_12, %c0_13, %c0_14, %c0_15] : memref<2x8x32x8xf32, #tpu.memory_space<vmem>>, vector<1x8x32x8xf32>
    %34 = vector.shape_cast %33 : vector<1x8x32x8xf32> to vector<8x32x8xf32>
    "tpu.trace_start"() <{level = 10 : i32, message = "bsd,bdf->bsf"}> : () -> ()
    %cst_16 = arith.constant dense<0.000000e+00> : vector<8x8x8xf32>
    %35 = tpu.matmul %32, %34, %cst_16 {dimension_numbers = #tpu.dot_dimension_numbers<[2], [1], [1], [2], [0, 0, 0, 1, 1, 2], [0], [0]>} : vector<8x8x32xf32>, vector<8x32x8xf32>, vector<8x8x8xf32> -> vector<8x8x8xf32>
    "tpu.trace_stop"() : () -> ()
    %c0_17 = arith.constant 0 : index
    %c0_18 = arith.constant 0 : index
    %c0_19 = arith.constant 0 : index
    %c0_20 = arith.constant 0 : index
    %36 = vector.load %arg7[%c0_17, %c0_18, %c0_19, %c0_20] : memref<2x8x1x8xf32, #tpu.memory_space<vmem>>, vector<1x8x1x8xf32>
    %37 = vector.shape_cast %36 : vector<1x8x1x8xf32> to vector<8x1x8xf32>
    %38 = vector.broadcast %37 : vector<8x1x8xf32> to vector<8x8x8xf32>
    %39 = arith.addf %35, %38 : vector<8x8x8xf32>
    %c0_21 = arith.constant 0 : index
    %c0_22 = arith.constant 0 : index
    %c0_23 = arith.constant 0 : index
    %c0_24 = arith.constant 0 : index
    %40 = vector.load %arg5[%c0_21, %c0_22, %c0_23, %c0_24] : memref<2x8x32x8xf32, #tpu.memory_space<vmem>>, vector<1x8x32x8xf32>
    %41 = vector.shape_cast %40 : vector<1x8x32x8xf32> to vector<8x32x8xf32>
    "tpu.trace_start"() <{level = 10 : i32, message = "bsd,bdf->bsf"}> : () -> ()
    %cst_25 = arith.constant dense<0.000000e+00> : vector<8x8x8xf32>
    %42 = tpu.matmul %32, %41, %cst_25 {dimension_numbers = #tpu.dot_dimension_numbers<[2], [1], [1], [2], [0, 0, 0, 1, 1, 2], [0], [0]>} : vector<8x8x32xf32>, vector<8x32x8xf32>, vector<8x8x8xf32> -> vector<8x8x8xf32>
    "tpu.trace_stop"() : () -> ()
    %c0_26 = arith.constant 0 : index
    %c0_27 = arith.constant 0 : index
    %c0_28 = arith.constant 0 : index
    %c0_29 = arith.constant 0 : index
    %43 = vector.load %arg8[%c0_26, %c0_27, %c0_28, %c0_29] : memref<2x8x1x8xf32, #tpu.memory_space<vmem>>, vector<1x8x1x8xf32>
    %44 = vector.shape_cast %43 : vector<1x8x1x8xf32> to vector<8x1x8xf32>
    %45 = vector.broadcast %44 : vector<8x1x8xf32> to vector<8x8x8xf32>
    %46 = arith.addf %42, %45 : vector<8x8x8xf32>
    %c0_30 = arith.constant 0 : index
    %c0_31 = arith.constant 0 : index
    %c0_32 = arith.constant 0 : index
    %c0_33 = arith.constant 0 : index
    %47 = vector.load %arg6[%c0_30, %c0_31, %c0_32, %c0_33] : memref<2x8x32x8xf32, #tpu.memory_space<vmem>>, vector<1x8x32x8xf32>
    %48 = vector.shape_cast %47 : vector<1x8x32x8xf32> to vector<8x32x8xf32>
    "tpu.trace_start"() <{level = 10 : i32, message = "bsd,bdf->bsf"}> : () -> ()
    %cst_34 = arith.constant dense<0.000000e+00> : vector<8x8x8xf32>
    %49 = tpu.matmul %32, %48, %cst_34 {dimension_numbers = #tpu.dot_dimension_numbers<[2], [1], [1], [2], [0, 0, 0, 1, 1, 2], [0], [0]>} : vector<8x8x32xf32>, vector<8x32x8xf32>, vector<8x8x8xf32> -> vector<8x8x8xf32>
    "tpu.trace_stop"() : () -> ()
    %c0_35 = arith.constant 0 : index
    %c0_36 = arith.constant 0 : index
    %c0_37 = arith.constant 0 : index
    %c0_38 = arith.constant 0 : index
    %50 = vector.load %arg9[%c0_35, %c0_36, %c0_37, %c0_38] : memref<2x8x1x8xf32, #tpu.memory_space<vmem>>, vector<1x8x1x8xf32>
    %51 = vector.shape_cast %50 : vector<1x8x1x8xf32> to vector<8x1x8xf32>
    %52 = vector.broadcast %51 : vector<8x1x8xf32> to vector<8x8x8xf32>
    %53 = arith.addf %49, %52 : vector<8x8x8xf32>
    "tpu.trace_start"() <{level = 10 : i32, message = "bqd,bkd->bqk"}> : () -> ()
    %cst_39 = arith.constant dense<0.000000e+00> : vector<8x8x8xf32>
    %54 = tpu.matmul %39, %46, %cst_39 {dimension_numbers = #tpu.dot_dimension_numbers<[2], [2], [1], [1], [0, 0, 0, 1, 1, 1], [0], [0]>} : vector<8x8x8xf32>, vector<8x8x8xf32>, vector<8x8x8xf32> -> vector<8x8x8xf32>
    "tpu.trace_stop"() : () -> ()
    %cst_40 = arith.constant 0.353553385 : f32
    %55 = vector.broadcast %cst_40 : f32 to vector<8x8x8xf32>
    %56 = arith.mulf %54, %55 : vector<8x8x8xf32>
    %cst_41 = arith.constant dense<0xFF800000> : vector<8x8xf32>
    %57 = vector.multi_reduction <maximumf>, %56, %cst_41 [2] : vector<8x8x8xf32> to vector<8x8xf32>
    %58 = vector.shape_cast %57 : vector<8x8xf32> to vector<8x8x1xf32>
    %59 = vector.broadcast %58 : vector<8x8x1xf32> to vector<8x8x8xf32>
    %60 = arith.subf %56, %59 : vector<8x8x8xf32>
    %61 = math.exp %60 : vector<8x8x8xf32>
    %cst_42 = arith.constant dense<0.000000e+00> : vector<8x8xf32>
    %62 = vector.multi_reduction <add>, %61, %cst_42 [2] : vector<8x8x8xf32> to vector<8x8xf32>
    %63 = vector.shape_cast %62 : vector<8x8xf32> to vector<8x8x1xf32>
    %64 = tpu.reciprocal %63 : vector<8x8x1xf32> -> vector<8x8x1xf32>
    %65 = vector.broadcast %64 : vector<8x8x1xf32> to vector<8x8x8xf32>
    %66 = arith.mulf %61, %65 : vector<8x8x8xf32>
    "tpu.trace_start"() <{level = 10 : i32, message = "bqk,bkd->bqd"}> : () -> ()
    %cst_43 = arith.constant dense<0.000000e+00> : vector<8x8x8xf32>
    %67 = tpu.matmul %66, %53, %cst_43 {dimension_numbers = #tpu.dot_dimension_numbers<[2], [1], [1], [2], [0, 0, 0, 1, 1, 2], [0], [0]>} : vector<8x8x8xf32>, vector<8x8x8xf32>, vector<8x8x8xf32> -> vector<8x8x8xf32>
    "tpu.trace_stop"() : () -> ()
    %c0_44 = arith.constant 0 : index
    %c0_45 = arith.constant 0 : index
    %c0_46 = arith.constant 0 : index
    %c0_47 = arith.constant 0 : index
    %68 = vector.load %arg10[%c0_44, %c0_45, %c0_46, %c0_47] : memref<2x8x8x32xf32, #tpu.memory_space<vmem>>, vector<1x8x8x32xf32>
    %69 = vector.shape_cast %68 : vector<1x8x8x32xf32> to vector<8x8x32xf32>
    "tpu.trace_start"() <{level = 10 : i32, message = "bsd,bdf->bsf"}> : () -> ()
    %cst_48 = arith.constant dense<0.000000e+00> : vector<8x8x32xf32>
    %70 = tpu.matmul %67, %69, %cst_48 {dimension_numbers = #tpu.dot_dimension_numbers<[2], [1], [1], [2], [0, 0, 0, 1, 1, 2], [0], [0]>} : vector<8x8x8xf32>, vector<8x8x32xf32>, vector<8x8x32xf32> -> vector<8x8x32xf32>
    "tpu.trace_stop"() : () -> ()
    %71 = vector.shape_cast %70 : vector<8x8x32xf32> to vector<2x4x8x32xf32>
    %cst_49 = arith.constant dense<0.000000e+00> : vector<2x8x32xf32>
    %72 = vector.multi_reduction <add>, %71, %cst_49 [1] : vector<2x4x8x32xf32> to vector<2x8x32xf32>
    %c0_50 = arith.constant 0 : index
    %c0_51 = arith.constant 0 : index
    %c0_52 = arith.constant 0 : index
    %73 = vector.load %arg11[%c0_50, %c0_51, %c0_52] : memref<2x1x32xf32, #tpu.memory_space<vmem>>, vector<1x1x32xf32>
    %74 = vector.shape_cast %73 : vector<1x1x32xf32> to vector<1x32xf32>
    %75 = vector.shape_cast %74 : vector<1x32xf32> to vector<1x1x32xf32>
    %76 = vector.broadcast %75 : vector<1x1x32xf32> to vector<2x8x32xf32>
    %77 = arith.addf %72, %76 : vector<2x8x32xf32>
    %78 = arith.addf %28, %77 : vector<2x8x32xf32>
    %c0_53 = arith.constant 0 : index
    %c0_54 = arith.constant 0 : index
    %c0_55 = arith.constant 0 : index
    %79 = vector.load %arg12[%c0_53, %c0_54, %c0_55] : memref<2x1x32xf32, #tpu.memory_space<vmem>>, vector<1x1x32xf32>
    %80 = vector.shape_cast %79 : vector<1x1x32xf32> to vector<1x32xf32>
    %c0_56 = arith.constant 0 : index
    %c0_57 = arith.constant 0 : index
    %c0_58 = arith.constant 0 : index
    %81 = vector.load %arg13[%c0_56, %c0_57, %c0_58] : memref<2x1x32xf32, #tpu.memory_space<vmem>>, vector<1x1x32xf32>
    %82 = vector.shape_cast %81 : vector<1x1x32xf32> to vector<1x32xf32>
    %cst_59 = arith.constant dense<0.000000e+00> : vector<2x8xf32>
    %83 = vector.multi_reduction <add>, %78, %cst_59 [2] : vector<2x8x32xf32> to vector<2x8xf32>
    %84 = vector.shape_cast %83 : vector<2x8xf32> to vector<2x8x1xf32>
    %cst_60 = arith.constant 3.200000e+01 : f32
    %85 = vector.broadcast %cst_60 : f32 to vector<2x8x1xf32>
    %86 = arith.divf %84, %85 : vector<2x8x1xf32>
    %87 = vector.broadcast %86 : vector<2x8x1xf32> to vector<2x8x32xf32>
    %88 = arith.subf %78, %87 : vector<2x8x32xf32>
    %89 = arith.mulf %88, %88 : vector<2x8x32xf32>
    %cst_61 = arith.constant dense<0.000000e+00> : vector<2x8xf32>
    %90 = vector.multi_reduction <add>, %89, %cst_61 [2] : vector<2x8x32xf32> to vector<2x8xf32>
    %91 = vector.shape_cast %90 : vector<2x8xf32> to vector<2x8x1xf32>
    %cst_62 = arith.constant 3.200000e+01 : f32
    %92 = vector.broadcast %cst_62 : f32 to vector<2x8x1xf32>
    %93 = arith.divf %91, %92 : vector<2x8x1xf32>
    %cst_63 = arith.constant 9.99999974E-6 : f32
    %94 = vector.broadcast %cst_63 : f32 to vector<2x8x1xf32>
    %95 = arith.addf %93, %94 : vector<2x8x1xf32>
    %96 = math.rsqrt %95 : vector<2x8x1xf32>
    %97 = vector.broadcast %96 : vector<2x8x1xf32> to vector<2x8x32xf32>
    %98 = arith.mulf %88, %97 : vector<2x8x32xf32>
    %99 = vector.shape_cast %80 : vector<1x32xf32> to vector<1x1x32xf32>
    %100 = vector.broadcast %99 : vector<1x1x32xf32> to vector<2x8x32xf32>
    %101 = arith.mulf %98, %100 : vector<2x8x32xf32>
    %102 = vector.shape_cast %82 : vector<1x32xf32> to vector<1x1x32xf32>
    %103 = vector.broadcast %102 : vector<1x1x32xf32> to vector<2x8x32xf32>
    %104 = arith.addf %101, %103 : vector<2x8x32xf32>
    %105 = vector.shape_cast %104 : vector<2x8x32xf32> to vector<16x32xf32>
    %c0_64 = arith.constant 0 : index
    %c0_65 = arith.constant 0 : index
    %c0_66 = arith.constant 0 : index
    %106 = vector.load %arg14[%c0_64, %c0_65, %c0_66] : memref<2x32x64xf32, #tpu.memory_space<vmem>>, vector<1x32x64xf32>
    %107 = vector.shape_cast %106 : vector<1x32x64xf32> to vector<32x64xf32>
    %cst_67 = arith.constant dense<0.000000e+00> : vector<16x64xf32>
    %108 = tpu.matmul %105, %107, %cst_67 {dimension_numbers = #tpu.dot_dimension_numbers<[1], [0], [0], [1], [0, 0, 1, 1], [], []>} : vector<16x32xf32>, vector<32x64xf32>, vector<16x64xf32> -> vector<16x64xf32>
    %c0_68 = arith.constant 0 : index
    %c0_69 = arith.constant 0 : index
    %c0_70 = arith.constant 0 : index
    %109 = vector.load %arg15[%c0_68, %c0_69, %c0_70] : memref<2x1x64xf32, #tpu.memory_space<vmem>>, vector<1x1x64xf32>
    %110 = vector.shape_cast %109 : vector<1x1x64xf32> to vector<1x64xf32>
    %111 = vector.broadcast %110 : vector<1x64xf32> to vector<16x64xf32>
    %112 = arith.addf %108, %111 : vector<16x64xf32>
    %cst_71 = arith.constant 0.000000e+00 : f32
    %113 = vector.broadcast %cst_71 : f32 to vector<16x64xf32>
    %114 = arith.maximumf %112, %113 : vector<16x64xf32>
    %c0_72 = arith.constant 0 : index
    %c0_73 = arith.constant 0 : index
    %c0_74 = arith.constant 0 : index
    %115 = vector.load %arg16[%c0_72, %c0_73, %c0_74] : memref<2x64x32xf32, #tpu.memory_space<vmem>>, vector<1x64x32xf32>
    %116 = vector.shape_cast %115 : vector<1x64x32xf32> to vector<64x32xf32>
    %cst_75 = arith.constant dense<0.000000e+00> : vector<16x32xf32>
    %117 = tpu.matmul %114, %116, %cst_75 {dimension_numbers = #tpu.dot_dimension_numbers<[1], [0], [0], [1], [0, 0, 1, 1], [], []>} : vector<16x64xf32>, vector<64x32xf32>, vector<16x32xf32> -> vector<16x32xf32>
    %c0_76 = arith.constant 0 : index
    %c0_77 = arith.constant 0 : index
    %c0_78 = arith.constant 0 : index
    %118 = vector.load %arg17[%c0_76, %c0_77, %c0_78] : memref<2x1x32xf32, #tpu.memory_space<vmem>>, vector<1x1x32xf32>
    %119 = vector.shape_cast %118 : vector<1x1x32xf32> to vector<1x32xf32>
    %120 = vector.broadcast %119 : vector<1x32xf32> to vector<16x32xf32>
    %121 = arith.addf %117, %120 : vector<16x32xf32>
    %122 = vector.shape_cast %121 : vector<16x32xf32> to vector<2x8x32xf32>
    %123 = arith.addf %104, %122 : vector<2x8x32xf32>
    %c0_79 = arith.constant 0 : index
    %c0_80 = arith.constant 0 : index
    %c0_81 = arith.constant 0 : index
    %124 = vector.load %arg18[%c0_79, %c0_80, %c0_81] : memref<2x1x32xf32, #tpu.memory_space<vmem>>, vector<1x1x32xf32>
    %125 = vector.shape_cast %124 : vector<1x1x32xf32> to vector<1x32xf32>
    %c0_82 = arith.constant 0 : index
    %c0_83 = arith.constant 0 : index
    %c0_84 = arith.constant 0 : index
    %126 = vector.load %arg19[%c0_82, %c0_83, %c0_84] : memref<2x1x32xf32, #tpu.memory_space<vmem>>, vector<1x1x32xf32>
    %127 = vector.shape_cast %126 : vector<1x1x32xf32> to vector<1x32xf32>
    %cst_85 = arith.constant dense<0.000000e+00> : vector<2x8xf32>
    %128 = vector.multi_reduction <add>, %123, %cst_85 [2] : vector<2x8x32xf32> to vector<2x8xf32>
    %129 = vector.shape_cast %128 : vector<2x8xf32> to vector<2x8x1xf32>
    %cst_86 = arith.constant 3.200000e+01 : f32
    %130 = vector.broadcast %cst_86 : f32 to vector<2x8x1xf32>
    %131 = arith.divf %129, %130 : vector<2x8x1xf32>
    %132 = vector.broadcast %131 : vector<2x8x1xf32> to vector<2x8x32xf32>
    %133 = arith.subf %123, %132 : vector<2x8x32xf32>
    %134 = arith.mulf %133, %133 : vector<2x8x32xf32>
    %cst_87 = arith.constant dense<0.000000e+00> : vector<2x8xf32>
    %135 = vector.multi_reduction <add>, %134, %cst_87 [2] : vector<2x8x32xf32> to vector<2x8xf32>
    %136 = vector.shape_cast %135 : vector<2x8xf32> to vector<2x8x1xf32>
    %cst_88 = arith.constant 3.200000e+01 : f32
    %137 = vector.broadcast %cst_88 : f32 to vector<2x8x1xf32>
    %138 = arith.divf %136, %137 : vector<2x8x1xf32>
    %cst_89 = arith.constant 9.99999974E-6 : f32
    %139 = vector.broadcast %cst_89 : f32 to vector<2x8x1xf32>
    %140 = arith.addf %138, %139 : vector<2x8x1xf32>
    %141 = math.rsqrt %140 : vector<2x8x1xf32>
    %142 = vector.broadcast %141 : vector<2x8x1xf32> to vector<2x8x32xf32>
    %143 = arith.mulf %133, %142 : vector<2x8x32xf32>
    %144 = vector.shape_cast %125 : vector<1x32xf32> to vector<1x1x32xf32>
    %145 = vector.broadcast %144 : vector<1x1x32xf32> to vector<2x8x32xf32>
    %146 = arith.mulf %143, %145 : vector<2x8x32xf32>
    %147 = vector.shape_cast %127 : vector<1x32xf32> to vector<1x1x32xf32>
    %148 = vector.broadcast %147 : vector<1x1x32xf32> to vector<2x8x32xf32>
    %149 = arith.addf %146, %148 : vector<2x8x32xf32>
    %150 = vector.shape_cast %149 : vector<2x8x32xf32> to vector<2x1x8x32xf32>
    %151 = vector.shape_cast %150 : vector<2x1x8x32xf32> to vector<2x1x8x32xf32>
    %152 = vector.broadcast %151 : vector<2x1x8x32xf32> to vector<2x4x8x32xf32>
    %153 = vector.shape_cast %152 : vector<2x4x8x32xf32> to vector<8x8x32xf32>
    %c1 = arith.constant 1 : index
    %c0_90 = arith.constant 0 : index
    %c0_91 = arith.constant 0 : index
    %c0_92 = arith.constant 0 : index
    %154 = vector.load %arg4[%c1, %c0_90, %c0_91, %c0_92] : memref<2x8x32x8xf32, #tpu.memory_space<vmem>>, vector<1x8x32x8xf32>
    %155 = vector.shape_cast %154 : vector<1x8x32x8xf32> to vector<8x32x8xf32>
    "tpu.trace_start"() <{level = 10 : i32, message = "bsd,bdf->bsf"}> : () -> ()
    %cst_93 = arith.constant dense<0.000000e+00> : vector<8x8x8xf32>
    %156 = tpu.matmul %153, %155, %cst_93 {dimension_numbers = #tpu.dot_dimension_numbers<[2], [1], [1], [2], [0, 0, 0, 1, 1, 2], [0], [0]>} : vector<8x8x32xf32>, vector<8x32x8xf32>, vector<8x8x8xf32> -> vector<8x8x8xf32>
    "tpu.trace_stop"() : () -> ()
    %c1_94 = arith.constant 1 : index
    %c0_95 = arith.constant 0 : index
    %c0_96 = arith.constant 0 : index
    %c0_97 = arith.constant 0 : index
    %157 = vector.load %arg7[%c1_94, %c0_95, %c0_96, %c0_97] : memref<2x8x1x8xf32, #tpu.memory_space<vmem>>, vector<1x8x1x8xf32>
    %158 = vector.shape_cast %157 : vector<1x8x1x8xf32> to vector<8x1x8xf32>
    %159 = vector.broadcast %158 : vector<8x1x8xf32> to vector<8x8x8xf32>
    %160 = arith.addf %156, %159 : vector<8x8x8xf32>
    %c1_98 = arith.constant 1 : index
    %c0_99 = arith.constant 0 : index
    %c0_100 = arith.constant 0 : index
    %c0_101 = arith.constant 0 : index
    %161 = vector.load %arg5[%c1_98, %c0_99, %c0_100, %c0_101] : memref<2x8x32x8xf32, #tpu.memory_space<vmem>>, vector<1x8x32x8xf32>
    %162 = vector.shape_cast %161 : vector<1x8x32x8xf32> to vector<8x32x8xf32>
    "tpu.trace_start"() <{level = 10 : i32, message = "bsd,bdf->bsf"}> : () -> ()
    %cst_102 = arith.constant dense<0.000000e+00> : vector<8x8x8xf32>
    %163 = tpu.matmul %153, %162, %cst_102 {dimension_numbers = #tpu.dot_dimension_numbers<[2], [1], [1], [2], [0, 0, 0, 1, 1, 2], [0], [0]>} : vector<8x8x32xf32>, vector<8x32x8xf32>, vector<8x8x8xf32> -> vector<8x8x8xf32>
    "tpu.trace_stop"() : () -> ()
    %c1_103 = arith.constant 1 : index
    %c0_104 = arith.constant 0 : index
    %c0_105 = arith.constant 0 : index
    %c0_106 = arith.constant 0 : index
    %164 = vector.load %arg8[%c1_103, %c0_104, %c0_105, %c0_106] : memref<2x8x1x8xf32, #tpu.memory_space<vmem>>, vector<1x8x1x8xf32>
    %165 = vector.shape_cast %164 : vector<1x8x1x8xf32> to vector<8x1x8xf32>
    %166 = vector.broadcast %165 : vector<8x1x8xf32> to vector<8x8x8xf32>
    %167 = arith.addf %163, %166 : vector<8x8x8xf32>
    %c1_107 = arith.constant 1 : index
    %c0_108 = arith.constant 0 : index
    %c0_109 = arith.constant 0 : index
    %c0_110 = arith.constant 0 : index
    %168 = vector.load %arg6[%c1_107, %c0_108, %c0_109, %c0_110] : memref<2x8x32x8xf32, #tpu.memory_space<vmem>>, vector<1x8x32x8xf32>
    %169 = vector.shape_cast %168 : vector<1x8x32x8xf32> to vector<8x32x8xf32>
    "tpu.trace_start"() <{level = 10 : i32, message = "bsd,bdf->bsf"}> : () -> ()
    %cst_111 = arith.constant dense<0.000000e+00> : vector<8x8x8xf32>
    %170 = tpu.matmul %153, %169, %cst_111 {dimension_numbers = #tpu.dot_dimension_numbers<[2], [1], [1], [2], [0, 0, 0, 1, 1, 2], [0], [0]>} : vector<8x8x32xf32>, vector<8x32x8xf32>, vector<8x8x8xf32> -> vector<8x8x8xf32>
    "tpu.trace_stop"() : () -> ()
    %c1_112 = arith.constant 1 : index
    %c0_113 = arith.constant 0 : index
    %c0_114 = arith.constant 0 : index
    %c0_115 = arith.constant 0 : index
    %171 = vector.load %arg9[%c1_112, %c0_113, %c0_114, %c0_115] : memref<2x8x1x8xf32, #tpu.memory_space<vmem>>, vector<1x8x1x8xf32>
    %172 = vector.shape_cast %171 : vector<1x8x1x8xf32> to vector<8x1x8xf32>
    %173 = vector.broadcast %172 : vector<8x1x8xf32> to vector<8x8x8xf32>
    %174 = arith.addf %170, %173 : vector<8x8x8xf32>
    "tpu.trace_start"() <{level = 10 : i32, message = "bqd,bkd->bqk"}> : () -> ()
    %cst_116 = arith.constant dense<0.000000e+00> : vector<8x8x8xf32>
    %175 = tpu.matmul %160, %167, %cst_116 {dimension_numbers = #tpu.dot_dimension_numbers<[2], [2], [1], [1], [0, 0, 0, 1, 1, 1], [0], [0]>} : vector<8x8x8xf32>, vector<8x8x8xf32>, vector<8x8x8xf32> -> vector<8x8x8xf32>
    "tpu.trace_stop"() : () -> ()
    %cst_117 = arith.constant 0.353553385 : f32
    %176 = vector.broadcast %cst_117 : f32 to vector<8x8x8xf32>
    %177 = arith.mulf %175, %176 : vector<8x8x8xf32>
    %cst_118 = arith.constant dense<0xFF800000> : vector<8x8xf32>
    %178 = vector.multi_reduction <maximumf>, %177, %cst_118 [2] : vector<8x8x8xf32> to vector<8x8xf32>
    %179 = vector.shape_cast %178 : vector<8x8xf32> to vector<8x8x1xf32>
    %180 = vector.broadcast %179 : vector<8x8x1xf32> to vector<8x8x8xf32>
    %181 = arith.subf %177, %180 : vector<8x8x8xf32>
    %182 = math.exp %181 : vector<8x8x8xf32>
    %cst_119 = arith.constant dense<0.000000e+00> : vector<8x8xf32>
    %183 = vector.multi_reduction <add>, %182, %cst_119 [2] : vector<8x8x8xf32> to vector<8x8xf32>
    %184 = vector.shape_cast %183 : vector<8x8xf32> to vector<8x8x1xf32>
    %185 = tpu.reciprocal %184 : vector<8x8x1xf32> -> vector<8x8x1xf32>
    %186 = vector.broadcast %185 : vector<8x8x1xf32> to vector<8x8x8xf32>
    %187 = arith.mulf %182, %186 : vector<8x8x8xf32>
    "tpu.trace_start"() <{level = 10 : i32, message = "bqk,bkd->bqd"}> : () -> ()
    %cst_120 = arith.constant dense<0.000000e+00> : vector<8x8x8xf32>
    %188 = tpu.matmul %187, %174, %cst_120 {dimension_numbers = #tpu.dot_dimension_numbers<[2], [1], [1], [2], [0, 0, 0, 1, 1, 2], [0], [0]>} : vector<8x8x8xf32>, vector<8x8x8xf32>, vector<8x8x8xf32> -> vector<8x8x8xf32>
    "tpu.trace_stop"() : () -> ()
    %c1_121 = arith.constant 1 : index
    %c0_122 = arith.constant 0 : index
    %c0_123 = arith.constant 0 : index
    %c0_124 = arith.constant 0 : index
    %189 = vector.load %arg10[%c1_121, %c0_122, %c0_123, %c0_124] : memref<2x8x8x32xf32, #tpu.memory_space<vmem>>, vector<1x8x8x32xf32>
    %190 = vector.shape_cast %189 : vector<1x8x8x32xf32> to vector<8x8x32xf32>
    "tpu.trace_start"() <{level = 10 : i32, message = "bsd,bdf->bsf"}> : () -> ()
    %cst_125 = arith.constant dense<0.000000e+00> : vector<8x8x32xf32>
    %191 = tpu.matmul %188, %190, %cst_125 {dimension_numbers = #tpu.dot_dimension_numbers<[2], [1], [1], [2], [0, 0, 0, 1, 1, 2], [0], [0]>} : vector<8x8x8xf32>, vector<8x8x32xf32>, vector<8x8x32xf32> -> vector<8x8x32xf32>
    "tpu.trace_stop"() : () -> ()
    %192 = vector.shape_cast %191 : vector<8x8x32xf32> to vector<2x4x8x32xf32>
    %cst_126 = arith.constant dense<0.000000e+00> : vector<2x8x32xf32>
    %193 = vector.multi_reduction <add>, %192, %cst_126 [1] : vector<2x4x8x32xf32> to vector<2x8x32xf32>
    %c1_127 = arith.constant 1 : index
    %c0_128 = arith.constant 0 : index
    %c0_129 = arith.constant 0 : index
    %194 = vector.load %arg11[%c1_127, %c0_128, %c0_129] : memref<2x1x32xf32, #tpu.memory_space<vmem>>, vector<1x1x32xf32>
    %195 = vector.shape_cast %194 : vector<1x1x32xf32> to vector<1x32xf32>
    %196 = vector.shape_cast %195 : vector<1x32xf32> to vector<1x1x32xf32>
    %197 = vector.broadcast %196 : vector<1x1x32xf32> to vector<2x8x32xf32>
    %198 = arith.addf %193, %197 : vector<2x8x32xf32>
    %199 = arith.addf %149, %198 : vector<2x8x32xf32>
    %c1_130 = arith.constant 1 : index
    %c0_131 = arith.constant 0 : index
    %c0_132 = arith.constant 0 : index
    %200 = vector.load %arg12[%c1_130, %c0_131, %c0_132] : memref<2x1x32xf32, #tpu.memory_space<vmem>>, vector<1x1x32xf32>
    %201 = vector.shape_cast %200 : vector<1x1x32xf32> to vector<1x32xf32>
    %c1_133 = arith.constant 1 : index
    %c0_134 = arith.constant 0 : index
    %c0_135 = arith.constant 0 : index
    %202 = vector.load %arg13[%c1_133, %c0_134, %c0_135] : memref<2x1x32xf32, #tpu.memory_space<vmem>>, vector<1x1x32xf32>
    %203 = vector.shape_cast %202 : vector<1x1x32xf32> to vector<1x32xf32>
    %cst_136 = arith.constant dense<0.000000e+00> : vector<2x8xf32>
    %204 = vector.multi_reduction <add>, %199, %cst_136 [2] : vector<2x8x32xf32> to vector<2x8xf32>
    %205 = vector.shape_cast %204 : vector<2x8xf32> to vector<2x8x1xf32>
    %cst_137 = arith.constant 3.200000e+01 : f32
    %206 = vector.broadcast %cst_137 : f32 to vector<2x8x1xf32>
    %207 = arith.divf %205, %206 : vector<2x8x1xf32>
    %208 = vector.broadcast %207 : vector<2x8x1xf32> to vector<2x8x32xf32>
    %209 = arith.subf %199, %208 : vector<2x8x32xf32>
    %210 = arith.mulf %209, %209 : vector<2x8x32xf32>
    %cst_138 = arith.constant dense<0.000000e+00> : vector<2x8xf32>
    %211 = vector.multi_reduction <add>, %210, %cst_138 [2] : vector<2x8x32xf32> to vector<2x8xf32>
    %212 = vector.shape_cast %211 : vector<2x8xf32> to vector<2x8x1xf32>
    %cst_139 = arith.constant 3.200000e+01 : f32
    %213 = vector.broadcast %cst_139 : f32 to vector<2x8x1xf32>
    %214 = arith.divf %212, %213 : vector<2x8x1xf32>
    %cst_140 = arith.constant 9.99999974E-6 : f32
    %215 = vector.broadcast %cst_140 : f32 to vector<2x8x1xf32>
    %216 = arith.addf %214, %215 : vector<2x8x1xf32>
    %217 = math.rsqrt %216 : vector<2x8x1xf32>
    %218 = vector.broadcast %217 : vector<2x8x1xf32> to vector<2x8x32xf32>
    %219 = arith.mulf %209, %218 : vector<2x8x32xf32>
    %220 = vector.shape_cast %201 : vector<1x32xf32> to vector<1x1x32xf32>
    %221 = vector.broadcast %220 : vector<1x1x32xf32> to vector<2x8x32xf32>
    %222 = arith.mulf %219, %221 : vector<2x8x32xf32>
    %223 = vector.shape_cast %203 : vector<1x32xf32> to vector<1x1x32xf32>
    %224 = vector.broadcast %223 : vector<1x1x32xf32> to vector<2x8x32xf32>
    %225 = arith.addf %222, %224 : vector<2x8x32xf32>
    %226 = vector.shape_cast %225 : vector<2x8x32xf32> to vector<16x32xf32>
    %c1_141 = arith.constant 1 : index
    %c0_142 = arith.constant 0 : index
    %c0_143 = arith.constant 0 : index
    %227 = vector.load %arg14[%c1_141, %c0_142, %c0_143] : memref<2x32x64xf32, #tpu.memory_space<vmem>>, vector<1x32x64xf32>
    %228 = vector.shape_cast %227 : vector<1x32x64xf32> to vector<32x64xf32>
    %cst_144 = arith.constant dense<0.000000e+00> : vector<16x64xf32>
    %229 = tpu.matmul %226, %228, %cst_144 {dimension_numbers = #tpu.dot_dimension_numbers<[1], [0], [0], [1], [0, 0, 1, 1], [], []>} : vector<16x32xf32>, vector<32x64xf32>, vector<16x64xf32> -> vector<16x64xf32>
    %c1_145 = arith.constant 1 : index
    %c0_146 = arith.constant 0 : index
    %c0_147 = arith.constant 0 : index
    %230 = vector.load %arg15[%c1_145, %c0_146, %c0_147] : memref<2x1x64xf32, #tpu.memory_space<vmem>>, vector<1x1x64xf32>
    %231 = vector.shape_cast %230 : vector<1x1x64xf32> to vector<1x64xf32>
    %232 = vector.broadcast %231 : vector<1x64xf32> to vector<16x64xf32>
    %233 = arith.addf %229, %232 : vector<16x64xf32>
    %cst_148 = arith.constant 0.000000e+00 : f32
    %234 = vector.broadcast %cst_148 : f32 to vector<16x64xf32>
    %235 = arith.maximumf %233, %234 : vector<16x64xf32>
    %c1_149 = arith.constant 1 : index
    %c0_150 = arith.constant 0 : index
    %c0_151 = arith.constant 0 : index
    %236 = vector.load %arg16[%c1_149, %c0_150, %c0_151] : memref<2x64x32xf32, #tpu.memory_space<vmem>>, vector<1x64x32xf32>
    %237 = vector.shape_cast %236 : vector<1x64x32xf32> to vector<64x32xf32>
    %cst_152 = arith.constant dense<0.000000e+00> : vector<16x32xf32>
    %238 = tpu.matmul %235, %237, %cst_152 {dimension_numbers = #tpu.dot_dimension_numbers<[1], [0], [0], [1], [0, 0, 1, 1], [], []>} : vector<16x64xf32>, vector<64x32xf32>, vector<16x32xf32> -> vector<16x32xf32>
    %c1_153 = arith.constant 1 : index
    %c0_154 = arith.constant 0 : index
    %c0_155 = arith.constant 0 : index
    %239 = vector.load %arg17[%c1_153, %c0_154, %c0_155] : memref<2x1x32xf32, #tpu.memory_space<vmem>>, vector<1x1x32xf32>
    %240 = vector.shape_cast %239 : vector<1x1x32xf32> to vector<1x32xf32>
    %241 = vector.broadcast %240 : vector<1x32xf32> to vector<16x32xf32>
    %242 = arith.addf %238, %241 : vector<16x32xf32>
    %243 = vector.shape_cast %242 : vector<16x32xf32> to vector<2x8x32xf32>
    %244 = arith.addf %225, %243 : vector<2x8x32xf32>
    %c1_156 = arith.constant 1 : index
    %c0_157 = arith.constant 0 : index
    %c0_158 = arith.constant 0 : index
    %245 = vector.load %arg18[%c1_156, %c0_157, %c0_158] : memref<2x1x32xf32, #tpu.memory_space<vmem>>, vector<1x1x32xf32>
    %246 = vector.shape_cast %245 : vector<1x1x32xf32> to vector<1x32xf32>
    %c1_159 = arith.constant 1 : index
    %c0_160 = arith.constant 0 : index
    %c0_161 = arith.constant 0 : index
    %247 = vector.load %arg19[%c1_159, %c0_160, %c0_161] : memref<2x1x32xf32, #tpu.memory_space<vmem>>, vector<1x1x32xf32>
    %248 = vector.shape_cast %247 : vector<1x1x32xf32> to vector<1x32xf32>
    %cst_162 = arith.constant dense<0.000000e+00> : vector<2x8xf32>
    %249 = vector.multi_reduction <add>, %244, %cst_162 [2] : vector<2x8x32xf32> to vector<2x8xf32>
    %250 = vector.shape_cast %249 : vector<2x8xf32> to vector<2x8x1xf32>
    %cst_163 = arith.constant 3.200000e+01 : f32
    %251 = vector.broadcast %cst_163 : f32 to vector<2x8x1xf32>
    %252 = arith.divf %250, %251 : vector<2x8x1xf32>
    %253 = vector.broadcast %252 : vector<2x8x1xf32> to vector<2x8x32xf32>
    %254 = arith.subf %244, %253 : vector<2x8x32xf32>
    %255 = arith.mulf %254, %254 : vector<2x8x32xf32>
    %cst_164 = arith.constant dense<0.000000e+00> : vector<2x8xf32>
    %256 = vector.multi_reduction <add>, %255, %cst_164 [2] : vector<2x8x32xf32> to vector<2x8xf32>
    %257 = vector.shape_cast %256 : vector<2x8xf32> to vector<2x8x1xf32>
    %cst_165 = arith.constant 3.200000e+01 : f32
    %258 = vector.broadcast %cst_165 : f32 to vector<2x8x1xf32>
    %259 = arith.divf %257, %258 : vector<2x8x1xf32>
    %cst_166 = arith.constant 9.99999974E-6 : f32
    %260 = vector.broadcast %cst_166 : f32 to vector<2x8x1xf32>
    %261 = arith.addf %259, %260 : vector<2x8x1xf32>
    %262 = math.rsqrt %261 : vector<2x8x1xf32>
    %263 = vector.broadcast %262 : vector<2x8x1xf32> to vector<2x8x32xf32>
    %264 = arith.mulf %254, %263 : vector<2x8x32xf32>
    %265 = vector.shape_cast %246 : vector<1x32xf32> to vector<1x1x32xf32>
    %266 = vector.broadcast %265 : vector<1x1x32xf32> to vector<2x8x32xf32>
    %267 = arith.mulf %264, %266 : vector<2x8x32xf32>
    %268 = vector.shape_cast %248 : vector<1x32xf32> to vector<1x1x32xf32>
    %269 = vector.broadcast %268 : vector<1x1x32xf32> to vector<2x8x32xf32>
    %270 = arith.addf %267, %269 : vector<2x8x32xf32>
    %c0_167 = arith.constant 0 : index
    %c0_168 = arith.constant 0 : index
    %c0_169 = arith.constant 0 : index
    %271 = vector.load %arg20[%c0_167, %c0_168, %c0_169] : memref<2x8x32xf32, #tpu.memory_space<vmem>>, vector<2x8x32xf32>
    tpu.vector_store %arg20[%c0_167, %c0_168, %c0_169], %270 {strides = array<i32>} : memref<2x8x32xf32, #tpu.memory_space<vmem>>, vector<2x8x32xf32>,
    return
  }
}

</mosaic_0001>

<bundles_post_ra>
// kernel: transformer_encoder_forward.1
= control target key start
LH: loop header
LB: loop body
LE: loop exit
PB: predicated region body
PF: predicated region fallthrough
CT: control target
= control target key end

     0   :  { %s12091_s0 = inlined_call_operand.vmem [shape: f32[2,8,32], index: 0, kind: input, shape index: {}]   ;;  %s12092_s1 = inlined_call_operand.vmem [shape: f32[8,32], index: 1, kind: input, shape index: {}]   ;;  %s12093_s2 = inlined_call_operand.vmem [shape: f32[1,32], index: 2, kind: input, shape index: {}]   ;;  %s12094_s3 = inlined_call_operand.vmem [shape: f32[1,32], index: 3, kind: input, shape index: {}]   ;;  %s12095_s4 = inlined_call_operand.vmem [shape: f32[2,8,32,8], index: 4, kind: input, shape index: {}]   ;;  %s12096_s5 = inlined_call_operand.vmem [shape: f32[2,8,32,8], index: 5, kind: input, shape index: {}]   ;;  %s12097_s6 = inlined_call_operand.vmem [shape: f32[2,8,32,8], index: 6, kind: input, shape index: {}]   ;;  %s12098_s7 = inlined_call_operand.vmem [shape: f32[2,8,1,8], index: 7, kind: input, shape index: {}]   ;;  %s12099_s8 = inlined_call_operand.vmem [shape: f32[2,8,1,8], index: 8, kind: input, shape index: {}]   ;;  %s12100_s9 = inlined_call_operand.vmem [shape: f32[2,8,1,8], index: 9, kind: input, shape index: {}]   ;;  %s12101_s10 = inlined_call_operand.vmem [shape: f32[2,8,8,32], index: 10, kind: input, shape index: {}]   ;;  %s12102_s11 = inlined_call_operand.vmem [shape: f32[2,1,32], index: 11, kind: input, shape index: {}]   ;;  %s12103_s12 = inlined_call_operand.vmem [shape: f32[2,1,32], index: 12, kind: input, shape index: {}]   ;;  %s12104_s13 = inlined_call_operand.vmem [shape: f32[2,1,32], index: 13, kind: input, shape index: {}]   ;;  %s12105_s14 = inlined_call_operand.vmem [shape: f32[2,32,64], index: 14, kind: input, shape index: {}]   ;;  %s12106_s15 = inlined_call_operand.vmem [shape: f32[2,1,64], index: 15, kind: input, shape index: {}]   ;;  %s12107_s16 = inlined_call_operand.vmem [shape: f32[2,64,32], index: 16, kind: input, shape index: {}]   ;;  %s12108_s17 = inlined_call_operand.vmem [shape: f32[2,1,32], index: 17, kind: input, shape index: {}]   ;;  %s12109_s18 = inlined_call_operand.vmem [shape: f32[2,1,32], index: 18, kind: input, shape index: {}]   ;;  %s12110_s19 = inlined_call_operand.vmem [shape: f32[2,1,32], index: 19, kind: input, shape index: {}]   ;;  %s12111_s20 = inlined_call_operand.hbm [shape: f32[2,8,32], index: 20, kind: output, shape index: {}]  }
   0x1   :  { %12115 = sst [smem:[#allocation5_spill]] %s12091_s0 }
   0x2   :  { %12116 = sst [smem:[#allocation6_spill]] %s12092_s1 }
   0x3   :  { %12117 = sst [smem:[#allocation7_spill]] %s12093_s2 }
   0x4   :  { %12118 = sst [smem:[#allocation8_spill]] %s12094_s3 }
   0x5   :  { %12119 = sst [smem:[#allocation9_spill]] %s12095_s4 }
   0x6   :  { %12120 = sst [smem:[#allocation10_spill]] %s12106_s15 }
   0x7   :  { %s12121_s23 = sld [smem:[#allocation5_spill]]  ;;  %s12122_s15 = sld [smem:[#allocation6_spill]]  ;;  %vm73_vm0 = vcmask 261120  }
   0xd   :  { %v66_v0 = vld [vmem:[%s12121_s23] sm:$0xff]  ;;  %v67_v2 = vld [vmem:[%s12121_s23 + $0x8] sm:$0xff] }
   0xe   :  { %v68_v1 = vld [vmem:[%s12122_s15] sm:$0xff] }
   0xf   :  { %v69_v3 = vadd.f32 %v68_v1, %v66_v0  ;;  %v70_v4 = vadd.f32 %v68_v1, %v67_v2 }
  0x10   :  { %25 = vsyncpa [#allocation3], 0  ;;  %s12123_s27 = sld [smem:[#allocation9_spill]]  ;;  %v10400_v22 = vmov 0.0|0.0   ;;  %vm10401_vm1 = vmmov 0   ;;  %v10402_v30 = vmov 0.0  }
  0x11   :  { %v74_v5 = vsel %vm73_vm0, %v69_v3, 0.0  ;;  %v77_v6 = vsel %vm73_vm0, %v70_v4, 0.0  ;;  %9950 = vmatprep.subr.bf16.mxu0 %v10400_v22  ;;  %9956 = vmatprep.subr.bf16.mxu1 %v10400_v22  ;;  %s12124_s4 = sld [smem:[#allocation7_spill]]  ;;  %s12125_s3 = sld [smem:[#allocation8_spill]]  ;;  %vm2067_vm2 = vcmask 64512   ;;  %vm4126_vm3 = vcmask 523264  }
  0x12   :  { %75 = vadd.xlane.f32.xlu0 %v74_v5  ;;  %9130 = vmatprep.mubr.msk.f32.mxu0 %vm10401_vm1, %v10402_v30  ;;  %s12126_s22 = sld [smem:[#allocation10_spill]]  ;;  %s10403_s25 = smov [#allocation2]  }
  0x13   :  { %9141 = vmatprep.mubr.msk.f32.mxu1 %vm10401_vm1, %v10402_v30 }
  0x16   :  { %78 = vadd.xlane.f32.xlu0 %v77_v6  ;;  %v117_v17 = vld [vmem:[%s12123_s27] sm:$0xff]  ;;  %v118_v18 = vld [vmem:[%s12123_s27 + $0x8] sm:$0xff]  ;;  %v119_v24 = vld [vmem:[%s12123_s27 + $0x10] sm:$0xff] }
  0x17   :  { %v121_v19 = vld [vmem:[%s12123_s27 + $0x20] sm:$0xff]  ;;  %v9951_v20 = vpack.c.bf16 %v118_v18, %v117_v17  ;;  %v122_v21 = vld [vmem:[%s12123_s27 + $0x28] sm:$0xff]  ;;  %v120_v25 = vld [vmem:[%s12123_s27 + $0x18] sm:$0xff] }
  0x18   :  { %v9957_v23 = vpack.c.bf16 %v122_v21, %v121_v19  ;;  %v123_v26 = vld [vmem:[%s12123_s27 + $0x30] sm:$0xff]  ;;  %v9954_v27 = vpack.c.bf16 %v120_v25, %v119_v24  ;;  %v124_v28 = vld [vmem:[%s12123_s27 + $0x38] sm:$0xff]  ;;  %v8423_v38 = vld [vmem:[%s12124_s4] ss:$0 sm:$0xff] }
  0x19   :  { %9952 = vmatpush3.bf16.msra.mxu0 %v9951_v20  ;;  %v9960_v29 = vpack.c.bf16 %v124_v28, %v123_v26  ;;  %v125_v39 = vld [vmem:[%s12123_s27 + $0x40] sm:$0xff]  ;;  %v126_v41 = vld [vmem:[%s12123_s27 + $0x48] sm:$0xff]  ;;  %v127_v48 = vld [vmem:[%s12123_s27 + $0x50] sm:$0xff] }
  0x1a   :  { %9958 = vmatpush3.bf16.msra.mxu1 %v9957_v23  ;;  %9953 = vmatprep.subr.bf16.mxu0 %v10400_v22  ;;  %v129_v42 = vld [vmem:[%s12123_s27 + $0x60] sm:$0xff]  ;;  %v130_v43 = vld [vmem:[%s12123_s27 + $0x68] sm:$0xff]  ;;  %v9963_v46 = vpack.c.bf16 %v126_v41, %v125_v39  ;;  %v128_v50 = vld [vmem:[%s12123_s27 + $0x58] sm:$0xff] }
  0x1b   :  { %9959 = vmatprep.subr.bf16.mxu1 %v10400_v22  ;;  %v8424_v44 = vld [vmem:[%s12125_s3] ss:$0 sm:$0xff]  ;;  %v9969_v47 = vpack.c.bf16 %v130_v43, %v129_v42  ;;  %v131_v51 = vld [vmem:[%s12123_s27 + $0x70] sm:$0xff]  ;;  %v132_v52 = vld [vmem:[%s12123_s27 + $0x78] sm:$0xff]  ;;  %v9966_v53 = vpack.c.bf16 %v128_v50, %v127_v48  ;;  %s8412_s3 = sshll.u32 %s10403_s25, 4  ;;  %s8413_s3 = int_to_ptr.vmem [resolvable:$true] %s8412_s3 }
  0x1c   :  { %v9972_v54 = vpack.c.bf16 %v132_v52, %v131_v51  ;;  %v133_v55 = vld [vmem:[%s12123_s27 + $0x80] sm:$0xff]  ;;  %v134_v56 = vld [vmem:[%s12123_s27 + $0x88] sm:$0xff]  ;;  %v135_v62 = vld [vmem:[%s12123_s27 + $0x90] sm:$0xff]  ;;  %p10381_p1 = scmp.lt.s32.totalorder %s8413_s3, %s8413_s3 }
  0x1d   :  { %9955 = vmatpush3.bf16.msra.mxu0 %v9954_v27  ;;  %v137_v57 = vld [vmem:[%s12123_s27 + $0xa0] sm:$0xff]  ;;  %v138_v58 = vld [vmem:[%s12123_s27 + $0xa8] sm:$0xff]  ;;  %v9975_v60 = vpack.c.bf16 %v134_v56, %v133_v55  ;;  %v136_v0 = vld [vmem:[%s12123_s27 + $0x98] sm:$0xff] }
  0x1e   :  { %9961 = vmatpush3.bf16.msra.mxu1 %v9960_v29  ;;  %9962 = vmatprep.subr.bf16.mxu0 %v10400_v22  ;;  %v9981_v61 = vpack.c.bf16 %v138_v58, %v137_v57  ;;  %v139_v1 = vld [vmem:[%s12123_s27 + $0xb0] sm:$0xff]  ;;  %v140_v2 = vld [vmem:[%s12123_s27 + $0xb8] sm:$0xff]  ;;  %v141_v5 = vld [vmem:[%s12123_s27 + $0xc0] sm:$0xff] }
  0x1f   :  { %9968 = vmatprep.subr.bf16.mxu1 %v10400_v22  ;;  %v771_v19 = vld [vmem:[%s12096_s5] sm:$0xff]  ;;  %v772_v20 = vld [vmem:[%s12096_s5 + $0x8] sm:$0xff]  ;;  %v773_v26 = vld [vmem:[%s12096_s5 + $0x10] sm:$0xff] }
  0x20   :  { %v775_v21 = vld [vmem:[%s12096_s5 + $0x20] sm:$0xff]  ;;  %v776_v23 = vld [vmem:[%s12096_s5 + $0x28] sm:$0xff]  ;;  %v9999_v24 = vpack.c.bf16 %v772_v20, %v771_v19  ;;  %v774_v27 = vld [vmem:[%s12096_s5 + $0x18] sm:$0xff] }
  0x21   :  { %v10005_v25 = vpack.c.bf16 %v776_v23, %v775_v21  ;;  %v777_v28 = vld [vmem:[%s12096_s5 + $0x30] sm:$0xff]  ;;  %v778_v29 = vld [vmem:[%s12096_s5 + $0x38] sm:$0xff]  ;;  %v792_v48 = vld [vmem:[%s12096_s5 + $0xa8] sm:$0xff] }
  0x22   :  { %v781_v39 = vld [vmem:[%s12096_s5 + $0x50] sm:$0xff]  ;;  %v786_v42 = vld [vmem:[%s12096_s5 + $0x78] sm:$0xff]  ;;  %v795_v58 = vld [vmem:[%s12096_s5 + $0xc0] sm:$0xff] }
  0x23   :  { %v785_v41 = vld [vmem:[%s12096_s5 + $0x70] sm:$0xff]  ;;  %v794_v55 = vld [vmem:[%s12096_s5 + $0xb8] sm:$0xff]  ;;  %v1427_v19 = vld [vmem:[%s12097_s6 + $0x40] sm:$0xff] }
  0x24   :  { %v789_v52 = vld [vmem:[%s12096_s5 + $0x90] sm:$0xff]  ;;  %v1428_v20 = vld [vmem:[%s12097_s6 + $0x48] sm:$0xff]  ;;  %v1431_v21 = vld [vmem:[%s12097_s6 + $0x60] sm:$0xff] }
  0x25   :  { %v1432_v23 = vld [vmem:[%s12097_s6 + $0x68] sm:$0xff] }
  0x9f   :  { %v76_v7 = vpop.xlane.xlu0 %75 }
  0xa0   :  { %v81_v8 = vmul.f32 0.03125, %v76_v7  ;;  %v142_v7 = vld [vmem:[%s12123_s27 + $0xc8] sm:$0xff] }
  0xa2   :  { %v83_v9 = vsub.f32 %v69_v3, %v81_v8  ;;  %v9978_v3 = vpack.c.bf16 %v136_v0, %v135_v62  ;;  %v145_v8 = vld [vmem:[%s12123_s27 + $0xe0] sm:$0xff]  ;;  %v797_v0 = vld [vmem:[%s12096_s5 + $0xd0] sm:$0xff] }
  0xa3   :  { %v79_v10 = vpop.xlane.xlu0 %78 }
  0xa4   :  { %v82_v11 = vmul.f32 0.03125, %v79_v10  ;;  %v85_v12 = vmul.f32 %v83_v9, %v83_v9  ;;  %v9987_v10 = vpack.c.bf16 %v142_v7, %v141_v5  ;;  %v1420_v7 = vld [vmem:[%s12097_s6 + $0x8] sm:$0xff] }
  0xa6   :  { %v10522_v13 = vsub.f32 %v70_v4, %v82_v11  ;;  %v87_v14 = vsel %vm73_vm0, %v85_v12, 0.0  ;;  %v9984_v4 = vpack.c.bf16 %v140_v2, %v139_v1  ;;  %v143_v12 = vld [vmem:[%s12123_s27 + $0xd0] sm:$0xff]  ;;  %v798_v1 = vld [vmem:[%s12096_s5 + $0xd8] sm:$0xff] }
  0xa7   :  { %88 = vadd.xlane.f32.xlu1 %v87_v14  ;;  %v144_v14 = vld [vmem:[%s12123_s27 + $0xd8] sm:$0xff]  ;;  %v801_v2 = vld [vmem:[%s12096_s5 + $0xf0] sm:$0xff] }
  0xa8   :  { %v86_v15 = vmul.f32 %v10522_v13, %v10522_v13  ;;  %v9990_v17 = vpack.c.bf16 %v144_v14, %v143_v12  ;;  %v1421_v12 = vld [vmem:[%s12097_s6 + $0x10] sm:$0xff]  ;;  %v1422_v14 = vld [vmem:[%s12097_s6 + $0x18] sm:$0xff] }
  0xaa   :  { %v90_v16 = vsel %vm73_vm0, %v86_v15, 0.0  ;;  %v147_v15 = vld [vmem:[%s12123_s27 + $0xf0] sm:$0xff] }
  0xab   :  { %91 = vadd.xlane.f32.xlu1 %v90_v16  ;;  %v148_v16 = vld [vmem:[%s12123_s27 + $0xf8] sm:$0xff] }
  0xac   :  { %v9996_v18 = vpack.c.bf16 %v148_v16, %v147_v15  ;;  %v1425_v15 = vld [vmem:[%s12097_s6 + $0x30] sm:$0xff]  ;;  %v1426_v16 = vld [vmem:[%s12097_s6 + $0x38] sm:$0xff] }
 0x134   :  { %v89_v31 = vpop.xlane.xlu1 %88 }
 0x135   :  { %v93_v32 = vmul.f32 0.03125, %v89_v31  ;;  %v10002_v31 = vpack.c.bf16 %v774_v27, %v773_v26  ;;  %v1429_v26 = vld [vmem:[%s12097_s6 + $0x50] sm:$0xff]  ;;  %v1430_v27 = vld [vmem:[%s12097_s6 + $0x58] sm:$0xff] }
 0x137   :  { %v95_v33 = vadd.f32 1e-05, %v93_v32  ;;  %v10008_v32 = vpack.c.bf16 %v778_v29, %v777_v28  ;;  %v1433_v28 = vld [vmem:[%s12097_s6 + $0x70] sm:$0xff]  ;;  %v1434_v29 = vld [vmem:[%s12097_s6 + $0x78] sm:$0xff] }
 0x138   :  { %v92_v34 = vpop.xlane.xlu1 %91 }
 0x139   :  { %10292 = vrsqrt.f32 %v95_v33  ;;  %v94_v35 = vmul.f32 0.03125, %v92_v34  ;;  %v779_v33 = vld [vmem:[%s12096_s5 + $0x40] sm:$0xff]  ;;  %v780_v34 = vld [vmem:[%s12096_s5 + $0x48] sm:$0xff] }
 0x13b   :  { %v96_v36 = vadd.f32 1e-05, %v94_v35  ;;  %v783_v35 = vld [vmem:[%s12096_s5 + $0x60] sm:$0xff] }
 0x13d   :  { %10294 = vrsqrt.f32 %v96_v36  ;;  %v784_v36 = vld [vmem:[%s12096_s5 + $0x68] sm:$0xff] }
 0x143   :  { %v10293_v37 = vpop.eup %10292 }
 0x144   :  { %v99_v40 = vmul.f32 %v10293_v37, %v83_v9  ;;  %v146_v9 = vld [vmem:[%s12123_s27 + $0xe8] sm:$0xff]  ;;  %v10011_v37 = vpack.c.bf16 %v780_v34, %v779_v33  ;;  %v1435_v33 = vld [vmem:[%s12097_s6 + $0x80] sm:$0xff] }
 0x145   :  { %v9993_v11 = vpack.c.bf16 %v146_v9, %v145_v8  ;;  %v1423_v8 = vld [vmem:[%s12097_s6 + $0x20] sm:$0xff]  ;;  %v1424_v9 = vld [vmem:[%s12097_s6 + $0x28] sm:$0xff] }
 0x146   :  { %v107_v45 = vmul.f32 %v8423_v38, %v99_v40  ;;  %v782_v40 = vld [vmem:[%s12096_s5 + $0x58] sm:$0xff]  ;;  %v1436_v34 = vld [vmem:[%s12097_s6 + $0x88] sm:$0xff] }
 0x147   :  { %v10295_v59 = vpop.eup %10294  ;;  %v10014_v43 = vpack.c.bf16 %v782_v40, %v781_v39  ;;  %v1437_v39 = vld [vmem:[%s12097_s6 + $0x90] sm:$0xff]  ;;  %v1438_v40 = vld [vmem:[%s12097_s6 + $0x98] sm:$0xff] }
 0x148   :  { %v10583_v49 = vadd.f32 %v8424_v44, %v107_v45  ;;  %v100_v63 = vmul.f32 %v10295_v59, %v10522_v13  ;;  %v787_v45 = vld [vmem:[%s12096_s5 + $0x80] sm:$0xff]  ;;  %v796_v59 = vld [vmem:[%s12096_s5 + $0xc8] sm:$0xff] }
 0x149   :  { %v10035_v62 = vpack.c.bf16 %v796_v59, %v795_v58 }
 0x14a   :  { %9131 = vmatmul.mubr.msk.f32.vlgmr.msra.gmra.mrb[0].mxu0 %vm73_vm0, %v10583_v49  ;;  %9142 = vmatmul.mubr.msk.f32.vlgmr.msra.gmra.mrb[0].mxu1 %vm73_vm0, %v10583_v49  ;;  %v108_v6 = vmul.f32 %v8423_v38, %v100_v63  ;;  %v10017_v38 = vpack.c.bf16 %v784_v36, %v783_v35  ;;  %v1439_v35 = vld [vmem:[%s12097_s6 + $0xa0] sm:$0xff]  ;;  %v1440_v36 = vld [vmem:[%s12097_s6 + $0xa8] sm:$0xff] }
 0x14b   :  { %9964 = vmatpush3.bf16.msra.mxu0 %v9963_v46  ;;  %9970 = vmatpush3.bf16.msra.mxu1 %v9969_v47  ;;  %v788_v46 = vld [vmem:[%s12096_s5 + $0x88] sm:$0xff]  ;;  %v791_v47 = vld [vmem:[%s12096_s5 + $0xa0] sm:$0xff] }
 0x14c   :  { %9965 = vmatprep.subr.bf16.mxu0 %v10400_v22  ;;  %9971 = vmatprep.subr.bf16.mxu1 %v10400_v22  ;;  %v10656_v13 = vadd.f32 %v8424_v44, %v108_v6  ;;  %v10020_v44 = vpack.c.bf16 %v786_v42, %v785_v41  ;;  %v10023_v50 = vpack.c.bf16 %v788_v46, %v787_v45  ;;  %v1419_v6 = vld [vmem:[%s12097_s6] sm:$0xff]  ;;  %v1441_v41 = vld [vmem:[%s12097_s6 + $0xb0] sm:$0xff]  ;;  %v1442_v42 = vld [vmem:[%s12097_s6 + $0xb8] sm:$0xff] }
 0x14d   :  { %9152 = vmatprep.mubr.msk.f32.mxu0 %vm10401_vm1, %v10402_v30  ;;  %9163 = vmatprep.mubr.msk.f32.mxu1 %vm10401_vm1, %v10402_v30  ;;  %v10029_v51 = vpack.c.bf16 %v792_v48, %v791_v47  ;;  %v1443_v45 = vld [vmem:[%s12097_s6 + $0xc0] sm:$0xff]  ;;  %v1444_v46 = vld [vmem:[%s12097_s6 + $0xc8] sm:$0xff] }
 0x14e   :  { %v1447_v47 = vld [vmem:[%s12097_s6 + $0xe0] sm:$0xff]  ;;  %v1448_v48 = vld [vmem:[%s12097_s6 + $0xe8] sm:$0xff] }
 0x14f   :  { %9967 = vmatpush3.bf16.msra.mxu0 %v9966_v53  ;;  %9973 = vmatpush3.bf16.msra.mxu1 %v9972_v54  ;;  %v790_v53 = vld [vmem:[%s12096_s5 + $0x98] sm:$0xff]  ;;  %v793_v54 = vld [vmem:[%s12096_s5 + $0xb0] sm:$0xff] }
 0x150   :  { %9974 = vmatprep.subr.bf16.mxu0 %v10400_v22  ;;  %9980 = vmatprep.subr.bf16.mxu1 %v10400_v22  ;;  %v10026_v56 = vpack.c.bf16 %v790_v53, %v789_v52  ;;  %v10032_v57 = vpack.c.bf16 %v794_v55, %v793_v54  ;;  %v1445_v52 = vld [vmem:[%s12097_s6 + $0xd0] sm:$0xff]  ;;  %v1446_v53 = vld [vmem:[%s12097_s6 + $0xd8] sm:$0xff] }
 0x151   :  { %v1449_v54 = vld [vmem:[%s12097_s6 + $0xf0] sm:$0xff]  ;;  %v1450_v55 = vld [vmem:[%s12097_s6 + $0xf8] sm:$0xff] }
 0x152   :  { %9153 = vmatmul.mubr.msk.f32.vlgmr.msra.gmra.mrb[2].mxu0 %vm73_vm0, %v10583_v49  ;;  %9164 = vmatmul.mubr.msk.f32.vlgmr.msra.gmra.mrb[2].mxu1 %vm73_vm0, %v10583_v49 }
 0x153   :  { %9976 = vmatpush3.bf16.msra.mxu0 %v9975_v60  ;;  %9982 = vmatpush3.bf16.msra.mxu1 %v9981_v61  ;;  %v799_v60 = vld [vmem:[%s12096_s5 + $0xe0] sm:$0xff]  ;;  %v800_v61 = vld [vmem:[%s12096_s5 + $0xe8] sm:$0xff] }
 0x154   :  { %9977 = vmatprep.subr.bf16.mxu0 %v10400_v22  ;;  %9983 = vmatprep.subr.bf16.mxu1 %v10400_v22  ;;  %v10041_v63 = vpack.c.bf16 %v800_v61, %v799_v60 }
 0x155   :  { %9174 = vmatprep.mubr.msk.f32.mxu0 %vm10401_vm1, %v10402_v30  ;;  %9185 = vmatprep.mubr.msk.f32.mxu1 %vm10401_vm1, %v10402_v30 }
 0x157   :  { %9979 = vmatpush3.bf16.msra.mxu0 %v9978_v3  ;;  %9985 = vmatpush3.bf16.msra.mxu1 %v9984_v4  ;;  %v802_v3 = vld [vmem:[%s12096_s5 + $0xf8] sm:$0xff]  ;;  %v10038_v4 = vpack.c.bf16 %v798_v1, %v797_v0 }
 0x158   :  { %9986 = vmatprep.subr.bf16.mxu0 %v10400_v22  ;;  %9992 = vmatprep.subr.bf16.mxu1 %v10400_v22  ;;  %v10044_v5 = vpack.c.bf16 %v802_v3, %v801_v2 }
 0x15a   :  { %9175 = vmatmul.mubr.msk.f32.vlgmr.msra.gmra.mrb[4].mxu0 %vm73_vm0, %v10656_v13  ;;  %9186 = vmatmul.mubr.msk.f32.vlgmr.msra.gmra.mrb[4].mxu1 %vm73_vm0, %v10656_v13 }
 0x15b   :  { %9988 = vmatpush3.bf16.msra.mxu0 %v9987_v10  ;;  %9994 = vmatpush3.bf16.msra.mxu1 %v9993_v11  ;;  %v10047_v10 = vpack.c.bf16 %v1420_v7, %v1419_v6  ;;  %v10053_v11 = vpack.c.bf16 %v1424_v9, %v1423_v8 }
 0x15c   :  { %9989 = vmatprep.subr.bf16.mxu0 %v10400_v22  ;;  %9995 = vmatprep.subr.bf16.mxu1 %v10400_v22 }
 0x15d   :  { %9196 = vmatprep.mubr.msk.f32.mxu0 %vm10401_vm1, %v10402_v30  ;;  %9207 = vmatprep.mubr.msk.f32.mxu1 %vm10401_vm1, %v10402_v30 }
 0x15f   :  { %9991 = vmatpush3.bf16.msra.mxu0 %v9990_v17  ;;  %9997 = vmatpush3.bf16.msra.mxu1 %v9996_v18  ;;  %v10050_v17 = vpack.c.bf16 %v1422_v14, %v1421_v12  ;;  %v10056_v18 = vpack.c.bf16 %v1426_v16, %v1425_v15  ;;  %v8425_v14 = vld [vmem:[%s12098_s7] ss:$0 sm:$0xff] }
 0x160   :  { %9998 = vmatprep.subr.bf16.mxu0 %v10400_v22  ;;  %10004 = vmatprep.subr.bf16.mxu1 %v10400_v22 }
 0x162   :  { %9197 = vmatmul.mubr.msk.f32.vlgmr.msra.gmra.mrb[6].mxu0 %vm73_vm0, %v10656_v13  ;;  %9208 = vmatmul.mubr.msk.f32.vlgmr.msra.gmra.mrb[6].mxu1 %vm73_vm0, %v10656_v13 }
 0x163   :  { %10000 = vmatpush3.bf16.msra.mxu0 %v9999_v24  ;;  %10006 = vmatpush3.bf16.msra.mxu1 %v10005_v25  ;;  %v10059_v24 = vpack.c.bf16 %v1428_v20, %v1427_v19  ;;  %v10065_v25 = vpack.c.bf16 %v1432_v23, %v1431_v21  ;;  %v8426_v20 = vld [vmem:[%s12098_s7 + $0x1] ss:$0 sm:$0xff]  ;;  %v8443_v23 = vld [vmem:[%s12099_s8 + $0x2] ss:$0 sm:$0xff] }
 0x164   :  { %10001 = vmatprep.subr.bf16.mxu0 %v10400_v22  ;;  %10007 = vmatprep.subr.bf16.mxu1 %v10400_v22 }
 0x165   :  { %9218 = vmatprep.mubr.msk.f32.mxu0 %vm10401_vm1, %v10402_v30  ;;  %9229 = vmatprep.mubr.msk.f32.mxu1 %vm10401_vm1, %v10402_v30 }
 0x167   :  { %10003 = vmatpush3.bf16.msra.mxu0 %v10002_v31  ;;  %10009 = vmatpush3.bf16.msra.mxu1 %v10008_v32  ;;  %v10062_v31 = vpack.c.bf16 %v1430_v27, %v1429_v26  ;;  %v10068_v32 = vpack.c.bf16 %v1434_v29, %v1433_v28  ;;  %v8427_v28 = vld [vmem:[%s12098_s7 + $0x2] ss:$0 sm:$0xff]  ;;  %v8428_v29 = vld [vmem:[%s12098_s7 + $0x3] ss:$0 sm:$0xff] }
 0x168   :  { %10010 = vmatprep.subr.bf16.mxu0 %v10400_v22  ;;  %10016 = vmatprep.subr.bf16.mxu1 %v10400_v22 }
 0x16a   :  { %9219 = vmatmul.mubr.msk.f32.vlgmr.msra.gmra.mrb[8].mxu0 %vm73_vm0, %v10583_v49  ;;  %9230 = vmatmul.mubr.msk.f32.vlgmr.msra.gmra.mrb[8].mxu1 %vm73_vm0, %v10583_v49 }
 0x16b   :  { %10012 = vmatpush3.bf16.msra.mxu0 %v10011_v37  ;;  %10018 = vmatpush3.bf16.msra.mxu1 %v10017_v38  ;;  %v10071_v37 = vpack.c.bf16 %v1436_v34, %v1435_v33  ;;  %v10077_v38 = vpack.c.bf16 %v1440_v36, %v1439_v35 }
 0x16c   :  { %10013 = vmatprep.subr.bf16.mxu0 %v10400_v22  ;;  %10019 = vmatprep.subr.bf16.mxu1 %v10400_v22 }
 0x16d   :  { %9240 = vmatprep.mubr.msk.f32.mxu0 %vm10401_vm1, %v10402_v30  ;;  %9251 = vmatprep.mubr.msk.f32.mxu1 %vm10401_vm1, %v10402_v30 }
 0x16f   :  { %10015 = vmatpush3.bf16.msra.mxu0 %v10014_v43  ;;  %10021 = vmatpush3.bf16.msra.mxu1 %v10020_v44  ;;  %v10074_v43 = vpack.c.bf16 %v1438_v40, %v1437_v39  ;;  %v10080_v44 = vpack.c.bf16 %v1442_v42, %v1441_v41  ;;  %v8429_v41 = vld [vmem:[%s12098_s7 + $0x4] ss:$0 sm:$0xff]  ;;  %v8430_v42 = vld [vmem:[%s12098_s7 + $0x5] ss:$0 sm:$0xff] }
 0x170   :  { %10022 = vmatprep.subr.bf16.mxu0 %v10400_v22  ;;  %10028 = vmatprep.subr.bf16.mxu1 %v10400_v22 }
 0x172   :  { %9241 = vmatmul.mubr.msk.f32.vlgmr.msra.gmra.mrb[10].mxu0 %vm73_vm0, %v10583_v49  ;;  %9252 = vmatmul.mubr.msk.f32.vlgmr.msra.gmra.mrb[10].mxu1 %vm73_vm0, %v10583_v49 }
 0x173   :  { %10024 = vmatpush3.bf16.msra.mxu0 %v10023_v50  ;;  %10030 = vmatpush3.bf16.msra.mxu1 %v10029_v51  ;;  %v10083_v50 = vpack.c.bf16 %v1444_v46, %v1443_v45  ;;  %v10089_v51 = vpack.c.bf16 %v1448_v48, %v1447_v47 }
 0x174   :  { %10025 = vmatprep.subr.bf16.mxu0 %v10400_v22  ;;  %10031 = vmatprep.subr.bf16.mxu1 %v10400_v22 }
 0x175   :  { %9262 = vmatprep.mubr.msk.f32.mxu0 %vm10401_vm1, %v10402_v30  ;;  %9273 = vmatprep.mubr.msk.f32.mxu1 %vm10401_vm1, %v10402_v30 }
 0x177   :  { %10027 = vmatpush3.bf16.msra.mxu0 %v10026_v56  ;;  %10033 = vmatpush3.bf16.msra.mxu1 %v10032_v57  ;;  %v10086_v56 = vpack.c.bf16 %v1446_v53, %v1445_v52  ;;  %v10092_v57 = vpack.c.bf16 %v1450_v55, %v1449_v54  ;;  %v8431_v54 = vld [vmem:[%s12098_s7 + $0x6] ss:$0 sm:$0xff]  ;;  %v8432_v55 = vld [vmem:[%s12098_s7 + $0x7] ss:$0 sm:$0xff] }
 0x178   :  { %10034 = vmatprep.subr.bf16.mxu0 %v10400_v22  ;;  %10040 = vmatprep.subr.bf16.mxu1 %v10400_v22 }
 0x17a   :  { %9263 = vmatmul.mubr.msk.f32.vlgmr.msra.gmra.mrb[12].mxu0 %vm73_vm0, %v10656_v13  ;;  %9274 = vmatmul.mubr.msk.f32.vlgmr.msra.gmra.mrb[12].mxu1 %vm73_vm0, %v10656_v13 }
 0x17b   :  { %10036 = vmatpush3.bf16.msra.mxu0 %v10035_v62  ;;  %10042 = vmatpush3.bf16.msra.mxu1 %v10041_v63 }
 0x17c   :  { %10037 = vmatprep.subr.bf16.mxu0 %v10400_v22  ;;  %10043 = vmatprep.subr.bf16.mxu1 %v10400_v22 }
 0x17d   :  { %9284 = vmatprep.mubr.msk.f32.mxu0 %vm10401_vm1, %v10402_v30  ;;  %9295 = vmatprep.mubr.msk.f32.mxu1 %vm10401_vm1, %v10402_v30 }
 0x17f   :  { %10039 = vmatpush3.bf16.msra.mxu0 %v10038_v4  ;;  %10045 = vmatpush3.bf16.msra.mxu1 %v10044_v5 }
 0x180   :  { %10046 = vmatprep.subr.bf16.mxu0 %v10400_v22  ;;  %10052 = vmatprep.subr.bf16.mxu1 %v10400_v22 }
 0x182   :  { %9285 = vmatmul.mubr.msk.f32.vlgmr.msra.gmra.mrb[14].mxu0 %vm73_vm0, %v10656_v13  ;;  %9296 = vmatmul.mubr.msk.f32.vlgmr.msra.gmra.mrb[14].mxu1 %vm73_vm0, %v10656_v13 }
 0x183   :  { %10048 = vmatpush3.bf16.msra.mxu0 %v10047_v10  ;;  %10054 = vmatpush3.bf16.msra.mxu1 %v10053_v11  ;;  %v8441_v10 = vld [vmem:[%s12099_s8] ss:$0 sm:$0xff] }
 0x184   :  { %10049 = vmatprep.subr.bf16.mxu0 %v10400_v22  ;;  %10055 = vmatprep.subr.bf16.mxu1 %v10400_v22 }
 0x185   :  { %9306 = vmatprep.mubr.msk.f32.mxu0 %vm10401_vm1, %v10402_v30  ;;  %9317 = vmatprep.mubr.msk.f32.mxu1 %vm10401_vm1, %v10402_v30 }
 0x187   :  { %10051 = vmatpush3.bf16.msra.mxu0 %v10050_v17  ;;  %10057 = vmatpush3.bf16.msra.mxu1 %v10056_v18  ;;  %v8442_v18 = vld [vmem:[%s12099_s8 + $0x1] ss:$0 sm:$0xff] }
 0x188   :  { %10058 = vmatprep.subr.bf16.mxu0 %v10400_v22  ;;  %10064 = vmatprep.subr.bf16.mxu1 %v10400_v22 }
 0x18a   :  { %9307 = vmatmul.mubr.msk.f32.vlgmr.msra.gmra.mrb[16].mxu0 %vm73_vm0, %v10583_v49  ;;  %9318 = vmatmul.mubr.msk.f32.vlgmr.msra.gmra.mrb[16].mxu1 %vm73_vm0, %v10583_v49 }
 0x18b   :  { %10060 = vmatpush3.bf16.msra.mxu0 %v10059_v24  ;;  %10066 = vmatpush3.bf16.msra.mxu1 %v10065_v25  ;;  %v8444_v24 = vld [vmem:[%s12099_s8 + $0x3] ss:$0 sm:$0xff] }
 0x18c   :  { %10061 = vmatprep.subr.bf16.mxu0 %v10400_v22  ;;  %10067 = vmatprep.subr.bf16.mxu1 %v10400_v22 }
 0x18d   :  { %9328 = vmatprep.mubr.msk.f32.mxu0 %vm10401_vm1, %v10402_v30  ;;  %9339 = vmatprep.mubr.msk.f32.mxu1 %vm10401_vm1, %v10402_v30 }
 0x18f   :  { %10063 = vmatpush3.bf16.msra.mxu0 %v10062_v31  ;;  %10069 = vmatpush3.bf16.msra.mxu1 %v10068_v32 }
 0x190   :  { %10070 = vmatprep.subr.bf16.mxu0 %v10400_v22  ;;  %10076 = vmatprep.subr.bf16.mxu1 %v10400_v22 }
 0x192   :  { %9329 = vmatmul.mubr.msk.f32.vlgmr.msra.gmra.mrb[18].mxu0 %vm73_vm0, %v10583_v49  ;;  %9340 = vmatmul.mubr.msk.f32.vlgmr.msra.gmra.mrb[18].mxu1 %vm73_vm0, %v10583_v49 }
 0x193   :  { %10072 = vmatpush3.bf16.msra.mxu0 %v10071_v37  ;;  %10078 = vmatpush3.bf16.msra.mxu1 %v10077_v38  ;;  %v8445_v37 = vld [vmem:[%s12099_s8 + $0x4] ss:$0 sm:$0xff]  ;;  %v8446_v38 = vld [vmem:[%s12099_s8 + $0x5] ss:$0 sm:$0xff] }
 0x194   :  { %10073 = vmatprep.subr.bf16.mxu0 %v10400_v22  ;;  %10079 = vmatprep.subr.bf16.mxu1 %v10400_v22 }
 0x195   :  { %9350 = vmatprep.mubr.msk.f32.mxu0 %vm10401_vm1, %v10402_v30  ;;  %9361 = vmatprep.mubr.msk.f32.mxu1 %vm10401_vm1, %v10402_v30 }
 0x197   :  { %10075 = vmatpush3.bf16.msra.mxu0 %v10074_v43  ;;  %10081 = vmatpush3.bf16.msra.mxu1 %v10080_v44 }
 0x198   :  { %10082 = vmatprep.subr.bf16.mxu0 %v10400_v22  ;;  %10088 = vmatprep.subr.bf16.mxu1 %v10400_v22 }
 0x19a   :  { %9351 = vmatmul.mubr.msk.f32.vlgmr.msra.gmra.mrb[20].mxu0 %vm73_vm0, %v10656_v13  ;;  %9362 = vmatmul.mubr.msk.f32.vlgmr.msra.gmra.mrb[20].mxu1 %vm73_vm0, %v10656_v13 }
 0x19b   :  { %10084 = vmatpush3.bf16.msra.mxu0 %v10083_v50  ;;  %10090 = vmatpush3.bf16.msra.mxu1 %v10089_v51  ;;  %v8447_v50 = vld [vmem:[%s12099_s8 + $0x6] ss:$0 sm:$0xff]  ;;  %v8448_v51 = vld [vmem:[%s12099_s8 + $0x7] ss:$0 sm:$0xff] }
 0x19c   :  { %10085 = vmatprep.subr.bf16.mxu0 %v10400_v22  ;;  %10091 = vmatprep.subr.bf16.mxu1 %v10400_v22 }
 0x19d   :  { %9372 = vmatprep.mubr.msk.f32.mxu0 %vm10401_vm1, %v10402_v30  ;;  %9383 = vmatprep.mubr.msk.f32.mxu1 %vm10401_vm1, %v10402_v30 }
 0x19f   :  { %10087 = vmatpush3.bf16.msra.mxu0 %v10086_v56  ;;  %10093 = vmatpush3.bf16.msra.mxu1 %v10092_v57 }
 0x1a0   :  { %9386 = vmatprep.subr.mxu0 %v10402_v30  ;;  %9401 = vmatprep.subr.mxu1 %v10402_v30 }
 0x1a2   :  { %9373 = vmatmul.mubr.msk.f32.vlgmr.msra.gmra.mrb[22].mxu0 %vm73_vm0, %v10656_v13  ;;  %9384 = vmatmul.mubr.msk.f32.vlgmr.msra.gmra.mrb[22].mxu1 %vm73_vm0, %v10656_v13 }
 0x1a3   :  { %9388 = vmatprep.mubr.msk.f32.mxu0 %vm10401_vm1, %v10402_v30  ;;  %9403 = vmatprep.mubr.msk.f32.mxu1 %vm10401_vm1, %v10402_v30 }
 0x21d   :  { %v274_v58 = vpop.f32.mrb[0].mxu0  ;;  %v344_v59 = vpop.f32.mrb[0].mxu1 }
 0x21e   :  { %v9132_v60 = vpop.f32.mrb[1].mxu0  ;;  %v9143_v61 = vpop.f32.mrb[1].mxu1  ;;  %v275_v19 = vadd.f32 %v8425_v14, %v274_v58  ;;  %v345_v25 = vadd.f32 %v8426_v20, %v344_v59 }
 0x225   :  { %v414_v62 = vpop.f32.mrb[2].mxu0  ;;  %v484_v63 = vpop.f32.mrb[2].mxu1 }
 0x226   :  { %v9154_v0 = vpop.f32.mrb[3].mxu0  ;;  %v9165_v1 = vpop.f32.mrb[3].mxu1  ;;  %v415_v35 = vadd.f32 %v8427_v28, %v414_v62  ;;  %v485_v36 = vadd.f32 %v8428_v29, %v484_v63  ;;  %v8457_v62 = vld [vmem:[%s12100_s9] ss:$0 sm:$0xff]  ;;  %v8458_v63 = vld [vmem:[%s12100_s9 + $0x1] ss:$0 sm:$0xff] }
 0x22d   :  { %v557_v2 = vpop.f32.mrb[4].mxu0  ;;  %v627_v3 = vpop.f32.mrb[4].mxu1 }
 0x22e   :  { %v9176_v4 = vpop.f32.mrb[5].mxu0  ;;  %v9187_v5 = vpop.f32.mrb[5].mxu1  ;;  %v558_v47 = vadd.f32 %v8429_v41, %v557_v2  ;;  %v628_v48 = vadd.f32 %v8430_v42, %v627_v3 }
 0x235   :  { %v10977_v6 = vpop.f32.mrb[6].mxu0  ;;  %v10979_v7 = vpop.f32.mrb[6].mxu1 }
 0x236   :  { %v9198_v8 = vpop.f32.mrb[7].mxu0  ;;  %v9209_v9 = vpop.f32.mrb[7].mxu1  ;;  %v698_v60 = vadd.f32 %v8431_v54, %v10977_v6  ;;  %v768_v61 = vadd.f32 %v8432_v55, %v10979_v7 }
 0x23d   :  { %v925_v11 = vpop.f32.mrb[8].mxu0  ;;  %v995_v12 = vpop.f32.mrb[8].mxu1 }
 0x23e   :  { %v926_v15 = vadd.f32 %v8441_v10, %v925_v11  ;;  %v9220_v16 = vpop.f32.mrb[9].mxu0  ;;  %v9231_v17 = vpop.f32.mrb[9].mxu1  ;;  %v996_v21 = vadd.f32 %v8442_v18, %v995_v12 }
 0x240   :  { %9387 = vmatpush3.xpose.msk.msra.mxu0 %vm2067_vm2, %v926_v15 }
 0x241   :  { %9391 = vmatprep.subr.mxu0 %v10402_v30 }
 0x243   :  { %9389 = vmatmul.mubr.msk.f32.vlgmr.msra.gmra.mrb[24].mxu0 %vm2067_vm2, %v275_v19 }
 0x244   :  { %9392 = vmatpush3.xpose.msk.msra.mxu0 %vm2067_vm2, %v996_v21  ;;  %9393 = vmatprep.mubr.msk.f32.mxu0 %vm10401_vm1, %v10402_v30 }
 0x245   :  { %v1065_v26 = vpop.f32.mrb[10].mxu0  ;;  %v1135_v27 = vpop.f32.mrb[10].mxu1  ;;  %9396 = vmatprep.subr.mxu0 %v10402_v30 }
 0x246   :  { %v1066_v31 = vadd.f32 %v8443_v23, %v1065_v26  ;;  %v1136_v32 = vadd.f32 %v8444_v24, %v1135_v27  ;;  %v9242_v33 = vpop.f32.mrb[11].mxu0  ;;  %v9253_v34 = vpop.f32.mrb[11].mxu1 }
 0x247   :  { %9394 = vmatmul.mubr.msk.f32.vlgmr.msra.gmra.mrb[26].mxu0 %vm2067_vm2, %v345_v25 }
 0x248   :  { %9397 = vmatpush3.xpose.msk.msra.mxu0 %vm2067_vm2, %v1066_v31  ;;  %9402 = vmatpush3.xpose.msk.msra.mxu1 %vm2067_vm2, %v1136_v32 }
 0x249   :  { %9398 = vmatprep.mubr.msk.f32.mxu0 %vm10401_vm1, %v10402_v30  ;;  %9406 = vmatprep.subr.mxu0 %v10402_v30 }
 0x24a   :  { %9411 = vmatprep.subr.mxu1 %v10402_v30 }
 0x24b   :  { %9399 = vmatmul.mubr.msk.f32.vlgmr.msra.gmra.mrb[28].mxu0 %vm2067_vm2, %v415_v35  ;;  %9404 = vmatmul.mubr.msk.f32.vlgmr.msra.gmra.mrb[24].mxu1 %vm2067_vm2, %v485_v36 }
 0x24c   :  { %9408 = vmatprep.mubr.msk.f32.mxu0 %vm10401_vm1, %v10402_v30  ;;  %9413 = vmatprep.mubr.msk.f32.mxu1 %vm10401_vm1, %v10402_v30 }
 0x24d   :  { %v1205_v39 = vpop.f32.mrb[12].mxu0  ;;  %v1275_v40 = vpop.f32.mrb[12].mxu1 }
 0x24e   :  { %v1206_v43 = vadd.f32 %v8445_v37, %v1205_v39  ;;  %v1276_v44 = vadd.f32 %v8446_v38, %v1275_v40  ;;  %v9264_v45 = vpop.f32.mrb[13].mxu0  ;;  %v9275_v46 = vpop.f32.mrb[13].mxu1 }
 0x250   :  { %9407 = vmatpush3.xpose.msk.msra.mxu0 %vm2067_vm2, %v1206_v43  ;;  %9412 = vmatpush3.xpose.msk.msra.mxu1 %vm2067_vm2, %v1276_v44 }
 0x251   :  { %9416 = vmatprep.subr.mxu0 %v10402_v30  ;;  %9421 = vmatprep.subr.mxu1 %v10402_v30 }
 0x253   :  { %9409 = vmatmul.mubr.msk.f32.vlgmr.msra.gmra.mrb[30].mxu0 %vm2067_vm2, %v558_v47  ;;  %9414 = vmatmul.mubr.msk.f32.vlgmr.msra.gmra.mrb[26].mxu1 %vm2067_vm2, %v628_v48 }
 0x254   :  { %9418 = vmatprep.mubr.msk.f32.mxu0 %vm10401_vm1, %v10402_v30  ;;  %9423 = vmatprep.mubr.msk.f32.mxu1 %vm10401_vm1, %v10402_v30 }
 0x255   :  { %v1345_v52 = vpop.f32.mrb[14].mxu0  ;;  %v1415_v53 = vpop.f32.mrb[14].mxu1 }
 0x256   :  { %v1346_v56 = vadd.f32 %v8447_v50, %v1345_v52  ;;  %v1416_v57 = vadd.f32 %v8448_v51, %v1415_v53  ;;  %v9286_v58 = vpop.f32.mrb[15].mxu0  ;;  %v9297_v59 = vpop.f32.mrb[15].mxu1 }
 0x258   :  { %9417 = vmatpush3.xpose.msk.msra.mxu0 %vm2067_vm2, %v1346_v56  ;;  %9422 = vmatpush3.xpose.msk.msra.mxu1 %vm2067_vm2, %v1416_v57 }
 0x259   :  { %9426 = vmatprep.subr.mxu0 %v10402_v30  ;;  %9431 = vmatprep.subr.mxu1 %v10402_v30 }
 0x25b   :  { %9419 = vmatmul.mubr.msk.f32.vlgmr.msra.gmra.mrb[32].mxu0 %vm2067_vm2, %v698_v60  ;;  %9424 = vmatmul.mubr.msk.f32.vlgmr.msra.gmra.mrb[28].mxu1 %vm2067_vm2, %v768_v61 }
 0x25c   :  { %9428 = vmatprep.mubr.msk.f32.mxu0 %vm10401_vm1, %v10402_v30  ;;  %9433 = vmatprep.mubr.msk.f32.mxu1 %vm10401_vm1, %v10402_v30 }
 0x25d   :  { %v1573_v0 = vpop.f32.mrb[16].mxu0  ;;  %v1643_v1 = vpop.f32.mrb[16].mxu1 }
 0x25e   :  { %v1574_v2 = vadd.f32 %v8457_v62, %v1573_v0  ;;  %v1644_v3 = vadd.f32 %v8458_v63, %v1643_v1  ;;  %v9308_v4 = vpop.f32.mrb[17].mxu0  ;;  %v9319_v5 = vpop.f32.mrb[17].mxu1 }
 0x260   :  { %9427 = vmatpush3.msra.mxu0 %v1574_v2  ;;  %9432 = vmatpush3.msra.mxu1 %v1644_v3 }
 0x261   :  { %9436 = vmatprep.subr.mxu0 %v10402_v30  ;;  %9441 = vmatprep.subr.mxu1 %v10402_v30 }
 0x265   :  { %v11079_v6 = vpop.f32.mrb[18].mxu0  ;;  %v11081_v7 = vpop.f32.mrb[18].mxu1 }
 0x266   :  { %v9330_v8 = vpop.f32.mrb[19].mxu0  ;;  %v9341_v9 = vpop.f32.mrb[19].mxu1 }
 0x26d   :  { %v11083_v10 = vpop.f32.mrb[20].mxu0  ;;  %v11085_v11 = vpop.f32.mrb[20].mxu1 }
 0x26e   :  { %v9352_v12 = vpop.f32.mrb[21].mxu0  ;;  %v9363_v14 = vpop.f32.mrb[21].mxu1 }
 0x275   :  { %v11087_v15 = vpop.f32.mrb[22].mxu0  ;;  %v11089_v16 = vpop.f32.mrb[22].mxu1 }
 0x276   :  { %v9374_v17 = vpop.f32.mrb[23].mxu0  ;;  %v9385_v18 = vpop.f32.mrb[23].mxu1 }
 0x316   :  { %v2140_v19 = vpop.f32.mrb[24].mxu0 }
 0x317   :  { %v2676_v20 = vmul.f32 0.35355338, %v2140_v19  ;;  %v9390_v21 = vpop.f32.mrb[25].mxu0 }
 0x319   :  { %v2684_v23 = vsel %vm2067_vm2, %v2676_v20, -inf }
 0x31a   :  { %2685 = vmax.xlane.f32.xlu0 %v2684_v23  ;;  %v2216_v24 = vpop.f32.mrb[26].mxu0 }
 0x31b   :  { %v2677_v25 = vmul.f32 0.35355338, %v2216_v24  ;;  %v9395_v26 = vpop.f32.mrb[27].mxu0 }
 0x31d   :  { %v2687_v27 = vsel %vm2067_vm2, %v2677_v25, -inf }
 0x31e   :  { %v2368_v28 = vpop.f32.mrb[24].mxu1  ;;  %2688 = vmax.xlane.f32.xlu1 %v2687_v27  ;;  %v2292_v29 = vpop.f32.mrb[28].mxu0 }
 0x31f   :  { %v2679_v31 = vmul.f32 0.35355338, %v2368_v28  ;;  %v2678_v32 = vmul.f32 0.35355338, %v2292_v29  ;;  %v9400_v33 = vpop.f32.mrb[29].mxu0  ;;  %v9405_v34 = vpop.f32.mrb[25].mxu1 }
 0x321   :  { %v2693_v35 = vsel %vm2067_vm2, %v2679_v31, -inf  ;;  %v2690_v36 = vsel %vm2067_vm2, %v2678_v32, -inf }
 0x322   :  { %2694 = vmax.xlane.f32.xlu1 %v2693_v35  ;;  %2691 = vmax.xlane.f32.xlu0 %v2690_v36 }
 0x326   :  { %v2444_v37 = vpop.f32.mrb[30].mxu0  ;;  %v2520_v38 = vpop.f32.mrb[26].mxu1 }
 0x327   :  { %v2680_v39 = vmul.f32 0.35355338, %v2444_v37  ;;  %v2681_v40 = vmul.f32 0.35355338, %v2520_v38  ;;  %v9410_v41 = vpop.f32.mrb[31].mxu0  ;;  %v9415_v42 = vpop.f32.mrb[27].mxu1 }
 0x329   :  { %v2699_v43 = vsel %vm2067_vm2, %v2681_v40, -inf  ;;  %v2696_v44 = vsel %vm2067_vm2, %v2680_v39, -inf }
 0x32a   :  { %2700 = vmax.xlane.f32.xlu1 %v2699_v43  ;;  %2697 = vmax.xlane.f32.xlu0 %v2696_v44  ;;  %v8459_v43 = vld [vmem:[%s12100_s9 + $0x2] ss:$0 sm:$0xff] }
 0x32e   :  { %v2596_v45 = vpop.f32.mrb[32].mxu0  ;;  %v2672_v46 = vpop.f32.mrb[28].mxu1 }
 0x32f   :  { %v2682_v47 = vmul.f32 0.35355338, %v2596_v45  ;;  %v2683_v48 = vmul.f32 0.35355338, %v2672_v46  ;;  %v9420_v50 = vpop.f32.mrb[33].mxu0  ;;  %v9425_v51 = vpop.f32.mrb[29].mxu1  ;;  %v1714_v46 = vadd.f32 %v8459_v43, %v11079_v6 }
 0x330   :  { %v8462_v6 = vld [vmem:[%s12100_s9 + $0x5] ss:$0 sm:$0xff] }
 0x331   :  { %v2705_v52 = vsel %vm2067_vm2, %v2683_v48, -inf  ;;  %v2702_v53 = vsel %vm2067_vm2, %v2682_v47, -inf }
 0x332   :  { %2706 = vmax.xlane.f32.xlu1 %v2705_v52  ;;  %2703 = vmax.xlane.f32.xlu0 %v2702_v53 }
 0x3a7   :  { %v2686_v54 = vpop.xlane.xlu0 %2685 }
 0x3a8   :  { %v2708_v55 = vsub.f32 %v2676_v20, %v2686_v54 }
 0x3aa   :  { %v2716_v56 = vmul.f32 1.442695, %v2708_v55  ;;  %v8461_v55 = vld [vmem:[%s12100_s9 + $0x4] ss:$0 sm:$0xff] }
 0x3ab   :  { %v2689_v57 = vpop.xlane.xlu1 %2688 }
 0x3ac   :  { %10296 = vpow2.f32 %v2716_v56  ;;  %v2709_v58 = vsub.f32 %v2677_v25, %v2689_v57  ;;  %v1924_v57 = vadd.f32 %v8462_v6, %v11085_v11  ;;  %v8505_v6 = vld [vmem:[%s12102_s11] ss:$0 sm:$0xff] }
 0x3ae   :  { %v2718_v59 = vmul.f32 1.442695, %v2709_v58 }
 0x3af   :  { %v2695_v60 = vpop.xlane.xlu1 %2694  ;;  %v2692_v61 = vpop.xlane.xlu0 %2691 }
 0x3b0   :  { %10298 = vpow2.f32 %v2718_v59  ;;  %v2711_v62 = vsub.f32 %v2679_v31, %v2695_v60  ;;  %v2710_v63 = vsub.f32 %v2678_v32, %v2692_v61  ;;  %v1854_v59 = vadd.f32 %v8461_v55, %v11083_v10  ;;  %v8464_v10 = vld [vmem:[%s12100_s9 + $0x7] ss:$0 sm:$0xff] }
 0x3b2   :  { %v2722_v0 = vmul.f32 1.442695, %v2711_v62  ;;  %v2720_v1 = vmul.f32 1.442695, %v2710_v63  ;;  %v8463_v62 = vld [vmem:[%s12100_s9 + $0x6] ss:$0 sm:$0xff] }
 0x3b4   :  { %10300 = vpow2.f32 %v2722_v0 }
 0x3b5   :  { %10302 = vpow2.f32 %v2720_v1  ;;  %v2064_v1 = vadd.f32 %v8464_v10, %v11089_v16 }
 0x3b6   :  { %v10297_v2 = vpop.eup %10296 }
 0x3b7   :  { %v2701_v3 = vpop.xlane.xlu1 %2700  ;;  %v2698_v4 = vpop.xlane.xlu0 %2697  ;;  %v2732_v5 = vsel %vm2067_vm2, %v10297_v2, 0.0 }
 0x3b8   :  { %v2713_v8 = vsub.f32 %v2681_v40, %v2701_v3  ;;  %v2712_v9 = vsub.f32 %v2680_v39, %v2698_v4  ;;  %2733 = vadd.xlane.f32.xlu0 %v2732_v5  ;;  %v1994_v3 = vadd.f32 %v8463_v62, %v11087_v15 }
 0x3ba   :  { %v10299_v12 = vpop.eup %10298  ;;  %v2726_v14 = vmul.f32 1.442695, %v2713_v8  ;;  %v2724_v17 = vmul.f32 1.442695, %v2712_v9  ;;  %v3356_v8 = vld [vmem:[%s12101_s10] sm:$0xff]  ;;  %v3357_v9 = vld [vmem:[%s12101_s10 + $0x8] sm:$0xff] }
 0x3bb   :  { %v2735_v18 = vsel %vm2067_vm2, %v10299_v12, 0.0 }
 0x3bc   :  { %10304 = vpow2.f32 %v2726_v14  ;;  %2736 = vadd.xlane.f32.xlu1 %v2735_v18  ;;  %v3359_v18 = vld [vmem:[%s12101_s10 + $0x18] sm:$0xff] }
 0x3bd   :  { %10306 = vpow2.f32 %v2724_v17 }
 0x3be   :  { %v10301_v19 = vpop.eup %10300 }
 0x3bf   :  { %v10303_v20 = vpop.eup %10302  ;;  %v2707_v21 = vpop.xlane.xlu1 %2706  ;;  %v2741_v24 = vsel %vm2067_vm2, %v10301_v19, 0.0 }
 0x3c0   :  { %v2704_v23 = vpop.xlane.xlu0 %2703  ;;  %v2715_v25 = vsub.f32 %v2683_v48, %v2707_v21  ;;  %2742 = vadd.xlane.f32.xlu1 %v2741_v24  ;;  %v2738_v27 = vsel %vm2067_vm2, %v10303_v20, 0.0  ;;  %v3361_v21 = vld [vmem:[%s12101_s10 + $0x28] sm:$0xff]  ;;  %v3360_v24 = vld [vmem:[%s12101_s10 + $0x20] sm:$0xff] }
 0x3c1   :  { %v2714_v26 = vsub.f32 %v2682_v47, %v2704_v23  ;;  %2739 = vadd.xlane.f32.xlu0 %v2738_v27  ;;  %v8460_v47 = vld [vmem:[%s12100_s9 + $0x3] ss:$0 sm:$0xff] }
 0x3c2   :  { %v2730_v28 = vmul.f32 1.442695, %v2715_v25  ;;  %v1784_v52 = vadd.f32 %v8460_v47, %v11081_v7 }
 0x3c3   :  { %v2728_v29 = vmul.f32 1.442695, %v2714_v26 }
 0x3c4   :  { %10308 = vpow2.f32 %v2730_v28  ;;  %v3363_v28 = vld [vmem:[%s12101_s10 + $0x38] sm:$0xff] }
 0x3c5   :  { %10310 = vpow2.f32 %v2728_v29 }
 0x3c6   :  { %v11103_v31 = vpop.eup %10304 }
 0x3c7   :  { %v11105_v32 = vpop.eup %10306  ;;  %v2747_v33 = vsel %vm2067_vm2, %v11103_v31, 0.0 }
 0x3c8   :  { %2748 = vadd.xlane.f32.xlu1 %v2747_v33  ;;  %v2744_v34 = vsel %vm2067_vm2, %v11105_v32, 0.0 }
 0x3c9   :  { %2745 = vadd.xlane.f32.xlu0 %v2744_v34 }
 0x3ce   :  { %v11111_v35 = vpop.eup %10308 }
 0x3cf   :  { %v11113_v36 = vpop.eup %10310  ;;  %v2753_v37 = vsel %vm2067_vm2, %v11111_v35, 0.0 }
 0x3d0   :  { %2754 = vadd.xlane.f32.xlu1 %v2753_v37  ;;  %v2750_v38 = vsel %vm2067_vm2, %v11113_v36, 0.0 }
 0x3d1   :  { %2751 = vadd.xlane.f32.xlu0 %v2750_v38 }
 0x445   :  { %v2734_v39 = vpop.xlane.xlu0 %2733 }
 0x446   :  { %10312 = vrcp.f32 %v2734_v39 }
 0x449   :  { %v2737_v40 = vpop.xlane.xlu1 %2736 }
 0x44a   :  { %10314 = vrcp.f32 %v2737_v40 }
 0x44d   :  { %v2743_v41 = vpop.xlane.xlu1 %2742 }
 0x44e   :  { %10316 = vrcp.f32 %v2743_v41  ;;  %v2740_v42 = vpop.xlane.xlu0 %2739 }
 0x44f   :  { %10318 = vrcp.f32 %v2740_v42 }
 0x450   :  { %v10313_v44 = vpop.eup %10312 }
 0x451   :  { %v2764_v45 = vmul.f32 %v10313_v44, %v10297_v2 }
 0x453   :  { %9429 = vmatmul.mubr.msk.f32.vlgmr.msra.gmra.mrb[34].mxu0 %vm2067_vm2, %v2764_v45 }
 0x454   :  { %v10315_v48 = vpop.eup %10314  ;;  %9437 = vmatpush3.msra.mxu0 %v1714_v46  ;;  %9438 = vmatprep.mubr.msk.f32.mxu0 %vm10401_vm1, %v10402_v30 }
 0x455   :  { %v2765_v50 = vmul.f32 %v10315_v48, %v10299_v12  ;;  %v2749_v51 = vpop.xlane.xlu1 %2748  ;;  %9446 = vmatprep.subr.mxu0 %v10402_v30  ;;  %v3358_v12 = vld [vmem:[%s12101_s10 + $0x10] sm:$0xff] }
 0x456   :  { %10320 = vrcp.f32 %v2749_v51  ;;  %v2746_v53 = vpop.xlane.xlu0 %2745 }
 0x457   :  { %10322 = vrcp.f32 %v2746_v53  ;;  %9434 = vmatmul.mubr.msk.f32.vlgmr.msra.gmra.mrb[30].mxu1 %vm2067_vm2, %v2765_v50 }
 0x458   :  { %v10317_v54 = vpop.eup %10316  ;;  %9442 = vmatpush3.msra.mxu1 %v1784_v52  ;;  %9443 = vmatprep.mubr.msk.f32.mxu1 %vm10401_vm1, %v10402_v30 }
 0x459   :  { %v10319_v56 = vpop.eup %10318  ;;  %v2767_v7 = vmul.f32 %v10317_v54, %v10301_v19  ;;  %9451 = vmatprep.subr.mxu1 %v10402_v30 }
 0x45a   :  { %v2766_v58 = vmul.f32 %v10319_v56, %v10303_v20 }
 0x45b   :  { %9444 = vmatmul.mubr.msk.f32.vlgmr.msra.gmra.mrb[32].mxu1 %vm2067_vm2, %v2767_v7 }
 0x45c   :  { %9439 = vmatmul.mubr.msk.f32.vlgmr.msra.gmra.mrb[36].mxu0 %vm2067_vm2, %v2766_v58  ;;  %9452 = vmatpush3.msra.mxu1 %v1924_v57 }
 0x45d   :  { %9447 = vmatpush3.msra.mxu0 %v1854_v59  ;;  %v2755_v60 = vpop.xlane.xlu1 %2754  ;;  %9448 = vmatprep.mubr.msk.f32.mxu0 %vm10401_vm1, %v10402_v30 }
 0x45e   :  { %10324 = vrcp.f32 %v2755_v60  ;;  %v2752_v61 = vpop.xlane.xlu0 %2751  ;;  %9453 = vmatprep.mubr.msk.f32.mxu1 %vm10401_vm1, %v10402_v30  ;;  %9456 = vmatprep.subr.mxu0 %v10402_v30 }
 0x45f   :  { %10326 = vrcp.f32 %v2752_v61  ;;  %9461 = vmatprep.subr.mxu1 %v10402_v30 }
 0x460   :  { %v10321_v11 = vpop.eup %10320 }
 0x461   :  { %v10323_v63 = vpop.eup %10322  ;;  %v2769_v0 = vmul.f32 %v10321_v11, %v11103_v31  ;;  %v3362_v31 = vld [vmem:[%s12101_s10 + $0x30] sm:$0xff] }
 0x462   :  { %v2768_v2 = vmul.f32 %v10323_v63, %v11105_v32 }
 0x463   :  { %9454 = vmatmul.mubr.msk.f32.vlgmr.msra.gmra.mrb[34].mxu1 %vm2067_vm2, %v2769_v0 }
 0x464   :  { %9449 = vmatmul.mubr.msk.f32.vlgmr.msra.gmra.mrb[38].mxu0 %vm2067_vm2, %v2768_v2  ;;  %9462 = vmatpush3.msra.mxu1 %v2064_v1 }
 0x465   :  { %9457 = vmatpush3.msra.mxu0 %v1994_v3  ;;  %9458 = vmatprep.mubr.msk.f32.mxu0 %vm10401_vm1, %v10402_v30 }
 0x466   :  { %9463 = vmatprep.mubr.msk.f32.mxu1 %vm10401_vm1, %v10402_v30  ;;  %9466 = vmatprep.subr.mxu0 %v10402_v30 }
 0x467   :  { %9471 = vmatprep.subr.mxu1 %v10402_v30 }
 0x468   :  { %v10325_v16 = vpop.eup %10324 }
 0x469   :  { %v10327_v4 = vpop.eup %10326  ;;  %v2771_v15 = vmul.f32 %v10325_v16, %v11111_v35 }
 0x46a   :  { %v2770_v5 = vmul.f32 %v10327_v4, %v11113_v36 }
 0x46b   :  { %9464 = vmatmul.mubr.msk.f32.vlgmr.msra.gmra.mrb[36].mxu1 %vm2067_vm2, %v2771_v15 }
 0x46c   :  { %9459 = vmatmul.mubr.msk.f32.vlgmr.msra.gmra.mrb[40].mxu0 %vm2067_vm2, %v2770_v5  ;;  %9473 = vmatprep.mubr.msk.f32.mxu1 %vm10401_vm1, %v10402_v30 }
 0x46d   :  { %9468 = vmatprep.mubr.msk.f32.mxu0 %vm10401_vm1, %v10402_v30  ;;  %9467 = vmatpush3.msra.mxu0 %v3356_v8 }
 0x46e   :  { %9476 = vmatprep.subr.mxu0 %v10402_v30  ;;  %9472 = vmatpush3.msra.mxu1 %v3357_v9 }
 0x46f   :  { %9481 = vmatprep.subr.mxu1 %v10402_v30 }
 0x526   :  { %v2841_v14 = vpop.f32.mrb[34].mxu0 }
 0x527   :  { %v9430_v17 = vpop.f32.mrb[35].mxu0  ;;  %9469 = vmatmul.mubr.msk.f32.vlgmr.msra.gmra.mrb[42].mxu0 %vm2067_vm2, %v2841_v14 }
 0x528   :  { %9477 = vmatpush3.msra.mxu0 %v3358_v12  ;;  %9478 = vmatprep.mubr.msk.f32.mxu0 %vm10401_vm1, %v10402_v30 }
 0x529   :  { %9486 = vmatprep.subr.mxu0 %v10402_v30 }
 0x52a   :  { %v2914_v19 = vpop.f32.mrb[30].mxu1 }
 0x52b   :  { %v9435_v20 = vpop.f32.mrb[31].mxu1  ;;  %9474 = vmatmul.mubr.msk.f32.vlgmr.msra.gmra.mrb[38].mxu1 %vm2067_vm2, %v2914_v19 }
 0x52c   :  { %9482 = vmatpush3.msra.mxu1 %v3359_v18  ;;  %9483 = vmatprep.mubr.msk.f32.mxu1 %vm10401_vm1, %v10402_v30 }
 0x52d   :  { %9491 = vmatprep.subr.mxu1 %v10402_v30 }
 0x52e   :  { %v3060_v23 = vpop.f32.mrb[32].mxu1 }
 0x52f   :  { %v2987_v25 = vpop.f32.mrb[36].mxu0  ;;  %v9445_v26 = vpop.f32.mrb[33].mxu1  ;;  %9484 = vmatmul.mubr.msk.f32.vlgmr.msra.gmra.mrb[40].mxu1 %vm2067_vm2, %v3060_v23 }
 0x530   :  { %v9440_v27 = vpop.f32.mrb[37].mxu0  ;;  %9479 = vmatmul.mubr.msk.f32.vlgmr.msra.gmra.mrb[44].mxu0 %vm2067_vm2, %v2987_v25  ;;  %9492 = vmatpush3.msra.mxu1 %v3361_v21  ;;  %v4019_v26 = vld [vmem:[%s12105_s14 + $0x10] sm:$0xff] }
 0x531   :  { %9487 = vmatpush3.msra.mxu0 %v3360_v24  ;;  %9488 = vmatprep.mubr.msk.f32.mxu0 %vm10401_vm1, %v10402_v30  ;;  %v4018_v24 = vld [vmem:[%s12105_s14 + $0x8] sm:$0xff]  ;;  %v4020_v27 = vld [vmem:[%s12105_s14 + $0x18] sm:$0xff] }
 0x532   :  { %9493 = vmatprep.mubr.msk.f32.mxu1 %vm10401_vm1, %v10402_v30  ;;  %9496 = vmatprep.subr.mxu0 %v10402_v30 }
 0x533   :  { %9501 = vmatprep.subr.mxu1 %v10402_v30 }
 0x536   :  { %v3206_v29 = vpop.f32.mrb[34].mxu1 }
 0x537   :  { %v3133_v32 = vpop.f32.mrb[38].mxu0  ;;  %v9455_v33 = vpop.f32.mrb[35].mxu1  ;;  %9494 = vmatmul.mubr.msk.f32.vlgmr.msra.gmra.mrb[42].mxu1 %vm2067_vm2, %v3206_v29  ;;  %v4111_v29 = vld [vmem:[%s12107_s16] sm:$0xff] }
 0x538   :  { %v9450_v34 = vpop.f32.mrb[39].mxu0  ;;  %9489 = vmatmul.mubr.msk.f32.vlgmr.msra.gmra.mrb[46].mxu0 %vm2067_vm2, %v3133_v32  ;;  %9502 = vmatpush3.msra.mxu1 %v3363_v28  ;;  %v10098_v28 = vpack.c.bf16 %v4020_v27, %v4019_v26  ;;  %v4113_v32 = vld [vmem:[%s12107_s16 + $0x10] sm:$0xff] }
 0x539   :  { %9497 = vmatpush3.msra.mxu0 %v3362_v31  ;;  %9498 = vmatprep.mubr.msk.f32.mxu0 %vm10401_vm1, %v10402_v30  ;;  %v4112_v31 = vld [vmem:[%s12107_s16 + $0x8] sm:$0xff]  ;;  %v4114_v34 = vld [vmem:[%s12107_s16 + $0x18] sm:$0xff]  ;;  %v8518_v27 = vld [vmem:[%s12123_s27 + $0x110] sm:$0xff] }
 0x53a   :  { %9503 = vmatprep.mubr.msk.f32.mxu1 %vm10401_vm1, %v10402_v30  ;;  %v10102_v33 = vpack.c.bf16 %v4112_v31, %v4111_v29  ;;  %v8526_v29 = vld [vmem:[%s12123_s27 + $0x150] sm:$0xff] }
 0x53c   :  { %10103 = vmatprep.subr.bf16.mxu1 %v10102_v33 }
 0x53e   :  { %v3352_v35 = vpop.f32.mrb[36].mxu1 }
 0x53f   :  { %v3279_v36 = vpop.f32.mrb[40].mxu0  ;;  %v9465_v37 = vpop.f32.mrb[37].mxu1  ;;  %9504 = vmatmul.mubr.msk.f32.vlgmr.msra.gmra.mrb[44].mxu1 %vm2067_vm2, %v3352_v35  ;;  %v10106_v35 = vpack.c.bf16 %v4114_v34, %v4113_v32  ;;  %v8527_v32 = vld [vmem:[%s12123_s27 + $0x158] sm:$0xff] }
 0x540   :  { %v9460_v38 = vpop.f32.mrb[41].mxu0  ;;  %9499 = vmatmul.mubr.msk.f32.vlgmr.msra.gmra.mrb[48].mxu0 %vm2067_vm2, %v3279_v36  ;;  %v4115_v36 = vld [vmem:[%s12107_s16 + $0x20] sm:$0xff]  ;;  %v4116_v37 = vld [vmem:[%s12107_s16 + $0x28] sm:$0xff]  ;;  %10105 = vmatpush3.bf16.msra.mxu1 %v10102_v33  ;;  %v10134_v33 = vpack.c.bf16 %v8527_v32, %v8526_v29  ;;  %v8546_v29 = vld [vmem:[%s12123_s27 + $0x1f0] sm:$0xff] }
 0x541   :  { %10107 = vmatprep.subr.bf16.mxu1 %v10106_v35  ;;  %v10110_v38 = vpack.c.bf16 %v4116_v37, %v4115_v36  ;;  %v8582_v32 = vld [vmem:[%s12096_s5 + $0x150] sm:$0xff] }
 0x544   :  { %10109 = vmatpush3.bf16.msra.mxu1 %v10106_v35 }
 0x545   :  { %10111 = vmatprep.subr.bf16.mxu1 %v10110_v38 }
 0x548   :  { %10113 = vmatpush3.bf16.msra.mxu1 %v10110_v38 }
 0x5fa   :  { %v3433_v39 = vpop.f32.mrb[42].mxu0 }
 0x5fb   :  { %v9470_v40 = vpop.f32.mrb[43].mxu0  ;;  %v3948_v42 = vsel %vm73_vm0, %v3433_v39, 0.0 }
 0x5fe   :  { %v3506_v41 = vpop.f32.mrb[38].mxu1 }
 0x5ff   :  { %v3949_v43 = vsel %vm73_vm0, %v3506_v41, 0.0  ;;  %v9475_v44 = vpop.f32.mrb[39].mxu1 }
 0x600   :  { %v3950_v45 = vadd.f32 %v3949_v43, %v3948_v42  ;;  %v8506_v43 = vld [vmem:[%s12103_s12] ss:$0 sm:$0xff] }
 0x602   :  { %v3652_v46 = vpop.f32.mrb[40].mxu1 }
 0x603   :  { %v3579_v47 = vpop.f32.mrb[44].mxu0  ;;  %v9485_v48 = vpop.f32.mrb[41].mxu1  ;;  %v3953_v53 = vsel %vm73_vm0, %v3652_v46, 0.0 }
 0x604   :  { %v3951_v50 = vsel %vm73_vm0, %v3579_v47, 0.0  ;;  %v9480_v51 = vpop.f32.mrb[45].mxu0  ;;  %v8507_v47 = vld [vmem:[%s12104_s13] ss:$0 sm:$0xff] }
 0x605   :  { %v3952_v52 = vadd.f32 %v3951_v50, %v3950_v45 }
 0x607   :  { %v3954_v54 = vadd.f32 %v3953_v53, %v3952_v52 }
 0x609   :  { %v3969_v55 = vadd.f32 %v8505_v6, %v3954_v54 }
 0x60a   :  { %v3798_v56 = vpop.f32.mrb[42].mxu1 }
 0x60b   :  { %v3725_v7 = vpop.f32.mrb[46].mxu0  ;;  %v3956_v57 = vsel %vm73_vm0, %v3798_v56, 0.0  ;;  %v9495_v58 = vpop.f32.mrb[43].mxu1  ;;  %v3971_v59 = vadd.f32 %v3969_v55, %v10583_v49  ;;  %v4117_v55 = vld [vmem:[%s12107_s16 + $0x30] sm:$0xff]  ;;  %v4118_v56 = vld [vmem:[%s12107_s16 + $0x38] sm:$0xff] }
 0x60c   :  { %v3955_v60 = vsel %vm73_vm0, %v3725_v7, 0.0  ;;  %v9490_v61 = vpop.f32.mrb[47].mxu0  ;;  %v10114_v7 = vpack.c.bf16 %v4118_v56, %v4117_v55  ;;  %v8523_v55 = vld [vmem:[%s12123_s27 + $0x138] sm:$0xff]  ;;  %v8534_v56 = vld [vmem:[%s12123_s27 + $0x190] sm:$0xff] }
 0x60d   :  { %v3957_v10 = vadd.f32 %v3956_v57, %v3955_v60  ;;  %v3975_v11 = vsel %vm73_vm0, %v3971_v59, 0.0  ;;  %v8508_v57 = vld [vmem:[%s12126_s22] ss:$0 sm:$0xff] }
 0x60e   :  { %3976 = vadd.xlane.f32.xlu0 %v3975_v11  ;;  %10115 = vmatprep.subr.bf16.mxu1 %v10114_v7 }
 0x60f   :  { %10117 = vmatpush3.bf16.msra.mxu1 %v10114_v7  ;;  %v8535_v7 = vld [vmem:[%s12123_s27 + $0x198] sm:$0xff] }
 0x610   :  { %10130 = vmatprep.subr.bf16.mxu1 %v10400_v22 }
 0x612   :  { %v3944_v62 = vpop.f32.mrb[44].mxu1 }
 0x613   :  { %v3871_v63 = vpop.f32.mrb[48].mxu0  ;;  %v9505_v0 = vpop.f32.mrb[45].mxu1  ;;  %v3960_v16 = vsel %vm73_vm0, %v3944_v62, 0.0  ;;  %v8511_v62 = vld [vmem:[%s12108_s17] ss:$0 sm:$0xff] }
 0x614   :  { %v3958_v1 = vsel %vm73_vm0, %v3871_v63, 0.0  ;;  %v9500_v2 = vpop.f32.mrb[49].mxu0 }
 0x615   :  { %v3959_v3 = vadd.f32 %v3958_v1, %v3957_v10 }
 0x617   :  { %v3961_v4 = vadd.f32 %v3960_v16, %v3959_v3 }
 0x619   :  { %v3970_v15 = vadd.f32 %v8505_v6, %v3961_v4 }
 0x61b   :  { %v3972_v49 = vadd.f32 %v3970_v15, %v10656_v13  ;;  %v4017_v13 = vld [vmem:[%s12105_s14] sm:$0xff] }
 0x61c   :  { %v10094_v25 = vpack.c.bf16 %v4018_v24, %v4017_v13  ;;  %v8524_v13 = vld [vmem:[%s12123_s27 + $0x140] sm:$0xff] }
 0x61d   :  { %v3978_v5 = vsel %vm73_vm0, %v3972_v49, 0.0 }
 0x61e   :  { %3979 = vadd.xlane.f32.xlu1 %v3978_v5  ;;  %10095 = vmatprep.subr.bf16.mxu0 %v10094_v25 }
 0x61f   :  { %10097 = vmatpush3.bf16.msra.mxu0 %v10094_v25  ;;  %v8525_v25 = vld [vmem:[%s12123_s27 + $0x148] sm:$0xff] }
 0x620   :  { %10099 = vmatprep.subr.bf16.mxu0 %v10098_v28  ;;  %v10131_v26 = vpack.c.bf16 %v8525_v25, %v8524_v13  ;;  %v8544_v13 = vld [vmem:[%s12123_s27 + $0x1e0] sm:$0xff] }
 0x621   :  { %v8580_v25 = vld [vmem:[%s12096_s5 + $0x140] sm:$0xff] }
 0x623   :  { %10101 = vmatpush3.bf16.msra.mxu0 %v10098_v28  ;;  %v8519_v28 = vld [vmem:[%s12123_s27 + $0x118] sm:$0xff] }
 0x624   :  { %10118 = vmatprep.subr.bf16.mxu0 %v10400_v22  ;;  %v10122_v31 = vpack.c.bf16 %v8519_v28, %v8518_v27 }
 0x69b   :  { %v3977_v8 = vpop.xlane.xlu0 %3976 }
 0x69c   :  { %v3981_v9 = vmul.f32 0.03125, %v3977_v8 }
 0x69e   :  { %v3983_v12 = vsub.f32 %v3971_v59, %v3981_v9 }
 0x6a0   :  { %v3985_v14 = vmul.f32 %v3983_v12, %v3983_v12 }
 0x6a2   :  { %v3987_v17 = vsel %vm73_vm0, %v3985_v14, 0.0 }
 0x6a3   :  { %3988 = vadd.xlane.f32.xlu0 %v3987_v17 }
 0x6ab   :  { %v3980_v18 = vpop.xlane.xlu1 %3979 }
 0x6ac   :  { %v3982_v19 = vmul.f32 0.03125, %v3980_v18 }
 0x6ae   :  { %v3984_v20 = vsub.f32 %v3972_v49, %v3982_v19 }
 0x6b0   :  { %v3986_v21 = vmul.f32 %v3984_v20, %v3984_v20 }
 0x6b2   :  { %v3990_v23 = vsel %vm73_vm0, %v3986_v21, 0.0  ;;  %v8516_v21 = vld [vmem:[%s12123_s27 + $0x100] sm:$0xff] }
 0x6b3   :  { %3991 = vadd.xlane.f32.xlu1 %v3990_v23  ;;  %v8517_v23 = vld [vmem:[%s12123_s27 + $0x108] sm:$0xff] }
 0x6b4   :  { %v10119_v24 = vpack.c.bf16 %v8517_v23, %v8516_v21 }
 0x730   :  { %v3989_v39 = vpop.xlane.xlu0 %3988 }
 0x731   :  { %v3993_v40 = vmul.f32 0.03125, %v3989_v39 }
 0x733   :  { %v3995_v41 = vadd.f32 1e-05, %v3993_v40 }
 0x735   :  { %10328 = vrsqrt.f32 %v3995_v41  ;;  %v8514_v41 = vld [vmem:[%s12109_s18] ss:$0 sm:$0xff] }
 0x73f   :  { %v10329_v42 = vpop.eup %10328 }
 0x740   :  { %v3992_v44 = vpop.xlane.xlu1 %3991  ;;  %v3999_v45 = vmul.f32 %v10329_v42, %v3983_v12  ;;  %v8520_v42 = vld [vmem:[%s12123_s27 + $0x120] sm:$0xff] }
 0x741   :  { %v3994_v46 = vmul.f32 0.03125, %v3992_v44  ;;  %v8521_v44 = vld [vmem:[%s12123_s27 + $0x128] sm:$0xff] }
 0x742   :  { %v4007_v48 = vmul.f32 %v8506_v43, %v3999_v45  ;;  %v8532_v45 = vld [vmem:[%s12123_s27 + $0x180] sm:$0xff] }
 0x743   :  { %v3996_v50 = vadd.f32 1e-05, %v3994_v46  ;;  %v8533_v46 = vld [vmem:[%s12123_s27 + $0x188] sm:$0xff] }
 0x744   :  { %v4015_v51 = vadd.f32 %v8507_v47, %v4007_v48  ;;  %v8515_v48 = vld [vmem:[%s12110_s19] ss:$0 sm:$0xff] }
 0x745   :  { %10330 = vrsqrt.f32 %v3996_v50 }
 0x746   :  { %9514 = vmatprep.mubr.msk.f32.mxu0 %vm73_vm0, %v4015_v51 }
 0x74f   :  { %v10331_v52 = vpop.eup %10330 }
 0x750   :  { %v4000_v53 = vmul.f32 %v10331_v52, %v3984_v20  ;;  %v10143_v52 = vpack.c.bf16 %v8533_v46, %v8532_v45  ;;  %v8591_v45 = vld [vmem:[%s12096_s5 + $0x198] sm:$0xff] }
 0x752   :  { %v4008_v6 = vmul.f32 %v8506_v43, %v4000_v53  ;;  %v8522_v53 = vld [vmem:[%s12123_s27 + $0x130] sm:$0xff] }
 0x754   :  { %v4016_v54 = vadd.f32 %v8507_v47, %v4008_v6 }
 0x756   :  { %9515 = vmatmul.mubr.msk.f32.vlgmr.msra.gmra.mrb[50].mxu0 %vm73_vm0, %v4016_v54 }
 0x757   :  { %9544 = vmatprep.mubr.msk.f32.mxu0 %vm10401_vm1, %v10402_v30  ;;  %10120 = vmatpush3.bf16.msra.mxu0 %v10119_v24  ;;  %v8545_v24 = vld [vmem:[%s12123_s27 + $0x1e8] sm:$0xff] }
 0x758   :  { %10121 = vmatprep.subr.bf16.mxu0 %v10400_v22  ;;  %v10161_v27 = vpack.c.bf16 %v8545_v24, %v8544_v13  ;;  %v8632_v13 = vld [vmem:[%s12097_s6 + $0x120] sm:$0xff]  ;;  %v8633_v24 = vld [vmem:[%s12097_s6 + $0x128] sm:$0xff] }
 0x75b   :  { %10123 = vmatpush3.bf16.msra.mxu0 %v10122_v31  ;;  %v8547_v31 = vld [vmem:[%s12123_s27 + $0x1f8] sm:$0xff] }
 0x75c   :  { %10124 = vmatprep.subr.bf16.mxu0 %v10400_v22 }
 0x829   :  { %v9516_v58 = vpop.f32.mrb[50].mxu0 }
 0x82a   :  { %v4106_v59 = vadd.f32 %v9516_v58, %v8508_v57  ;;  %v4100_v60 = vpop.f32.mrb[51].mxu0  ;;  %v10146_v58 = vpack.c.bf16 %v8535_v7, %v8534_v56  ;;  %v8587_v56 = vld [vmem:[%s12096_s5 + $0x178] sm:$0xff]  ;;  %v8598_v7 = vld [vmem:[%s12096_s5 + $0x1d0] sm:$0xff] }
 0x82b   :  { %v4101_v61 = vadd.f32 %v8508_v57, %v4100_v60  ;;  %v10128_v57 = vpack.c.bf16 %v8523_v55, %v8522_v53  ;;  %v8586_v55 = vld [vmem:[%s12096_s5 + $0x170] sm:$0xff] }
 0x82c   :  { %v4110_v11 = vmax.f32 %v4106_v59, 0.0  ;;  %v8528_v59 = vld [vmem:[%s12123_s27 + $0x160] sm:$0xff] }
 0x82d   :  { %v4109_v10 = vmax.f32 %v4101_v61, 0.0  ;;  %v8529_v61 = vld [vmem:[%s12123_s27 + $0x168] sm:$0xff] }
 0x82f   :  { %9533 = vmatprep.mubr.msk.f32.mxu1 %vm4126_vm3, %v4109_v10  ;;  %v8540_v10 = vld [vmem:[%s12123_s27 + $0x1c0] sm:$0xff] }
 0x830   :  { %9534 = vmatmul.mubr.msk.f32.vlgmr.msra.gmra.mrb[46].mxu1 %vm4126_vm3, %v4110_v11  ;;  %v8541_v11 = vld [vmem:[%s12123_s27 + $0x1c8] sm:$0xff] }
 0x831   :  { %9566 = vmatprep.mubr.msk.f32.mxu1 %vm10401_vm1, %v10402_v30  ;;  %10132 = vmatpush3.bf16.msra.mxu1 %v10131_v26  ;;  %v8581_v26 = vld [vmem:[%s12096_s5 + $0x148] sm:$0xff] }
 0x832   :  { %10133 = vmatprep.subr.bf16.mxu1 %v10400_v22  ;;  %v10179_v28 = vpack.c.bf16 %v8581_v26, %v8580_v25  ;;  %v8644_v25 = vld [vmem:[%s12097_s6 + $0x180] sm:$0xff]  ;;  %v8645_v26 = vld [vmem:[%s12097_s6 + $0x188] sm:$0xff] }
 0x835   :  { %10135 = vmatpush3.bf16.msra.mxu1 %v10134_v33  ;;  %v8583_v33 = vld [vmem:[%s12096_s5 + $0x158] sm:$0xff] }
 0x836   :  { %10142 = vmatprep.subr.bf16.mxu1 %v10400_v22 }
 0x903   :  { %v9535_v63 = vpop.f32.mrb[46].mxu1 }
 0x904   :  { %v4205_v0 = vadd.f32 %v9535_v63, %v8511_v62  ;;  %v4199_v1 = vpop.f32.mrb[47].mxu1  ;;  %v10155_v63 = vpack.c.bf16 %v8541_v11, %v8540_v10  ;;  %v8628_v10 = vld [vmem:[%s12097_s6 + $0x100] sm:$0xff]  ;;  %v8629_v11 = vld [vmem:[%s12097_s6 + $0x108] sm:$0xff] }
 0x905   :  { %v4200_v2 = vadd.f32 %v8511_v62, %v4199_v1  ;;  %v10137_v62 = vpack.c.bf16 %v8529_v61, %v8528_v59  ;;  %v8593_v61 = vld [vmem:[%s12096_s5 + $0x1a8] sm:$0xff] }
 0x906   :  { %v4209_v3 = vadd.f32 %v4205_v0, %v4016_v54  ;;  %v8530_v0 = vld [vmem:[%s12123_s27 + $0x170] sm:$0xff] }
 0x907   :  { %v4208_v16 = vadd.f32 %v4200_v2, %v4015_v51  ;;  %v10125_v51 = vpack.c.bf16 %v8521_v44, %v8520_v42  ;;  %v8531_v2 = vld [vmem:[%s12123_s27 + $0x178] sm:$0xff]  ;;  %v8578_v42 = vld [vmem:[%s12096_s5 + $0x130] sm:$0xff] }
 0x908   :  { %v4215_v4 = vsel %vm73_vm0, %v4209_v3, 0.0  ;;  %v8590_v44 = vld [vmem:[%s12096_s5 + $0x190] sm:$0xff] }
 0x909   :  { %4216 = vadd.xlane.f32.xlu1 %v4215_v4  ;;  %v4212_v15 = vsel %vm73_vm0, %v4208_v16, 0.0  ;;  %v10140_v4 = vpack.c.bf16 %v8531_v2, %v8530_v0  ;;  %v8594_v0 = vld [vmem:[%s12096_s5 + $0x1b0] sm:$0xff]  ;;  %v8595_v2 = vld [vmem:[%s12096_s5 + $0x1b8] sm:$0xff] }
 0x90a   :  { %4213 = vadd.xlane.f32.xlu0 %v4212_v15 }
 0x996   :  { %v4217_v49 = vpop.xlane.xlu1 %4216 }
 0x997   :  { %v4219_v5 = vmul.f32 0.03125, %v4217_v49  ;;  %v4214_v8 = vpop.xlane.xlu0 %4213  ;;  %v8536_v49 = vld [vmem:[%s12123_s27 + $0x1a0] sm:$0xff] }
 0x998   :  { %v4218_v9 = vmul.f32 0.03125, %v4214_v8  ;;  %v8572_v8 = vld [vmem:[%s12096_s5 + $0x100] sm:$0xff] }
 0x999   :  { %v4221_v12 = vsub.f32 %v4209_v3, %v4219_v5  ;;  %v8542_v3 = vld [vmem:[%s12123_s27 + $0x1d0] sm:$0xff]  ;;  %v8537_v5 = vld [vmem:[%s12123_s27 + $0x1a8] sm:$0xff] }
 0x99a   :  { %v4220_v14 = vsub.f32 %v4208_v16, %v4218_v9  ;;  %v8543_v16 = vld [vmem:[%s12123_s27 + $0x1d8] sm:$0xff]  ;;  %v8573_v9 = vld [vmem:[%s12096_s5 + $0x108] sm:$0xff] }
 0x99b   :  { %v4223_v17 = vmul.f32 %v4221_v12, %v4221_v12  ;;  %v10158_v15 = vpack.c.bf16 %v8543_v16, %v8542_v3  ;;  %v8630_v3 = vld [vmem:[%s12097_s6 + $0x110] sm:$0xff]  ;;  %v8631_v16 = vld [vmem:[%s12097_s6 + $0x118] sm:$0xff] }
 0x99c   :  { %v4222_v18 = vmul.f32 %v4220_v14, %v4220_v14 }
 0x99d   :  { %v4227_v19 = vsel %vm73_vm0, %v4223_v17, 0.0  ;;  %v8538_v17 = vld [vmem:[%s12123_s27 + $0x1b0] sm:$0xff] }
 0x99e   :  { %4228 = vadd.xlane.f32.xlu1 %v4227_v19  ;;  %v4224_v20 = vsel %vm73_vm0, %v4222_v18, 0.0  ;;  %v8539_v18 = vld [vmem:[%s12123_s27 + $0x1b8] sm:$0xff]  ;;  %v8574_v19 = vld [vmem:[%s12096_s5 + $0x110] sm:$0xff] }
 0x99f   :  { %4225 = vadd.xlane.f32.xlu0 %v4224_v20  ;;  %v8575_v20 = vld [vmem:[%s12096_s5 + $0x118] sm:$0xff]  ;;  %v10152_v21 = vpack.c.bf16 %v8539_v18, %v8538_v17  ;;  %v8602_v17 = vld [vmem:[%s12096_s5 + $0x1f0] sm:$0xff] }
 0x9a0   :  { %v10170_v23 = vpack.c.bf16 %v8575_v20, %v8574_v19  ;;  %v8603_v18 = vld [vmem:[%s12096_s5 + $0x1f8] sm:$0xff]  ;;  %v8638_v19 = vld [vmem:[%s12097_s6 + $0x150] sm:$0xff] }
 0x9a1   :  { %v8639_v20 = vld [vmem:[%s12097_s6 + $0x158] sm:$0xff] }
 0xa2b   :  { %v4229_v34 = vpop.xlane.xlu1 %4228 }
 0xa2c   :  { %v4231_v35 = vmul.f32 0.03125, %v4229_v34  ;;  %v4226_v36 = vpop.xlane.xlu0 %4225  ;;  %v10164_v34 = vpack.c.bf16 %v8547_v31, %v8546_v29  ;;  %v8634_v29 = vld [vmem:[%s12097_s6 + $0x130] sm:$0xff]  ;;  %v8635_v31 = vld [vmem:[%s12097_s6 + $0x138] sm:$0xff] }
 0xa2d   :  { %v4230_v37 = vmul.f32 0.03125, %v4226_v36  ;;  %v8576_v36 = vld [vmem:[%s12096_s5 + $0x120] sm:$0xff] }
 0xa2e   :  { %v4233_v38 = vadd.f32 1e-05, %v4231_v35  ;;  %v10182_v35 = vpack.c.bf16 %v8583_v33, %v8582_v32  ;;  %v8646_v32 = vld [vmem:[%s12097_s6 + $0x190] sm:$0xff]  ;;  %v8647_v33 = vld [vmem:[%s12097_s6 + $0x198] sm:$0xff] }
 0xa2f   :  { %v4232_v39 = vadd.f32 1e-05, %v4230_v37  ;;  %v8577_v37 = vld [vmem:[%s12096_s5 + $0x128] sm:$0xff] }
 0xa31   :  { %10332 = vrsqrt.f32 %v4232_v39  ;;  %v8589_v39 = vld [vmem:[%s12096_s5 + $0x188] sm:$0xff] }
 0xa32   :  { %10334 = vrsqrt.f32 %v4233_v38  ;;  %v8588_v38 = vld [vmem:[%s12096_s5 + $0x180] sm:$0xff] }
 0xa3b   :  { %v10333_v40 = vpop.eup %10332 }
 0xa3c   :  { %v4236_v43 = vmul.f32 %v10333_v40, %v4220_v14  ;;  %v10335_v47 = vpop.eup %10334  ;;  %v10167_v14 = vpack.c.bf16 %v8573_v9, %v8572_v8  ;;  %v10173_v40 = vpack.c.bf16 %v8577_v37, %v8576_v36  ;;  %v8636_v8 = vld [vmem:[%s12097_s6 + $0x140] sm:$0xff]  ;;  %v8637_v9 = vld [vmem:[%s12097_s6 + $0x148] sm:$0xff] }
 0xa3d   :  { %v4237_v6 = vmul.f32 %v10335_v47, %v4221_v12  ;;  %v10149_v12 = vpack.c.bf16 %v8537_v5, %v8536_v49  ;;  %v10194_v47 = vpack.c.bf16 %v8591_v45, %v8590_v44  ;;  %v8600_v49 = vld [vmem:[%s12096_s5 + $0x1e0] sm:$0xff]  ;;  %v8601_v5 = vld [vmem:[%s12096_s5 + $0x1e8] sm:$0xff]  ;;  %v8654_v44 = vld [vmem:[%s12097_s6 + $0x1d0] sm:$0xff] }
 0xa3e   :  { %v4244_v50 = vmul.f32 %v8514_v41, %v4236_v43  ;;  %v8579_v43 = vld [vmem:[%s12096_s5 + $0x138] sm:$0xff]  ;;  %v8640_v36 = vld [vmem:[%s12097_s6 + $0x160] sm:$0xff]  ;;  %v8641_v37 = vld [vmem:[%s12097_s6 + $0x168] sm:$0xff] }
 0xa3f   :  { %v4245_v60 = vmul.f32 %v8514_v41, %v4237_v6  ;;  %v10191_v41 = vpack.c.bf16 %v8589_v39, %v8588_v38  ;;  %v10176_v46 = vpack.c.bf16 %v8579_v43, %v8578_v42  ;;  %v8652_v38 = vld [vmem:[%s12097_s6 + $0x1c0] sm:$0xff]  ;;  %v8653_v39 = vld [vmem:[%s12097_s6 + $0x1c8] sm:$0xff]  ;;  %v8642_v42 = vld [vmem:[%s12097_s6 + $0x170] sm:$0xff] }
 0xa40   :  { %v11355_v54 = vadd.f32 %v8515_v48, %v4244_v50  ;;  %v8585_v50 = vld [vmem:[%s12096_s5 + $0x168] sm:$0xff]  ;;  %v8643_v43 = vld [vmem:[%s12097_s6 + $0x178] sm:$0xff] }
 0xa41   :  { %v11391_v1 = vadd.f32 %v8515_v48, %v4245_v60  ;;  %v8584_v48 = vld [vmem:[%s12096_s5 + $0x160] sm:$0xff]  ;;  %v8655_v45 = vld [vmem:[%s12097_s6 + $0x1d8] sm:$0xff] }
 0xa42   :  { %9545 = vmatmul.mubr.msk.f32.vlgmr.msra.gmra.mrb[52].mxu0 %vm73_vm0, %v11355_v54  ;;  %9567 = vmatmul.mubr.msk.f32.vlgmr.msra.gmra.mrb[48].mxu1 %vm73_vm0, %v11355_v54  ;;  %v10185_v53 = vpack.c.bf16 %v8585_v50, %v8584_v48  ;;  %v8592_v60 = vld [vmem:[%s12096_s5 + $0x1a0] sm:$0xff]  ;;  %v8649_v50 = vld [vmem:[%s12097_s6 + $0x1a8] sm:$0xff] }
 0xa43   :  { %10126 = vmatpush3.bf16.msra.mxu0 %v10125_v51  ;;  %10144 = vmatpush3.bf16.msra.mxu1 %v10143_v52  ;;  %v8596_v51 = vld [vmem:[%s12096_s5 + $0x1c0] sm:$0xff]  ;;  %v8597_v52 = vld [vmem:[%s12096_s5 + $0x1c8] sm:$0xff] }
 0xa44   :  { %10127 = vmatprep.subr.bf16.mxu0 %v10400_v22  ;;  %10145 = vmatprep.subr.bf16.mxu1 %v10400_v22  ;;  %v10203_v6 = vpack.c.bf16 %v8597_v52, %v8596_v51  ;;  %v8648_v48 = vld [vmem:[%s12097_s6 + $0x1a0] sm:$0xff]  ;;  %v8650_v52 = vld [vmem:[%s12097_s6 + $0x1b0] sm:$0xff] }
 0xa45   :  { %9555 = vmatprep.mubr.msk.f32.mxu0 %vm10401_vm1, %v10402_v30  ;;  %9588 = vmatprep.mubr.msk.f32.mxu1 %vm10401_vm1, %v10402_v30  ;;  %v10245_v51 = vpack.c.bf16 %v8649_v50, %v8648_v48 }
 0xa47   :  { %10129 = vmatpush3.bf16.msra.mxu0 %v10128_v57  ;;  %10147 = vmatpush3.bf16.msra.mxu1 %v10146_v58  ;;  %v8599_v57 = vld [vmem:[%s12096_s5 + $0x1d8] sm:$0xff]  ;;  %v10188_v58 = vpack.c.bf16 %v8587_v56, %v8586_v55  ;;  %v8656_v55 = vld [vmem:[%s12097_s6 + $0x1e0] sm:$0xff]  ;;  %v8657_v56 = vld [vmem:[%s12097_s6 + $0x1e8] sm:$0xff] }
 0xa48   :  { %10136 = vmatprep.subr.bf16.mxu0 %v10400_v22  ;;  %10154 = vmatprep.subr.bf16.mxu1 %v10400_v22  ;;  %v10206_v59 = vpack.c.bf16 %v8599_v57, %v8598_v7  ;;  %v10257_v7 = vpack.c.bf16 %v8657_v56, %v8656_v55  ;;  %v8658_v57 = vld [vmem:[%s12097_s6 + $0x1f0] sm:$0xff]  ;;  %v8561_v56 = vld [vmem:[%s12098_s7 + $0xd] ss:$0 sm:$0xff] }
 0xa4a   :  { %9556 = vmatmul.mubr.msk.f32.vlgmr.msra.gmra.mrb[54].mxu0 %vm73_vm0, %v11355_v54  ;;  %9589 = vmatmul.mubr.msk.f32.vlgmr.msra.gmra.mrb[50].mxu1 %vm73_vm0, %v11391_v1 }
 0xa4b   :  { %10138 = vmatpush3.bf16.msra.mxu0 %v10137_v62  ;;  %10156 = vmatpush3.bf16.msra.mxu1 %v10155_v63  ;;  %v10197_v62 = vpack.c.bf16 %v8593_v61, %v8592_v60  ;;  %v10215_v63 = vpack.c.bf16 %v8629_v11, %v8628_v10 }
 0xa4c   :  { %10139 = vmatprep.subr.bf16.mxu0 %v10400_v22  ;;  %10157 = vmatprep.subr.bf16.mxu1 %v10400_v22 }
 0xa4d   :  { %9577 = vmatprep.mubr.msk.f32.mxu0 %vm10401_vm1, %v10402_v30  ;;  %9610 = vmatprep.mubr.msk.f32.mxu1 %vm10401_vm1, %v10402_v30 }
 0xa4f   :  { %10141 = vmatpush3.bf16.msra.mxu0 %v10140_v4  ;;  %10159 = vmatpush3.bf16.msra.mxu1 %v10158_v15  ;;  %v10200_v4 = vpack.c.bf16 %v8595_v2, %v8594_v0  ;;  %v10218_v15 = vpack.c.bf16 %v8631_v16, %v8630_v3 }
 0xa50   :  { %10148 = vmatprep.subr.bf16.mxu0 %v10400_v22  ;;  %10166 = vmatprep.subr.bf16.mxu1 %v10400_v22 }
 0xa52   :  { %9578 = vmatmul.mubr.msk.f32.vlgmr.msra.gmra.mrb[56].mxu0 %vm73_vm0, %v11355_v54  ;;  %9611 = vmatmul.mubr.msk.f32.vlgmr.msra.gmra.mrb[52].mxu1 %vm73_vm0, %v11391_v1 }
 0xa53   :  { %10150 = vmatpush3.bf16.msra.mxu0 %v10149_v12  ;;  %10168 = vmatpush3.bf16.msra.mxu1 %v10167_v14  ;;  %v10209_v12 = vpack.c.bf16 %v8601_v5, %v8600_v49  ;;  %v10227_v14 = vpack.c.bf16 %v8637_v9, %v8636_v8  ;;  %v8556_v8 = vld [vmem:[%s12098_s7 + $0x8] ss:$0 sm:$0xff] }
 0xa54   :  { %10151 = vmatprep.subr.bf16.mxu0 %v10400_v22  ;;  %10169 = vmatprep.subr.bf16.mxu1 %v10400_v22 }
 0xa55   :  { %9599 = vmatprep.mubr.msk.f32.mxu0 %vm10401_vm1, %v10402_v30  ;;  %9632 = vmatprep.mubr.msk.f32.mxu1 %vm10401_vm1, %v10402_v30 }
 0xa57   :  { %10153 = vmatpush3.bf16.msra.mxu0 %v10152_v21  ;;  %10171 = vmatpush3.bf16.msra.mxu1 %v10170_v23  ;;  %v10212_v21 = vpack.c.bf16 %v8603_v18, %v8602_v17  ;;  %v10230_v23 = vpack.c.bf16 %v8639_v20, %v8638_v19  ;;  %v8614_v18 = vld [vmem:[%s12099_s8 + $0xa] ss:$0 sm:$0xff] }
 0xa58   :  { %10160 = vmatprep.subr.bf16.mxu0 %v10400_v22  ;;  %10178 = vmatprep.subr.bf16.mxu1 %v10400_v22 }
 0xa5a   :  { %9600 = vmatmul.mubr.msk.f32.vlgmr.msra.gmra.mrb[58].mxu0 %vm73_vm0, %v11391_v1  ;;  %9633 = vmatmul.mubr.msk.f32.vlgmr.msra.gmra.mrb[54].mxu1 %vm73_vm0, %v11355_v54 }
 0xa5b   :  { %10162 = vmatpush3.bf16.msra.mxu0 %v10161_v27  ;;  %10180 = vmatpush3.bf16.msra.mxu1 %v10179_v28  ;;  %v10221_v27 = vpack.c.bf16 %v8633_v24, %v8632_v13  ;;  %v10239_v28 = vpack.c.bf16 %v8645_v26, %v8644_v25  ;;  %v8613_v26 = vld [vmem:[%s12099_s8 + $0x9] ss:$0 sm:$0xff] }
 0xa5c   :  { %10163 = vmatprep.subr.bf16.mxu0 %v10400_v22  ;;  %10181 = vmatprep.subr.bf16.mxu1 %v10400_v22 }
 0xa5d   :  { %9621 = vmatprep.mubr.msk.f32.mxu0 %vm10401_vm1, %v10402_v30  ;;  %9654 = vmatprep.mubr.msk.f32.mxu1 %vm10401_vm1, %v10402_v30 }
 0xa5f   :  { %10165 = vmatpush3.bf16.msra.mxu0 %v10164_v34  ;;  %10183 = vmatpush3.bf16.msra.mxu1 %v10182_v35  ;;  %v10224_v34 = vpack.c.bf16 %v8635_v31, %v8634_v29  ;;  %v10242_v35 = vpack.c.bf16 %v8647_v33, %v8646_v32  ;;  %v8557_v31 = vld [vmem:[%s12098_s7 + $0x9] ss:$0 sm:$0xff]  ;;  %v8560_v32 = vld [vmem:[%s12098_s7 + $0xc] ss:$0 sm:$0xff] }
 0xa60   :  { %10172 = vmatprep.subr.bf16.mxu0 %v10400_v22  ;;  %10190 = vmatprep.subr.bf16.mxu1 %v10400_v22 }
 0xa62   :  { %9622 = vmatmul.mubr.msk.f32.vlgmr.msra.gmra.mrb[60].mxu0 %vm73_vm0, %v11391_v1  ;;  %9655 = vmatmul.mubr.msk.f32.vlgmr.msra.gmra.mrb[56].mxu1 %vm73_vm0, %v11355_v54 }
 0xa63   :  { %10174 = vmatpush3.bf16.msra.mxu0 %v10173_v40  ;;  %10192 = vmatpush3.bf16.msra.mxu1 %v10191_v41  ;;  %v10233_v40 = vpack.c.bf16 %v8641_v37, %v8640_v36  ;;  %v10251_v41 = vpack.c.bf16 %v8653_v39, %v8652_v38  ;;  %v8615_v39 = vld [vmem:[%s12099_s8 + $0xb] ss:$0 sm:$0xff] }
 0xa64   :  { %10175 = vmatprep.subr.bf16.mxu0 %v10400_v22  ;;  %10193 = vmatprep.subr.bf16.mxu1 %v10400_v22 }
 0xa65   :  { %9643 = vmatprep.mubr.msk.f32.mxu0 %vm10401_vm1, %v10402_v30  ;;  %9676 = vmatprep.mubr.msk.f32.mxu1 %vm10401_vm1, %v10402_v30 }
 0xa67   :  { %10177 = vmatpush3.bf16.msra.mxu0 %v10176_v46  ;;  %10195 = vmatpush3.bf16.msra.mxu1 %v10194_v47  ;;  %v10236_v46 = vpack.c.bf16 %v8643_v43, %v8642_v42  ;;  %v10254_v47 = vpack.c.bf16 %v8655_v45, %v8654_v44  ;;  %v8559_v43 = vld [vmem:[%s12098_s7 + $0xb] ss:$0 sm:$0xff]  ;;  %v8562_v44 = vld [vmem:[%s12098_s7 + $0xe] ss:$0 sm:$0xff] }
 0xa68   :  { %10184 = vmatprep.subr.bf16.mxu0 %v10400_v22  ;;  %10202 = vmatprep.subr.bf16.mxu1 %v10400_v22 }
 0xa6a   :  { %9644 = vmatmul.mubr.msk.f32.vlgmr.msra.gmra.mrb[62].mxu0 %vm73_vm0, %v11355_v54  ;;  %9677 = vmatmul.mubr.msk.f32.vlgmr.msra.gmra.mrb[58].mxu1 %vm73_vm0, %v11391_v1 }
 0xa6b   :  { %10186 = vmatpush3.bf16.msra.mxu0 %v10185_v53  ;;  %10204 = vmatpush3.bf16.msra.mxu1 %v10203_v6  ;;  %v8651_v53 = vld [vmem:[%s12097_s6 + $0x1b8] sm:$0xff] }
 0xa6c   :  { %10187 = vmatprep.subr.bf16.mxu0 %v10400_v22  ;;  %10205 = vmatprep.subr.bf16.mxu1 %v10400_v22  ;;  %v10248_v6 = vpack.c.bf16 %v8651_v53, %v8650_v52  ;;  %v8617_v52 = vld [vmem:[%s12099_s8 + $0xd] ss:$0 sm:$0xff]  ;;  %v8668_v53 = vld [vmem:[%s12100_s9 + $0x8] ss:$0 sm:$0xff] }
 0xa6d   :  { %9665 = vmatprep.mubr.msk.f32.mxu0 %vm10401_vm1, %v10402_v30  ;;  %9698 = vmatprep.mubr.msk.f32.mxu1 %vm10401_vm1, %v10402_v30 }
 0xa6f   :  { %10189 = vmatpush3.bf16.msra.mxu0 %v10188_v58  ;;  %10207 = vmatpush3.bf16.msra.mxu1 %v10206_v59  ;;  %v8659_v58 = vld [vmem:[%s12097_s6 + $0x1f8] sm:$0xff] }
 0xa70   :  { %10196 = vmatprep.subr.bf16.mxu0 %v10400_v22  ;;  %10214 = vmatprep.subr.bf16.mxu1 %v10400_v22  ;;  %v10260_v59 = vpack.c.bf16 %v8659_v58, %v8658_v57 }
 0xa72   :  { %9666 = vmatmul.mubr.msk.f32.vlgmr.msra.gmra.mrb[64].mxu0 %vm73_vm0, %v11355_v54  ;;  %9699 = vmatmul.mubr.msk.f32.vlgmr.msra.gmra.mrb[60].mxu1 %vm73_vm0, %v11391_v1 }
 0xa73   :  { %10198 = vmatpush3.bf16.msra.mxu0 %v10197_v62  ;;  %10216 = vmatpush3.bf16.msra.mxu1 %v10215_v63 }
 0xa74   :  { %10199 = vmatprep.subr.bf16.mxu0 %v10400_v22  ;;  %10217 = vmatprep.subr.bf16.mxu1 %v10400_v22 }
 0xa75   :  { %9687 = vmatprep.mubr.msk.f32.mxu0 %vm10401_vm1, %v10402_v30  ;;  %9720 = vmatprep.mubr.msk.f32.mxu1 %vm10401_vm1, %v10402_v30 }
 0xa77   :  { %10201 = vmatpush3.bf16.msra.mxu0 %v10200_v4  ;;  %10219 = vmatpush3.bf16.msra.mxu1 %v10218_v15  ;;  %v8612_v15 = vld [vmem:[%s12099_s8 + $0x8] ss:$0 sm:$0xff] }
 0xa78   :  { %10208 = vmatprep.subr.bf16.mxu0 %v10400_v22  ;;  %10226 = vmatprep.subr.bf16.mxu1 %v10400_v22 }
 0xa7a   :  { %9688 = vmatmul.mubr.msk.f32.vlgmr.msra.gmra.mrb[66].mxu0 %vm73_vm0, %v11391_v1  ;;  %9721 = vmatmul.mubr.msk.f32.vlgmr.msra.gmra.mrb[62].mxu1 %vm73_vm0, %v11355_v54 }
 0xa7b   :  { %10210 = vmatpush3.bf16.msra.mxu0 %v10209_v12  ;;  %10228 = vmatpush3.bf16.msra.mxu1 %v10227_v14 }
 0xa7c   :  { %10211 = vmatprep.subr.bf16.mxu0 %v10400_v22  ;;  %10229 = vmatprep.subr.bf16.mxu1 %v10400_v22 }
 0xa7d   :  { %9709 = vmatprep.mubr.msk.f32.mxu0 %vm10401_vm1, %v10402_v30  ;;  %9742 = vmatprep.mubr.msk.f32.mxu1 %vm10401_vm1, %v10402_v30 }
 0xa7f   :  { %10213 = vmatpush3.bf16.msra.mxu0 %v10212_v21  ;;  %10231 = vmatpush3.bf16.msra.mxu1 %v10230_v23  ;;  %v8558_v21 = vld [vmem:[%s12098_s7 + $0xa] ss:$0 sm:$0xff] }
 0xa80   :  { %10220 = vmatprep.subr.bf16.mxu0 %v10400_v22  ;;  %10238 = vmatprep.subr.bf16.mxu1 %v10400_v22 }
 0xa82   :  { %9710 = vmatmul.mubr.msk.f32.vlgmr.msra.gmra.mrb[68].mxu0 %vm73_vm0, %v11391_v1  ;;  %9743 = vmatmul.mubr.msk.f32.vlgmr.msra.gmra.mrb[64].mxu1 %vm73_vm0, %v11355_v54 }
 0xa83   :  { %10222 = vmatpush3.bf16.msra.mxu0 %v10221_v27  ;;  %10240 = vmatpush3.bf16.msra.mxu1 %v10239_v28  ;;  %v8616_v27 = vld [vmem:[%s12099_s8 + $0xc] ss:$0 sm:$0xff] }
 0xa84   :  { %10223 = vmatprep.subr.bf16.mxu0 %v10400_v22  ;;  %10241 = vmatprep.subr.bf16.mxu1 %v10400_v22 }
 0xa85   :  { %9731 = vmatprep.mubr.msk.f32.mxu0 %vm10401_vm1, %v10402_v30  ;;  %9764 = vmatprep.mubr.msk.f32.mxu1 %vm10401_vm1, %v10402_v30 }
 0xa87   :  { %10225 = vmatpush3.bf16.msra.mxu0 %v10224_v34  ;;  %10243 = vmatpush3.bf16.msra.mxu1 %v10242_v35 }
 0xa88   :  { %10232 = vmatprep.subr.bf16.mxu0 %v10400_v22  ;;  %10250 = vmatprep.subr.bf16.mxu1 %v10400_v22 }
 0xa8a   :  { %9732 = vmatmul.mubr.msk.f32.vlgmr.msra.gmra.mrb[70].mxu0 %vm73_vm0, %v11355_v54  ;;  %9765 = vmatmul.mubr.msk.f32.vlgmr.msra.gmra.mrb[66].mxu1 %vm73_vm0, %v11391_v1 }
 0xa8b   :  { %10234 = vmatpush3.bf16.msra.mxu0 %v10233_v40  ;;  %10252 = vmatpush3.bf16.msra.mxu1 %v10251_v41  ;;  %v8618_v40 = vld [vmem:[%s12099_s8 + $0xe] ss:$0 sm:$0xff] }
 0xa8c   :  { %10235 = vmatprep.subr.bf16.mxu0 %v10400_v22  ;;  %10253 = vmatprep.subr.bf16.mxu1 %v10400_v22 }
 0xa8d   :  { %9753 = vmatprep.mubr.msk.f32.mxu0 %vm10401_vm1, %v10402_v30  ;;  %9786 = vmatprep.mubr.msk.f32.mxu1 %vm10401_vm1, %v10402_v30 }
 0xa8f   :  { %10237 = vmatpush3.bf16.msra.mxu0 %v10236_v46  ;;  %10255 = vmatpush3.bf16.msra.mxu1 %v10254_v47 }
 0xa90   :  { %10244 = vmatprep.subr.bf16.mxu0 %v10400_v22  ;;  %9800 = vmatprep.subr.mxu1 %v10402_v30 }
 0xa92   :  { %9754 = vmatmul.mubr.msk.f32.vlgmr.msra.gmra.mrb[72].mxu0 %vm73_vm0, %v11355_v54  ;;  %9787 = vmatmul.mubr.msk.f32.vlgmr.msra.gmra.mrb[68].mxu1 %vm73_vm0, %v11391_v1 }
 0xa93   :  { %10246 = vmatpush3.bf16.msra.mxu0 %v10245_v51  ;;  %9775 = vmatprep.mubr.msk.f32.mxu0 %vm10401_vm1, %v10402_v30 }
 0xa94   :  { %10247 = vmatprep.subr.bf16.mxu0 %v10400_v22  ;;  %9802 = vmatprep.mubr.msk.f32.mxu1 %vm10401_vm1, %v10402_v30 }
 0xa97   :  { %10249 = vmatpush3.bf16.msra.mxu0 %v10248_v6 }
 0xa98   :  { %10256 = vmatprep.subr.bf16.mxu0 %v10400_v22 }
 0xa9a   :  { %9776 = vmatmul.mubr.msk.f32.vlgmr.msra.gmra.mrb[74].mxu0 %vm73_vm0, %v11391_v1 }
 0xa9b   :  { %10258 = vmatpush3.bf16.msra.mxu0 %v10257_v7  ;;  %9797 = vmatprep.mubr.msk.f32.mxu0 %vm10401_vm1, %v10402_v30 }
 0xa9c   :  { %10259 = vmatprep.subr.bf16.mxu0 %v10400_v22 }
 0xa9f   :  { %10261 = vmatpush3.bf16.msra.mxu0 %v10260_v59 }
 0xaa0   :  { %9810 = vmatprep.subr.mxu0 %v10402_v30 }
 0xaa2   :  { %9798 = vmatmul.mubr.msk.f32.vlgmr.msra.gmra.mrb[76].mxu0 %vm73_vm0, %v11391_v1 }
 0xaa3   :  { %9812 = vmatprep.mubr.msk.f32.mxu0 %vm10401_vm1, %v10402_v30 }
 0xb15   :  { %v4413_v60 = vpop.f32.mrb[52].mxu0  ;;  %v4553_v61 = vpop.f32.mrb[48].mxu1 }
 0xb16   :  { %v9546_v10 = vpop.f32.mrb[53].mxu0  ;;  %v9568_v11 = vpop.f32.mrb[49].mxu1  ;;  %v4414_v17 = vadd.f32 %v8556_v8, %v4413_v60  ;;  %v4554_v25 = vadd.f32 %v8558_v21, %v4553_v61  ;;  %v8619_v61 = vld [vmem:[%s12099_s8 + $0xf] ss:$0 sm:$0xff]  ;;  %s10376_s8 = scalar_lea.vmem %s8413_s3, 256 }
 0xb17   :  { %p10377_p0 = scmp.ne.s32.totalorder %s8413_s3, %s10376_s8  ;;  %p10382_p2 = scmp.lt.s32.totalorder %s10376_s8, %s10376_s8 }
 0xb19   :  { %p10383_p3 = por %p10382_p2, %p10381_p1 }
 0xb1b   :  { %p10384_p4 = pnand %p10383_p3, %p10377_p0 }
 0xb1d   :  { %v4483_v62 = vpop.f32.mrb[54].mxu0  ;;  %v4696_v63 = vpop.f32.mrb[50].mxu1 }
 0xb1e   :  { %v9557_v0 = vpop.f32.mrb[55].mxu0  ;;  %v9590_v2 = vpop.f32.mrb[51].mxu1  ;;  %v4484_v37 = vadd.f32 %v8557_v31, %v4483_v62  ;;  %v4697_v38 = vadd.f32 %v8560_v32, %v4696_v63  ;;  %v8563_v62 = vld [vmem:[%s12098_s7 + $0xf] ss:$0 sm:$0xff] }
 0xb25   :  { %v4623_v3 = vpop.f32.mrb[56].mxu0  ;;  %v4836_v16 = vpop.f32.mrb[52].mxu1 }
 0xb26   :  { %v9579_v22 = vpop.f32.mrb[57].mxu0  ;;  %v9612_v4 = vpop.f32.mrb[53].mxu1  ;;  %v4624_v50 = vadd.f32 %v8559_v43, %v4623_v3  ;;  %v4837_v51 = vadd.f32 %v8562_v44, %v4836_v16  ;;  %v8669_v16 = vld [vmem:[%s12100_s9 + $0x9] ss:$0 sm:$0xff] }
 0xb2d   :  { %v11751_v49 = vpop.f32.mrb[58].mxu0  ;;  %v5066_v5 = vpop.f32.mrb[54].mxu1 }
 0xb2e   :  { %v5067_v9 = vadd.f32 %v8612_v15, %v5066_v5  ;;  %v9601_v12 = vpop.f32.mrb[59].mxu0  ;;  %v9634_v14 = vpop.f32.mrb[55].mxu1  ;;  %v4767_v60 = vadd.f32 %v8561_v56, %v11751_v49 }
 0xb30   :  { %9801 = vmatpush3.xpose.msk.msra.mxu1 %vm2067_vm2, %v5067_v9 }
 0xb31   :  { %9805 = vmatprep.subr.mxu1 %v10402_v30 }
 0xb33   :  { %9803 = vmatmul.mubr.msk.f32.vlgmr.msra.gmra.mrb[70].mxu1 %vm2067_vm2, %v4414_v17 }
 0xb34   :  { %9807 = vmatprep.mubr.msk.f32.mxu1 %vm10401_vm1, %v10402_v30 }
 0xb35   :  { %v11764_v19 = vpop.f32.mrb[60].mxu0  ;;  %v5206_v20 = vpop.f32.mrb[56].mxu1 }
 0xb36   :  { %v5207_v23 = vadd.f32 %v8614_v18, %v5206_v20  ;;  %v9623_v13 = vpop.f32.mrb[61].mxu0  ;;  %v9656_v24 = vpop.f32.mrb[57].mxu1  ;;  %v4907_v3 = vadd.f32 %v8563_v62, %v11764_v19 }
 0xb38   :  { %9811 = vmatpush3.xpose.msk.msra.mxu0 %vm2067_vm2, %v5207_v23 }
 0xb39   :  { %9820 = vmatprep.subr.mxu0 %v10402_v30 }
 0xb3b   :  { %9813 = vmatmul.mubr.msk.f32.vlgmr.msra.gmra.mrb[78].mxu0 %vm2067_vm2, %v4554_v25 }
 0xb3c   :  { %9822 = vmatprep.mubr.msk.f32.mxu0 %vm10401_vm1, %v10402_v30 }
 0xb3d   :  { %v5136_v28 = vpop.f32.mrb[62].mxu0  ;;  %v5346_v29 = vpop.f32.mrb[58].mxu1 }
 0xb3e   :  { %v5137_v33 = vadd.f32 %v8613_v26, %v5136_v28  ;;  %v5347_v34 = vadd.f32 %v8616_v27, %v5346_v29  ;;  %v9645_v35 = vpop.f32.mrb[63].mxu0  ;;  %v9678_v36 = vpop.f32.mrb[59].mxu1 }
 0xb40   :  { %9806 = vmatpush3.xpose.msk.msra.mxu1 %vm2067_vm2, %v5137_v33  ;;  %9821 = vmatpush3.xpose.msk.msra.mxu0 %vm2067_vm2, %v5347_v34 }
 0xb41   :  { %9815 = vmatprep.subr.mxu1 %v10402_v30  ;;  %9830 = vmatprep.subr.mxu0 %v10402_v30 }
 0xb43   :  { %9808 = vmatmul.mubr.msk.f32.vlgmr.msra.gmra.mrb[72].mxu1 %vm2067_vm2, %v4484_v37  ;;  %9823 = vmatmul.mubr.msk.f32.vlgmr.msra.gmra.mrb[80].mxu0 %vm2067_vm2, %v4697_v38 }
 0xb44   :  { %9817 = vmatprep.mubr.msk.f32.mxu1 %vm10401_vm1, %v10402_v30  ;;  %9832 = vmatprep.mubr.msk.f32.mxu0 %vm10401_vm1, %v10402_v30 }
 0xb45   :  { %v5276_v41 = vpop.f32.mrb[64].mxu0  ;;  %v5486_v42 = vpop.f32.mrb[60].mxu1 }
 0xb46   :  { %v5277_v45 = vadd.f32 %v8615_v39, %v5276_v41  ;;  %v5487_v46 = vadd.f32 %v8618_v40, %v5486_v42  ;;  %v9667_v47 = vpop.f32.mrb[65].mxu0  ;;  %v9700_v48 = vpop.f32.mrb[61].mxu1 }
 0xb48   :  { %9816 = vmatpush3.xpose.msk.msra.mxu1 %vm2067_vm2, %v5277_v45  ;;  %9831 = vmatpush3.xpose.msk.msra.mxu0 %vm2067_vm2, %v5487_v46 }
 0xb49   :  { %9825 = vmatprep.subr.mxu1 %v10402_v30  ;;  %9840 = vmatprep.subr.mxu0 %v10402_v30 }
 0xb4b   :  { %9818 = vmatmul.mubr.msk.f32.vlgmr.msra.gmra.mrb[74].mxu1 %vm2067_vm2, %v4624_v50  ;;  %9833 = vmatmul.mubr.msk.f32.vlgmr.msra.gmra.mrb[82].mxu0 %vm2067_vm2, %v4837_v51 }
 0xb4c   :  { %9827 = vmatprep.mubr.msk.f32.mxu1 %vm10401_vm1, %v10402_v30  ;;  %9842 = vmatprep.mubr.msk.f32.mxu0 %vm10401_vm1, %v10402_v30 }
 0xb4d   :  { %v5416_v6 = vpop.f32.mrb[66].mxu0  ;;  %v5716_v55 = vpop.f32.mrb[62].mxu1 }
 0xb4e   :  { %v5417_v7 = vadd.f32 %v8617_v52, %v5416_v6  ;;  %v5717_v57 = vadd.f32 %v8668_v53, %v5716_v55  ;;  %v9689_v58 = vpop.f32.mrb[67].mxu0  ;;  %v9722_v59 = vpop.f32.mrb[63].mxu1 }
 0xb50   :  { %9826 = vmatpush3.xpose.msk.msra.mxu1 %vm2067_vm2, %v5417_v7  ;;  %9841 = vmatpush3.msra.mxu0 %v5717_v57 }
 0xb51   :  { %9835 = vmatprep.subr.mxu1 %v10402_v30  ;;  %9850 = vmatprep.subr.mxu0 %v10402_v30 }
 0xb53   :  { %9828 = vmatmul.mubr.msk.f32.vlgmr.msra.gmra.mrb[76].mxu1 %vm2067_vm2, %v4767_v60 }
 0xb54   :  { %9837 = vmatprep.mubr.msk.f32.mxu1 %vm10401_vm1, %v10402_v30 }
 0xb55   :  { %v5556_v10 = vpop.f32.mrb[68].mxu0  ;;  %v11837_v11 = vpop.f32.mrb[64].mxu1 }
 0xb56   :  { %v5557_v63 = vadd.f32 %v8619_v61, %v5556_v10  ;;  %v9711_v0 = vpop.f32.mrb[69].mxu0  ;;  %v9744_v2 = vpop.f32.mrb[65].mxu1 }
 0xb58   :  { %9836 = vmatpush3.xpose.msk.msra.mxu1 %vm2067_vm2, %v5557_v63 }
 0xb59   :  { %9845 = vmatprep.subr.mxu1 %v10402_v30 }
 0xb5b   :  { %9838 = vmatmul.mubr.msk.f32.vlgmr.msra.gmra.mrb[78].mxu1 %vm2067_vm2, %v4907_v3 }
 0xb5c   :  { %9847 = vmatprep.mubr.msk.f32.mxu1 %vm10401_vm1, %v10402_v30 }
 0xb5d   :  { %v5786_v22 = vpop.f32.mrb[70].mxu0  ;;  %v11851_v4 = vpop.f32.mrb[66].mxu1 }
 0xb5e   :  { %v5787_v15 = vadd.f32 %v8669_v16, %v5786_v22  ;;  %v9733_v49 = vpop.f32.mrb[71].mxu0  ;;  %v9766_v5 = vpop.f32.mrb[67].mxu1 }
 0xb60   :  { %9846 = vmatpush3.msra.mxu1 %v5787_v15 }
 0xb61   :  { %9855 = vmatprep.subr.mxu1 %v10402_v30 }
 0xb65   :  { %v11854_v8 = vpop.f32.mrb[72].mxu0  ;;  %v11856_v9 = vpop.f32.mrb[68].mxu1 }
 0xb66   :  { %v9755_v12 = vpop.f32.mrb[73].mxu0  ;;  %v9788_v14 = vpop.f32.mrb[69].mxu1 }
 0xb6d   :  { %v11858_v17 = vpop.f32.mrb[74].mxu0 }
 0xb6e   :  { %v9777_v18 = vpop.f32.mrb[75].mxu0 }
 0xb75   :  { %v11860_v19 = vpop.f32.mrb[76].mxu0 }
 0xb76   :  { %v9799_v20 = vpop.f32.mrb[77].mxu0 }
 0xc06   :  { %v6282_v21 = vpop.f32.mrb[70].mxu1 }
 0xc07   :  { %v6818_v23 = vmul.f32 0.35355338, %v6282_v21  ;;  %v9804_v13 = vpop.f32.mrb[71].mxu1 }
 0xc09   :  { %v6826_v24 = vsel %vm2067_vm2, %v6818_v23, -inf }
 0xc0a   :  { %6827 = vmax.xlane.f32.xlu0 %v6826_v24 }
 0xc0e   :  { %v6434_v25 = vpop.f32.mrb[78].mxu0 }
 0xc0f   :  { %v6820_v26 = vmul.f32 0.35355338, %v6434_v25  ;;  %v9814_v27 = vpop.f32.mrb[79].mxu0 }
 0xc11   :  { %v6832_v28 = vsel %vm2067_vm2, %v6820_v26, -inf }
 0xc12   :  { %6833 = vmax.xlane.f32.xlu0 %v6832_v28 }
 0xc16   :  { %v6358_v29 = vpop.f32.mrb[72].mxu1  ;;  %v6586_v31 = vpop.f32.mrb[80].mxu0 }
 0xc17   :  { %v6819_v32 = vmul.f32 0.35355338, %v6358_v29  ;;  %v6822_v33 = vmul.f32 0.35355338, %v6586_v31  ;;  %v9809_v34 = vpop.f32.mrb[73].mxu1  ;;  %v9824_v35 = vpop.f32.mrb[81].mxu0 }
 0xc19   :  { %v6829_v36 = vsel %vm2067_vm2, %v6819_v32, -inf  ;;  %v6838_v37 = vsel %vm2067_vm2, %v6822_v33, -inf }
 0xc1a   :  { %6830 = vmax.xlane.f32.xlu1 %v6829_v36  ;;  %6839 = vmax.xlane.f32.xlu0 %v6838_v37 }
 0xc1e   :  { %v6510_v38 = vpop.f32.mrb[74].mxu1  ;;  %v6738_v39 = vpop.f32.mrb[82].mxu0 }
 0xc1f   :  { %v6821_v40 = vmul.f32 0.35355338, %v6510_v38  ;;  %v6824_v41 = vmul.f32 0.35355338, %v6738_v39  ;;  %v9819_v42 = vpop.f32.mrb[75].mxu1  ;;  %v9834_v43 = vpop.f32.mrb[83].mxu0 }
 0xc21   :  { %v6835_v44 = vsel %vm2067_vm2, %v6821_v40, -inf  ;;  %v6844_v45 = vsel %vm2067_vm2, %v6824_v41, -inf }
 0xc22   :  { %6836 = vmax.xlane.f32.xlu1 %v6835_v44  ;;  %6845 = vmax.xlane.f32.xlu0 %v6844_v45 }
 0xc26   :  { %v6662_v46 = vpop.f32.mrb[76].mxu1 }
 0xc27   :  { %v6823_v47 = vmul.f32 0.35355338, %v6662_v46  ;;  %v9829_v48 = vpop.f32.mrb[77].mxu1 }
 0xc29   :  { %v6841_v50 = vsel %vm2067_vm2, %v6823_v47, -inf }
 0xc2a   :  { %6842 = vmax.xlane.f32.xlu1 %v6841_v50 }
 0xc2e   :  { %v6814_v51 = vpop.f32.mrb[78].mxu1 }
 0xc2f   :  { %v6825_v52 = vmul.f32 0.35355338, %v6814_v51  ;;  %v9839_v53 = vpop.f32.mrb[79].mxu1 }
 0xc30   :  { %v8671_v53 = vld [vmem:[%s12100_s9 + $0xb] ss:$0 sm:$0xff] }
 0xc31   :  { %v6847_v6 = vsel %vm2067_vm2, %v6825_v52, -inf }
 0xc32   :  { %6848 = vmax.xlane.f32.xlu1 %v6847_v6 }
 0xc97   :  { %v6828_v55 = vpop.xlane.xlu0 %6827 }
 0xc98   :  { %v6850_v56 = vsub.f32 %v6818_v23, %v6828_v55 }
 0xc9a   :  { %v6858_v7 = vmul.f32 1.442695, %v6850_v56 }
 0xc9c   :  { %10336 = vpow2.f32 %v6858_v7  ;;  %v5927_v7 = vadd.f32 %v8671_v53, %v11854_v8  ;;  %v8673_v8 = vld [vmem:[%s12100_s9 + $0xd] ss:$0 sm:$0xff] }
 0xc9f   :  { %v6834_v57 = vpop.xlane.xlu0 %6833 }
 0xca0   :  { %v6852_v58 = vsub.f32 %v6820_v26, %v6834_v57 }
 0xca2   :  { %v6862_v59 = vmul.f32 1.442695, %v6852_v58 }
 0xca4   :  { %10338 = vpow2.f32 %v6862_v59 }
 0xca6   :  { %v10337_v60 = vpop.eup %10336 }
 0xca7   :  { %v6831_v61 = vpop.xlane.xlu1 %6830  ;;  %v6840_v10 = vpop.xlane.xlu0 %6839  ;;  %v6874_v62 = vsel %vm2067_vm2, %v10337_v60, 0.0 }
 0xca8   :  { %v6851_v63 = vsub.f32 %v6819_v32, %v6831_v61  ;;  %v6854_v0 = vsub.f32 %v6822_v33, %v6840_v10  ;;  %6875 = vadd.xlane.f32.xlu0 %v6874_v62  ;;  %v6067_v10 = vadd.f32 %v8673_v8, %v11858_v17  ;;  %v8675_v17 = vld [vmem:[%s12100_s9 + $0xf] ss:$0 sm:$0xff] }
 0xcaa   :  { %v6860_v2 = vmul.f32 1.442695, %v6851_v63  ;;  %v6866_v3 = vmul.f32 1.442695, %v6854_v0 }
 0xcac   :  { %10340 = vpow2.f32 %v6860_v2 }
 0xcad   :  { %10342 = vpow2.f32 %v6866_v3  ;;  %v6207_v3 = vadd.f32 %v8675_v17, %v11860_v19  ;;  %v8708_v19 = vld [vmem:[%s12101_s10 + $0x40] sm:$0xff] }
 0xcae   :  { %v10339_v16 = vpop.eup %10338 }
 0xcaf   :  { %v6837_v22 = vpop.xlane.xlu1 %6836  ;;  %v6846_v15 = vpop.xlane.xlu0 %6845  ;;  %v6880_v49 = vsel %vm2067_vm2, %v10339_v16, 0.0 }
 0xcb0   :  { %v6853_v5 = vsub.f32 %v6821_v40, %v6837_v22  ;;  %v6856_v12 = vsub.f32 %v6824_v41, %v6846_v15  ;;  %6881 = vadd.xlane.f32.xlu0 %v6880_v49  ;;  %v8670_v41 = vld [vmem:[%s12100_s9 + $0xa] ss:$0 sm:$0xff]  ;;  %v8710_v49 = vld [vmem:[%s12101_s10 + $0x50] sm:$0xff] }
 0xcb1   :  { %v5857_v44 = vadd.f32 %v8670_v41, %v11837_v11  ;;  %v8709_v15 = vld [vmem:[%s12101_s10 + $0x48] sm:$0xff] }
 0xcb2   :  { %v6864_v14 = vmul.f32 1.442695, %v6853_v5  ;;  %v6870_v18 = vmul.f32 1.442695, %v6856_v12 }
 0xcb4   :  { %10344 = vpow2.f32 %v6864_v14  ;;  %v8712_v14 = vld [vmem:[%s12101_s10 + $0x60] sm:$0xff] }
 0xcb5   :  { %10346 = vpow2.f32 %v6870_v18 }
 0xcb6   :  { %v10341_v20 = vpop.eup %10340 }
 0xcb7   :  { %v10343_v21 = vpop.eup %10342  ;;  %v6843_v23 = vpop.xlane.xlu1 %6842  ;;  %v6877_v13 = vsel %vm2067_vm2, %v10341_v20, 0.0 }
 0xcb8   :  { %v6855_v24 = vsub.f32 %v6823_v47, %v6843_v23  ;;  %6878 = vadd.xlane.f32.xlu1 %v6877_v13  ;;  %v6886_v25 = vsel %vm2067_vm2, %v10343_v21, 0.0  ;;  %v8672_v47 = vld [vmem:[%s12100_s9 + $0xc] ss:$0 sm:$0xff]  ;;  %v8714_v13 = vld [vmem:[%s12101_s10 + $0x70] sm:$0xff] }
 0xcb9   :  { %6887 = vadd.xlane.f32.xlu0 %v6886_v25  ;;  %v5997_v11 = vadd.f32 %v8672_v47, %v11851_v4  ;;  %v8674_v4 = vld [vmem:[%s12100_s9 + $0xe] ss:$0 sm:$0xff] }
 0xcba   :  { %v6868_v26 = vmul.f32 1.442695, %v6855_v24  ;;  %v6137_v58 = vadd.f32 %v8674_v4, %v11856_v9 }
 0xcbc   :  { %10348 = vpow2.f32 %v6868_v26 }
 0xcbe   :  { %v11874_v27 = vpop.eup %10344 }
 0xcbf   :  { %v11876_v28 = vpop.eup %10346  ;;  %v6849_v29 = vpop.xlane.xlu1 %6848  ;;  %v6883_v31 = vsel %vm2067_vm2, %v11874_v27, 0.0 }
 0xcc0   :  { %v6857_v32 = vsub.f32 %v6825_v52, %v6849_v29  ;;  %6884 = vadd.xlane.f32.xlu1 %v6883_v31  ;;  %v6892_v33 = vsel %vm2067_vm2, %v11876_v28, 0.0 }
 0xcc1   :  { %6893 = vadd.xlane.f32.xlu0 %v6892_v33  ;;  %v8715_v33 = vld [vmem:[%s12101_s10 + $0x78] sm:$0xff] }
 0xcc2   :  { %v6872_v34 = vmul.f32 1.442695, %v6857_v32 }
 0xcc4   :  { %10350 = vpow2.f32 %v6872_v34 }
 0xcc6   :  { %v11882_v35 = vpop.eup %10348 }
 0xcc7   :  { %v6889_v36 = vsel %vm2067_vm2, %v11882_v35, 0.0 }
 0xcc8   :  { %6890 = vadd.xlane.f32.xlu1 %v6889_v36 }
 0xcce   :  { %v11886_v37 = vpop.eup %10350 }
 0xccf   :  { %v6895_v38 = vsel %vm2067_vm2, %v11886_v37, 0.0 }
 0xcd0   :  { %6896 = vadd.xlane.f32.xlu1 %v6895_v38 }
 0xd35   :  { %v6876_v39 = vpop.xlane.xlu0 %6875 }
 0xd36   :  { %10352 = vrcp.f32 %v6876_v39 }
 0xd3d   :  { %v6882_v40 = vpop.xlane.xlu0 %6881 }
 0xd3e   :  { %10354 = vrcp.f32 %v6882_v40 }
 0xd40   :  { %v10353_v42 = vpop.eup %10352 }
 0xd41   :  { %v6906_v43 = vmul.f32 %v10353_v42, %v10337_v60 }
 0xd43   :  { %9843 = vmatmul.mubr.msk.f32.vlgmr.msra.gmra.mrb[84].mxu0 %vm2067_vm2, %v6906_v43 }
 0xd44   :  { %9851 = vmatpush3.msra.mxu0 %v5857_v44  ;;  %9852 = vmatprep.mubr.msk.f32.mxu0 %vm10401_vm1, %v10402_v30 }
 0xd45   :  { %v6879_v45 = vpop.xlane.xlu1 %6878  ;;  %9860 = vmatprep.subr.mxu0 %v10402_v30 }
 0xd46   :  { %10356 = vrcp.f32 %v6879_v45  ;;  %v6888_v46 = vpop.xlane.xlu0 %6887 }
 0xd47   :  { %10358 = vrcp.f32 %v6888_v46 }
 0xd48   :  { %v10355_v48 = vpop.eup %10354 }
 0xd49   :  { %v6908_v50 = vmul.f32 %v10355_v48, %v10339_v16 }
 0xd4b   :  { %9853 = vmatmul.mubr.msk.f32.vlgmr.msra.gmra.mrb[86].mxu0 %vm2067_vm2, %v6908_v50 }
 0xd4c   :  { %9861 = vmatpush3.msra.mxu0 %v5997_v11  ;;  %9862 = vmatprep.mubr.msk.f32.mxu0 %vm10401_vm1, %v10402_v30 }
 0xd4d   :  { %v6885_v51 = vpop.xlane.xlu1 %6884  ;;  %9870 = vmatprep.subr.mxu0 %v10402_v30 }
 0xd4e   :  { %10360 = vrcp.f32 %v6885_v51  ;;  %v6894_v52 = vpop.xlane.xlu0 %6893 }
 0xd4f   :  { %10362 = vrcp.f32 %v6894_v52  ;;  %v8725_v52 = vld [vmem:[%s12102_s11 + $0x1] ss:$0 sm:$0xff] }
 0xd50   :  { %v10357_v6 = vpop.eup %10356 }
 0xd51   :  { %v10359_v55 = vpop.eup %10358  ;;  %v6907_v56 = vmul.f32 %v10357_v6, %v10341_v20 }
 0xd52   :  { %v6910_v57 = vmul.f32 %v10359_v55, %v10343_v21  ;;  %v8711_v21 = vld [vmem:[%s12101_s10 + $0x58] sm:$0xff] }
 0xd53   :  { %9848 = vmatmul.mubr.msk.f32.vlgmr.msra.gmra.mrb[80].mxu1 %vm2067_vm2, %v6907_v56 }
 0xd54   :  { %9856 = vmatpush3.msra.mxu1 %v5927_v7  ;;  %9863 = vmatmul.mubr.msk.f32.vlgmr.msra.gmra.mrb[88].mxu0 %vm2067_vm2, %v6910_v57 }
 0xd55   :  { %9871 = vmatpush3.msra.mxu0 %v6137_v58  ;;  %v6891_v59 = vpop.xlane.xlu1 %6890  ;;  %9857 = vmatprep.mubr.msk.f32.mxu1 %vm10401_vm1, %v10402_v30 }
 0xd56   :  { %10364 = vrcp.f32 %v6891_v59  ;;  %9865 = vmatprep.subr.mxu1 %v10402_v30  ;;  %9872 = vmatprep.mubr.msk.f32.mxu0 %vm10401_vm1, %v10402_v30 }
 0xd57   :  { %9880 = vmatprep.subr.mxu0 %v10402_v30 }
 0xd58   :  { %v10361_v9 = vpop.eup %10360 }
 0xd59   :  { %v10363_v60 = vpop.eup %10362  ;;  %v6909_v61 = vmul.f32 %v10361_v9, %v11874_v27  ;;  %v8713_v27 = vld [vmem:[%s12101_s10 + $0x68] sm:$0xff] }
 0xd5a   :  { %v6912_v62 = vmul.f32 %v10363_v60, %v11876_v28 }
 0xd5b   :  { %9858 = vmatmul.mubr.msk.f32.vlgmr.msra.gmra.mrb[82].mxu1 %vm2067_vm2, %v6909_v61 }
 0xd5c   :  { %9866 = vmatpush3.msra.mxu1 %v6067_v10  ;;  %9873 = vmatmul.mubr.msk.f32.vlgmr.msra.gmra.mrb[90].mxu0 %vm2067_vm2, %v6912_v62 }
 0xd5d   :  { %v6897_v63 = vpop.xlane.xlu1 %6896  ;;  %9867 = vmatprep.mubr.msk.f32.mxu1 %vm10401_vm1, %v10402_v30  ;;  %9875 = vmatprep.subr.mxu1 %v10402_v30 }
 0xd5e   :  { %10366 = vrcp.f32 %v6897_v63  ;;  %9882 = vmatprep.mubr.msk.f32.mxu0 %vm10401_vm1, %v10402_v30  ;;  %9881 = vmatpush3.msra.mxu0 %v8708_v19 }
 0xd5f   :  { %9890 = vmatprep.subr.mxu0 %v10402_v30 }
 0xd60   :  { %v10365_v0 = vpop.eup %10364 }
 0xd61   :  { %v6911_v2 = vmul.f32 %v10365_v0, %v11882_v35 }
 0xd63   :  { %9868 = vmatmul.mubr.msk.f32.vlgmr.msra.gmra.mrb[84].mxu1 %vm2067_vm2, %v6911_v2 }
 0xd64   :  { %9876 = vmatpush3.msra.mxu1 %v6207_v3  ;;  %9877 = vmatprep.mubr.msk.f32.mxu1 %vm10401_vm1, %v10402_v30 }
 0xd65   :  { %9885 = vmatprep.subr.mxu1 %v10402_v30 }
 0xd68   :  { %v10367_v16 = vpop.eup %10366 }
 0xd69   :  { %v6913_v22 = vmul.f32 %v10367_v16, %v11886_v37 }
 0xd6b   :  { %9878 = vmatmul.mubr.msk.f32.vlgmr.msra.gmra.mrb[86].mxu1 %vm2067_vm2, %v6913_v22 }
 0xd6c   :  { %9887 = vmatprep.mubr.msk.f32.mxu1 %vm10401_vm1, %v10402_v30  ;;  %9886 = vmatpush3.msra.mxu1 %v8709_v15 }
 0xd6d   :  { %9895 = vmatprep.subr.mxu1 %v10402_v30 }
 0xe16   :  { %v6983_v5 = vpop.f32.mrb[84].mxu0 }
 0xe17   :  { %v9844_v12 = vpop.f32.mrb[85].mxu0  ;;  %9883 = vmatmul.mubr.msk.f32.vlgmr.msra.gmra.mrb[92].mxu0 %vm2067_vm2, %v6983_v5 }
 0xe18   :  { %9891 = vmatpush3.msra.mxu0 %v8710_v49  ;;  %9892 = vmatprep.mubr.msk.f32.mxu0 %vm10401_vm1, %v10402_v30 }
 0xe19   :  { %9900 = vmatprep.subr.mxu0 %v10402_v30 }
 0xe1e   :  { %v7129_v18 = vpop.f32.mrb[86].mxu0 }
 0xe1f   :  { %v9854_v20 = vpop.f32.mrb[87].mxu0  ;;  %9893 = vmatmul.mubr.msk.f32.vlgmr.msra.gmra.mrb[94].mxu0 %vm2067_vm2, %v7129_v18 }
 0xe20   :  { %9901 = vmatpush3.msra.mxu0 %v8712_v14  ;;  %9902 = vmatprep.mubr.msk.f32.mxu0 %vm10401_vm1, %v10402_v30 }
 0xe21   :  { %9910 = vmatprep.subr.mxu0 %v10402_v30 }
 0xe26   :  { %v7056_v23 = vpop.f32.mrb[80].mxu1 }
 0xe27   :  { %v7275_v24 = vpop.f32.mrb[88].mxu0  ;;  %v9849_v25 = vpop.f32.mrb[81].mxu1  ;;  %9888 = vmatmul.mubr.msk.f32.vlgmr.msra.gmra.mrb[88].mxu1 %vm2067_vm2, %v7056_v23 }
 0xe28   :  { %v9864_v26 = vpop.f32.mrb[89].mxu0  ;;  %9903 = vmatmul.mubr.msk.f32.vlgmr.msra.gmra.mrb[96].mxu0 %vm2067_vm2, %v7275_v24  ;;  %9896 = vmatpush3.msra.mxu1 %v8711_v21  ;;  %v8731_v21 = vld [vmem:[%s12105_s14 + $0x28] sm:$0xff]  ;;  %v8733_v24 = vld [vmem:[%s12105_s14 + $0x38] sm:$0xff] }
 0xe29   :  { %9897 = vmatprep.mubr.msk.f32.mxu1 %vm10401_vm1, %v10402_v30  ;;  %9911 = vmatpush3.msra.mxu0 %v8714_v13  ;;  %v8732_v13 = vld [vmem:[%s12105_s14 + $0x30] sm:$0xff]  ;;  %v8738_v26 = vld [vmem:[%s12107_s16 + $0x40] sm:$0xff] }
 0xe2a   :  { %9912 = vmatprep.mubr.msk.f32.mxu0 %vm10401_vm1, %v10402_v30  ;;  %9905 = vmatprep.subr.mxu1 %v10402_v30  ;;  %v10266_v25 = vpack.c.bf16 %v8733_v24, %v8732_v13  ;;  %v8752_v13 = vld [vmem:[%s12109_s18 + $0x1] ss:$0 sm:$0xff] }
 0xe2e   :  { %v7202_v28 = vpop.f32.mrb[82].mxu1 }
 0xe2f   :  { %v7421_v29 = vpop.f32.mrb[90].mxu0  ;;  %v9859_v31 = vpop.f32.mrb[83].mxu1  ;;  %9898 = vmatmul.mubr.msk.f32.vlgmr.msra.gmra.mrb[90].mxu1 %vm2067_vm2, %v7202_v28  ;;  %v8740_v28 = vld [vmem:[%s12107_s16 + $0x50] sm:$0xff] }
 0xe30   :  { %v9874_v32 = vpop.f32.mrb[91].mxu0  ;;  %9913 = vmatmul.mubr.msk.f32.vlgmr.msra.gmra.mrb[98].mxu0 %vm2067_vm2, %v7421_v29  ;;  %9906 = vmatpush3.msra.mxu1 %v8713_v27  ;;  %v8739_v27 = vld [vmem:[%s12107_s16 + $0x48] sm:$0xff]  ;;  %v8741_v31 = vld [vmem:[%s12107_s16 + $0x58] sm:$0xff] }
 0xe31   :  { %9907 = vmatprep.mubr.msk.f32.mxu1 %vm10401_vm1, %v10402_v30  ;;  %9915 = vmatprep.subr.mxu1 %v10402_v30  ;;  %v10270_v29 = vpack.c.bf16 %v8739_v27, %v8738_v26  ;;  %v10274_v32 = vpack.c.bf16 %v8741_v31, %v8740_v28  ;;  %v8753_v27 = vld [vmem:[%s12110_s19 + $0x1] ss:$0 sm:$0xff] }
 0xe36   :  { %v7348_v34 = vpop.f32.mrb[84].mxu1 }
 0xe37   :  { %v9869_v35 = vpop.f32.mrb[85].mxu1  ;;  %9908 = vmatmul.mubr.msk.f32.vlgmr.msra.gmra.mrb[92].mxu1 %vm2067_vm2, %v7348_v34  ;;  %v8743_v34 = vld [vmem:[%s12107_s16 + $0x68] sm:$0xff] }
 0xe38   :  { %9916 = vmatpush3.msra.mxu1 %v8715_v33  ;;  %9917 = vmatprep.mubr.msk.f32.mxu1 %vm10401_vm1, %v10402_v30  ;;  %v8742_v33 = vld [vmem:[%s12107_s16 + $0x60] sm:$0xff] }
 0xe39   :  { %10271 = vmatprep.subr.bf16.mxu1 %v10270_v29  ;;  %v10278_v35 = vpack.c.bf16 %v8743_v34, %v8742_v33 }
 0xe3e   :  { %v7494_v36 = vpop.f32.mrb[86].mxu1 }
 0xe3f   :  { %v9879_v37 = vpop.f32.mrb[87].mxu1  ;;  %9918 = vmatmul.mubr.msk.f32.vlgmr.msra.gmra.mrb[94].mxu1 %vm2067_vm2, %v7494_v36 }
 0xe40   :  { %10273 = vmatpush3.bf16.msra.mxu1 %v10270_v29 }
 0xe41   :  { %10275 = vmatprep.subr.bf16.mxu1 %v10274_v32 }
 0xe44   :  { %10277 = vmatpush3.bf16.msra.mxu1 %v10274_v32 }
 0xe45   :  { %10279 = vmatprep.subr.bf16.mxu1 %v10278_v35 }
 0xe48   :  { %10281 = vmatpush3.bf16.msra.mxu1 %v10278_v35 }
 0xeea   :  { %v7576_v38 = vpop.f32.mrb[92].mxu0 }
 0xeeb   :  { %v9884_v39 = vpop.f32.mrb[93].mxu0  ;;  %v8091_v43 = vsel %vm73_vm0, %v7576_v38, 0.0 }
 0xef2   :  { %v7722_v40 = vpop.f32.mrb[94].mxu0 }
 0xef3   :  { %v9894_v41 = vpop.f32.mrb[95].mxu0  ;;  %v8094_v50 = vsel %vm73_vm0, %v7722_v40, 0.0  ;;  %v8728_v40 = vld [vmem:[%s12103_s12 + $0x1] ss:$0 sm:$0xff] }
 0xefa   :  { %v7649_v42 = vpop.f32.mrb[88].mxu1 }
 0xefb   :  { %v8092_v44 = vsel %vm73_vm0, %v7649_v42, 0.0  ;;  %v7868_v45 = vpop.f32.mrb[96].mxu0  ;;  %v9889_v46 = vpop.f32.mrb[89].mxu1 }
 0xefc   :  { %v8093_v47 = vadd.f32 %v8092_v44, %v8091_v43  ;;  %v9904_v48 = vpop.f32.mrb[97].mxu0  ;;  %v8098_v59 = vsel %vm73_vm0, %v7868_v45, 0.0  ;;  %v8729_v44 = vld [vmem:[%s12104_s13 + $0x1] ss:$0 sm:$0xff] }
 0xefe   :  { %v8095_v30 = vadd.f32 %v8094_v50, %v8093_v47 }
 0xf02   :  { %v7795_v11 = vpop.f32.mrb[90].mxu1 }
 0xf03   :  { %v8096_v51 = vsel %vm73_vm0, %v7795_v11, 0.0  ;;  %v8014_v53 = vpop.f32.mrb[98].mxu0  ;;  %v9899_v6 = vpop.f32.mrb[91].mxu1 }
 0xf04   :  { %v8097_v4 = vadd.f32 %v8096_v51, %v8095_v30  ;;  %v9914_v55 = vpop.f32.mrb[99].mxu0  ;;  %v8101_v61 = vsel %vm73_vm0, %v8014_v53, 0.0  ;;  %v8744_v51 = vld [vmem:[%s12107_s16 + $0x70] sm:$0xff]  ;;  %v8735_v6 = vld [vmem:[%s12126_s22 + $0x1] ss:$0 sm:$0xff] }
 0xf06   :  { %v8113_v56 = vadd.f32 %v8725_v52, %v8097_v4 }
 0xf08   :  { %v8115_v7 = vadd.f32 %v8113_v56, %v11355_v54 }
 0xf0a   :  { %v7941_v57 = vpop.f32.mrb[92].mxu1  ;;  %v8121_v58 = vsel %vm73_vm0, %v8115_v7, 0.0 }
 0xf0b   :  { %v8099_v8 = vsel %vm73_vm0, %v7941_v57, 0.0  ;;  %v9909_v9 = vpop.f32.mrb[93].mxu1  ;;  %8122 = vadd.xlane.f32.xlu0 %v8121_v58 }
 0xf0c   :  { %v8100_v60 = vadd.f32 %v8099_v8, %v8098_v59  ;;  %v8747_v59 = vld [vmem:[%s12108_s17 + $0x1] ss:$0 sm:$0xff] }
 0xf0e   :  { %v8102_v10 = vadd.f32 %v8101_v61, %v8100_v60 }
 0xf12   :  { %v8087_v62 = vpop.f32.mrb[94].mxu1 }
 0xf13   :  { %v8103_v63 = vsel %vm73_vm0, %v8087_v62, 0.0  ;;  %v9919_v17 = vpop.f32.mrb[95].mxu1 }
 0xf14   :  { %v8104_v0 = vadd.f32 %v8103_v63, %v8102_v10 }
 0xf16   :  { %v8114_v2 = vadd.f32 %v8725_v52, %v8104_v0  ;;  %v8745_v52 = vld [vmem:[%s12107_s16 + $0x78] sm:$0xff] }
 0xf17   :  { %v10282_v53 = vpack.c.bf16 %v8745_v52, %v8744_v51 }
 0xf18   :  { %v8116_v54 = vadd.f32 %v8114_v2, %v11391_v1  ;;  %v8730_v1 = vld [vmem:[%s12105_s14 + $0x20] sm:$0xff] }
 0xf19   :  { %v10262_v23 = vpack.c.bf16 %v8731_v21, %v8730_v1  ;;  %10283 = vmatprep.subr.bf16.mxu1 %v10282_v53 }
 0xf1a   :  { %v8124_v3 = vsel %vm73_vm0, %v8116_v54, 0.0  ;;  %10285 = vmatpush3.bf16.msra.mxu1 %v10282_v53 }
 0xf1b   :  { %8125 = vadd.xlane.f32.xlu1 %v8124_v3  ;;  %10263 = vmatprep.subr.bf16.mxu0 %v10262_v23 }
 0xf1c   :  { %10265 = vmatpush3.bf16.msra.mxu0 %v10262_v23 }
 0xf1d   :  { %10267 = vmatprep.subr.bf16.mxu0 %v10266_v25 }
 0xf20   :  { %10269 = vmatpush3.bf16.msra.mxu0 %v10266_v25 }
 0xf98   :  { %v8123_v16 = vpop.xlane.xlu0 %8122 }
 0xf99   :  { %v8127_v22 = vmul.f32 0.03125, %v8123_v16 }
 0xf9b   :  { %v8129_v19 = vsub.f32 %v8115_v7, %v8127_v22 }
 0xf9d   :  { %v8131_v15 = vmul.f32 %v8129_v19, %v8129_v19 }
 0xf9f   :  { %v8133_v49 = vsel %vm73_vm0, %v8131_v15, 0.0 }
 0xfa0   :  { %8134 = vadd.xlane.f32.xlu0 %v8133_v49 }
 0xfa8   :  { %v8126_v5 = vpop.xlane.xlu1 %8125 }
 0xfa9   :  { %v8128_v12 = vmul.f32 0.03125, %v8126_v5 }
 0xfab   :  { %v8130_v14 = vsub.f32 %v8116_v54, %v8128_v12 }
 0xfad   :  { %v8132_v18 = vmul.f32 %v8130_v14, %v8130_v14 }
 0xfaf   :  { %v8136_v20 = vsel %vm73_vm0, %v8132_v18, 0.0 }
 0xfb0   :  { %8137 = vadd.xlane.f32.xlu1 %v8136_v20 }
0x102d   :  { %v8135_v36 = vpop.xlane.xlu0 %8134 }
0x102e   :  { %v8139_v37 = vmul.f32 0.03125, %v8135_v36 }
0x1030   :  { %v8141_v38 = vadd.f32 1e-05, %v8139_v37 }
0x1032   :  { %10368 = vrsqrt.f32 %v8141_v38 }
0x103c   :  { %v10369_v39 = vpop.eup %10368 }
0x103d   :  { %v8138_v41 = vpop.xlane.xlu1 %8137  ;;  %v8145_v42 = vmul.f32 %v10369_v39, %v8129_v19 }
0x103e   :  { %v8140_v43 = vmul.f32 0.03125, %v8138_v41 }
0x103f   :  { %v8153_v45 = vmul.f32 %v8728_v40, %v8145_v42 }
0x1040   :  { %v8142_v46 = vadd.f32 1e-05, %v8140_v43 }
0x1041   :  { %v8161_v47 = vadd.f32 %v8729_v44, %v8153_v45 }
0x1042   :  { %10370 = vrsqrt.f32 %v8142_v46 }
0x1043   :  { %9928 = vmatprep.mubr.msk.f32.mxu0 %vm73_vm0, %v8161_v47 }
0x104c   :  { %v10371_v48 = vpop.eup %10370 }
0x104d   :  { %v8146_v50 = vmul.f32 %v10371_v48, %v8130_v14 }
0x104f   :  { %v8154_v30 = vmul.f32 %v8728_v40, %v8146_v50 }
0x1051   :  { %v8162_v11 = vadd.f32 %v8729_v44, %v8154_v30 }
0x1053   :  { %9929 = vmatmul.mubr.msk.f32.vlgmr.msra.gmra.mrb[100].mxu0 %vm73_vm0, %v8162_v11 }
0x1126   :  { %v9930_v4 = vpop.f32.mrb[100].mxu0 }
0x1127   :  { %v8254_v55 = vadd.f32 %v9930_v4, %v8735_v6  ;;  %v8248_v56 = vpop.f32.mrb[101].mxu0 }
0x1128   :  { %v8249_v7 = vadd.f32 %v8735_v6, %v8248_v56 }
0x1129   :  { %v8258_v58 = vmax.f32 %v8254_v55, 0.0 }
0x112a   :  { %v8257_v57 = vmax.f32 %v8249_v7, 0.0 }
0x112c   :  { %9947 = vmatprep.mubr.msk.f32.mxu1 %vm4126_vm3, %v8257_v57 }
0x112d   :  { %9948 = vmatmul.mubr.msk.f32.vlgmr.msra.gmra.mrb[96].mxu1 %vm4126_vm3, %v8258_v58 }
0x1200   :  { %v9949_v8 = vpop.f32.mrb[96].mxu1 }
0x1201   :  { %v8354_v9 = vadd.f32 %v9949_v8, %v8747_v59  ;;  %v8348_v60 = vpop.f32.mrb[97].mxu1 }
0x1202   :  { %v8349_v61 = vadd.f32 %v8747_v59, %v8348_v60 }
0x1203   :  { %v8358_v10 = vadd.f32 %v8354_v9, %v8162_v11 }
0x1204   :  { %v8357_v62 = vadd.f32 %v8349_v61, %v8161_v47 }
0x1205   :  { %v8366_v63 = vsel %vm73_vm0, %v8358_v10, 0.0 }
0x1206   :  { %8367 = vadd.xlane.f32.xlu1 %v8366_v63  ;;  %v8363_v17 = vsel %vm73_vm0, %v8357_v62, 0.0 }
0x1207   :  { %8364 = vadd.xlane.f32.xlu0 %v8363_v17 }
0x1293   :  { %v8368_v0 = vpop.xlane.xlu1 %8367 }
0x1294   :  { %v8370_v2 = vmul.f32 0.03125, %v8368_v0  ;;  %v8365_v54 = vpop.xlane.xlu0 %8364 }
0x1295   :  { %v8369_v3 = vmul.f32 0.03125, %v8365_v54 }
0x1296   :  { %v8372_v16 = vsub.f32 %v8358_v10, %v8370_v2 }
0x1297   :  { %v8371_v22 = vsub.f32 %v8357_v62, %v8369_v3 }
0x1298   :  { %v8374_v19 = vmul.f32 %v8372_v16, %v8372_v16 }
0x1299   :  { %v8373_v15 = vmul.f32 %v8371_v22, %v8371_v22 }
0x129a   :  { %v8378_v49 = vsel %vm73_vm0, %v8374_v19, 0.0 }
0x129b   :  { %8379 = vadd.xlane.f32.xlu1 %v8378_v49  ;;  %v8375_v5 = vsel %vm73_vm0, %v8373_v15, 0.0 }
0x129c   :  { %8376 = vadd.xlane.f32.xlu0 %v8375_v5 }
0x1328   :  { %v8380_v12 = vpop.xlane.xlu1 %8379 }
0x1329   :  { %v8382_v14 = vmul.f32 0.03125, %v8380_v12  ;;  %v8377_v18 = vpop.xlane.xlu0 %8376 }
0x132a   :  { %v8381_v20 = vmul.f32 0.03125, %v8377_v18 }
0x132b   :  { %v8384_v1 = vadd.f32 1e-05, %v8382_v14 }
0x132c   :  { %v8383_v21 = vadd.f32 1e-05, %v8381_v20 }
0x132d   :  { %10372 = vrsqrt.f32 %v8384_v1 }
0x132e   :  { %10374 = vrsqrt.f32 %v8383_v21 }
0x1337   :  { %v10373_v23 = vpop.eup %10372 }
0x1338   :  { %v10375_v24 = vpop.eup %10374  ;;  %v8388_v25 = vmul.f32 %v10373_v23, %v8372_v16 }
0x1339   :  { %v8387_v26 = vmul.f32 %v10375_v24, %v8371_v22 }
0x133a   :  { %v8396_v28 = vmul.f32 %v8752_v13, %v8388_v25 }
0x133b   :  { %v8395_v29 = vmul.f32 %v8752_v13, %v8387_v26 }
0x133c   :  { %v8404_v31 = vadd.f32 %v8753_v27, %v8396_v28 }
0x133d   :  { %v8403_v32 = vadd.f32 %v8753_v27, %v8395_v29 }
0x133e   :  { %8406 = vst.msk [vmem:[#allocation2 + $0x8] sm:$0xff] %vm73_vm0, %v8404_v31 }
0x133f   :  { %8405 = vst.msk [vmem:[#allocation2] sm:$0xff] %vm73_vm0, %v8403_v32 }
0x1340   :  { %10387 = shalt.err (!%p10384_p4)
}
0x1341   :  { %s10388_s6 = scalar_lea.hbm %s12111_s20, 256 }
0x1342   :  { %p10389_p5 = scmp.ne.s32.totalorder %s12111_s20, %s10388_s6  ;;  %p10392_p6 = scmp.lt.u32.totalorder %s10388_s6, %s12111_s20 }
0x1344   :  { %p10394_p7 = pnand %p10392_p6, %p10389_p5 }
0x1346   :  { %10397 = shalt.err (!%p10394_p7)
}
0x1347   :  { %s10404_s14 = smov 128   ;;  %s10405_s28 = smov 8  }
0x1348   :  { %8418 = dma.vmem_to_hbm [thread:$0]  %s8413_s3, 256, %s12111_s20, [#allocation3], %s10404_s14, %s10404_s14, %s10405_s28  }
0x1349   :  { %10398 = dma.done.wait [#allocation3], 256  }
0x134a   :  { %10399 = vsyncadd [#allocation3], 4294967040 }
0x134b   :  { %8422 = vsyncpa [#allocation3], 1 }

</bundles_post_ra>
